<compile_context>
chip_gen: v6e
topology: v6e:2x2x1
jax: 0.10.0
libtpu: 0.0.40
codegen_flags: <defaults>
</compile_context>

<pallas_src>
import jax
import jax.numpy as jnp
import numpy as np
from jax.experimental import pallas as pl
from jax.experimental.pallas import tpu as pltpu

# ----------------------------- hyper-parameters ------------------------------
N_MELS = 80          # SpeakerNet default n_mels=80
EMB_DIM = 192        # SpeakerNet default emb_dim=192
CHANNELS = 128       # TDNN width (small stand-in for ECAPA C=512/1024)
FRAME_LEN = 100      # waveform samples per frame
N_FRAMES = 16        # time steps after framing
WAV_LEN = FRAME_LEN * N_FRAMES

# lane-padded sizes used inside the kernel (multiples of 128)
FRAME_PAD = 128
MEL_PAD = 128
EMB_PAD = 256

B_UTT = 16           # utterances processed per grid step (M = B_UTT * N_FRAMES = 256)


# ------------------------------- kernel helpers ------------------------------
def _conv_relu(x, w_flat, b, dilation):
    """'same'-padded dilated Conv1d over time + ReLU, as a single im2col matmul.

    x:      (B, T, Cin)  f32 time-major activations.
    w_flat: (k*Cin, Cout) bf16  == PyTorch Conv1d weight (Cout, Cin, k)
            transposed to (k, Cin, Cout) and flattened (tap-major).
    b:      (1, Cout) f32.
    """
    B, T, Cin = x.shape
    Cout = w_flat.shape[1]
    k = w_flat.shape[0] // Cin
    pad = ((k - 1) // 2) * dilation

    # Zero-pad the time axis with an 8-sublane-aligned block on each side, then
    # take k static time slices (XLU sublane shifts, no extra MXU work).
    z = jnp.zeros((B, 8, Cin), jnp.float32)
    xp = jnp.concatenate([z, x, z], axis=1)                        # (B, T+16, Cin)
    cols = [xp[:, 8 - pad + j * dilation: 8 - pad + j * dilation + T, :]
            for j in range(k)]
    xcol = jnp.concatenate(cols, axis=-1).reshape(B * T, k * Cin)  # (B*T, k*Cin)

    y = jnp.dot(xcol.astype(jnp.bfloat16), w_flat,
                preferred_element_type=jnp.float32) + b            # (B*T, Cout) f32
    return jnp.maximum(y, 0.0).reshape(B, T, Cout)


def speaker_kernel(frames_ref, wfb_ref, bfb_ref,
                   w1_ref, b1_ref, w2_ref, b2_ref, w3_ref, b3_ref,
                   wlin_ref, blin_ref, out_ref):
    """B_UTT utterances per grid step.  frames_ref: (B, T, FRAME_PAD) bf16."""
    B = frames_ref.shape[0]
    T = frames_ref.shape[1]

    # Front-end: learned projection + ReLU standing in for the fbank / SSL
    # feature extractor.
    # TODO(synk): true fbank (STFT + mel filterbank) / wavlm SSL extractor has
    #             no clean Pallas equivalent here.
    x = frames_ref[...].reshape(B * T, FRAME_PAD)                  # bf16 (B*T, 128)
    feat = jnp.maximum(
        jnp.dot(x, wfb_ref[...], preferred_element_type=jnp.float32)
        + bfb_ref[...], 0.0)                                       # f32 (B*T, MEL_PAD)
    feat = feat.reshape(B, T, MEL_PAD)

    # TDNN stack (Conv1d + ReLU), increasing dilation like ECAPA-TDNN.
    h = _conv_relu(feat, w1_ref[...], b1_ref[...], 1)
    h = _conv_relu(h, w2_ref[...], b2_ref[...], 2)
    h = _conv_relu(h, w3_ref[...], b3_ref[...], 3)                 # (B, T, C) f32

    # Statistics pooling over time: concat(mean, std)  -- kept in f32.
    mean = jnp.mean(h, axis=1)                                     # (B, C)
    var = jnp.mean((h - mean[:, None, :]) ** 2, axis=1)            # (B, C)
    std = jnp.sqrt(var + 1e-6)
    pooled = jnp.concatenate([mean, std], axis=-1)                 # (B, 2C)

    # Final embedding Linear (one (B, 2C) @ (2C, EMB_PAD) matmul per step).
    emb = jnp.dot(pooled.astype(jnp.bfloat16), wlin_ref[...],
                  preferred_element_type=jnp.float32) + blin_ref[...]
    out_ref[...] = emb                                             # (B, EMB_PAD) f32


# --------------------------------- wrapper ------------------------------------
def _const_spec(shape):
    nd = len(shape)
    return pl.BlockSpec(shape, lambda i, _nd=nd: (0,) * _nd)


def _prep_kernel_weights(p):
    """Pad lane dims to 128-multiples, flatten conv weights, cast MXU operands."""
    f32 = jnp.float32
    bf16 = jnp.bfloat16
    w_fb = jnp.zeros((FRAME_PAD, MEL_PAD), f32).at[:FRAME_LEN, :N_MELS].set(p['w_fb'])
    b_fb = jnp.zeros((1, MEL_PAD), f32).at[:, :N_MELS].set(p['b_fb'])
    w1 = jnp.zeros((5, MEL_PAD, CHANNELS), f32).at[:, :N_MELS, :].set(p['w1'])
    w1 = w1.reshape(5 * MEL_PAD, CHANNELS)
    w2 = p['w2'].reshape(3 * CHANNELS, CHANNELS)
    w3 = p['w3'].reshape(3 * CHANNELS, CHANNELS)
    w_lin = jnp.zeros((2 * CHANNELS, EMB_PAD), f32).at[:, :EMB_DIM].set(p['w_lin'])
    b_lin = jnp.zeros((1, EMB_PAD), f32).at[:, :EMB_DIM].set(p['b_lin'])
    return (w_fb.astype(bf16), b_fb,
            w1.astype(bf16), p['b1'],
            w2.astype(bf16), p['b2'],
            w3.astype(bf16), p['b3'],
            w_lin.astype(bf16), b_lin)


@jax.jit
def speakernet_forward(data, params):
    """SpeakerNet.forward with label=None: returns (N, EMB_DIM) embeddings."""
    # data.reshape(-1, data.size()[-1])
    wav = data.reshape(-1, data.shape[-1]).astype(jnp.float32)          # (N, L)
    n = wav.shape[0]
    frames = wav.reshape(n, N_FRAMES, FRAME_LEN)                        # framing (glue)

    # Pad batch to a multiple of B_UTT and frame samples to 128 lanes.
    n_pad = ((n + B_UTT - 1) // B_UTT) * B_UTT
    frames = jnp.pad(frames, ((0, n_pad - n), (0, 0), (0, FRAME_PAD - FRAME_LEN)))
    frames = frames.astype(jnp.bfloat16)                                # halve DMA bytes

    weights = _prep_kernel_weights(params)
    grid = (n_pad // B_UTT,)

    out = pl.pallas_call(
        speaker_kernel,
        out_shape=jax.ShapeDtypeStruct((n_pad, EMB_PAD), jnp.float32),
        grid_spec=pltpu.PrefetchScalarGridSpec(
            num_scalar_prefetch=0,
            grid=grid,
            in_specs=[pl.BlockSpec((B_UTT, N_FRAMES, FRAME_PAD),
                                   lambda i: (i, 0, 0))]
                     + [_const_spec(w.shape) for w in weights],
            out_specs=pl.BlockSpec((B_UTT, EMB_PAD), lambda i: (i, 0)),
        ),
        compiler_params=pltpu.CompilerParams(
            dimension_semantics=("parallel",)),
    )(frames, *weights)
    return out[:n, :EMB_DIM]


# TODO(synk): the label != None branch of SpeakerNet.forward calls a dynamically
#             imported LossFunction (loss.<trainfunc>); not available here.


# ------------------------- deterministic parameter init -----------------------
def init_params(key):
    ks = jax.random.split(key, 6)

    def dense(k, shape, scale=0.05):
        return (jax.random.normal(k, shape, jnp.float32) * scale)

    return {
        'w_fb':  dense(ks[0], (FRAME_LEN, N_MELS)),
        'b_fb':  jnp.zeros((1, N_MELS), jnp.float32),
        'w1':    dense(ks[1], (5, N_MELS, CHANNELS)),       # Conv1d k=5, dil=1
        'b1':    jnp.zeros((1, CHANNELS), jnp.float32),
        'w2':    dense(ks[2], (3, CHANNELS, CHANNELS)),     # Conv1d k=3, dil=2
        'b2':    jnp.zeros((1, CHANNELS), jnp.float32),
        'w3':    dense(ks[3], (3, CHANNELS, CHANNELS)),     # Conv1d k=3, dil=3
        'b3':    jnp.zeros((1, CHANNELS), jnp.float32),
        'w_lin': dense(ks[4], (2 * CHANNELS, EMB_DIM)),     # Linear 2C -> emb
        'b_lin': jnp.zeros((1, EMB_DIM), jnp.float32),
    }


# ----------------------------- pure-JAX reference ------------------------------
def _ref_conv(x, w, dil):
    # x: (N, T, Cin), w: (k, Cin, Cout)
    k = w.shape[0]
    pad = ((k - 1) // 2) * dil
    T = x.shape[1]
    xp = jnp.pad(x, ((0, 0), (pad, pad), (0, 0)))
    y = 0.0
    for j in range(k):
        y = y + jnp.einsum('ntc,cd->ntd', xp[:, j * dil:j * dil + T, :], w[j])
    return y


def reference_forward(data, p):
    wav = data.reshape(-1, data.shape[-1]).astype(jnp.float32)
    n = wav.shape[0]
    frames = wav.reshape(n, N_FRAMES, FRAME_LEN)
    feat = jax.nn.relu(jnp.einsum('ntf,fm->ntm', frames, p['w_fb']) + p['b_fb'])
    h = jax.nn.relu(_ref_conv(feat, p['w1'], 1) + p['b1'])
    h = jax.nn.relu(_ref_conv(h, p['w2'], 2) + p['b2'])
    h = jax.nn.relu(_ref_conv(h, p['w3'], 3) + p['b3'])
    mean = h.mean(axis=1)
    std = jnp.sqrt(((h - mean[:, None, :]) ** 2).mean(axis=1) + 1e-6)
    pooled = jnp.concatenate([mean, std], axis=-1)
    return pooled @ p['w_lin'] + p['b_lin']


# ------------------------------------ main -------------------------------------
if __name__ == "__main__":
    key = jax.random.PRNGKey(0)
    k_data, k_par = jax.random.split(key)
    params = init_params(k_par)

    # SpeakerNet input: (batch, utterances_per_sample, wav_len); forward flattens
    # the leading dims to (N, wav_len).  N=32 -> 2 grid steps of 16 utterances.
    data = jax.random.normal(k_data, (4, 8, WAV_LEN), jnp.float32)

    out = speakernet_forward(data, params)            # label=None path
    out = jax.block_until_ready(out)
    assert out.shape == (32, EMB_DIM), out.shape

    ref = jax.block_until_ready(reference_forward(data, params))
    # bf16 MXU operands vs. f32 reference -> slightly looser tolerance.
    np.testing.assert_allclose(np.asarray(out), np.asarray(ref),
                               rtol=5e-2, atol=5e-2)

    print("KERNEL_OK")
</pallas_src>

<mosaic_0001>
module attributes {stable_mosaic.version = 11 : i64} {
  func.func @speaker_kernel(%arg0: i32, %arg1: memref<16x16x128xbf16, #tpu.memory_space<vmem>>, %arg2: memref<128x128xbf16, #tpu.memory_space<vmem>>, %arg3: memref<1x128xf32, #tpu.memory_space<vmem>>, %arg4: memref<640x128xbf16, #tpu.memory_space<vmem>>, %arg5: memref<1x128xf32, #tpu.memory_space<vmem>>, %arg6: memref<384x128xbf16, #tpu.memory_space<vmem>>, %arg7: memref<1x128xf32, #tpu.memory_space<vmem>>, %arg8: memref<384x128xbf16, #tpu.memory_space<vmem>>, %arg9: memref<1x128xf32, #tpu.memory_space<vmem>>, %arg10: memref<256x256xbf16, #tpu.memory_space<vmem>>, %arg11: memref<1x256xf32, #tpu.memory_space<vmem>>, %arg12: memref<16x256xf32, #tpu.memory_space<vmem>>) attributes {dimension_semantics = [#tpu.dimension_semantics<parallel>], iteration_bounds = array<i64: 2>, scalar_prefetch = 0 : i64, scratch_operands = 0 : i64, tpu.core_type = #tpu.core_type<tc>, window_params = [{transform_indices = @transform_0, window_bounds = array<i64: 16, 16, 128>}, {pipeline_mode = #tpu.pipeline_mode<synchronous>, transform_indices = @transform_1, window_bounds = array<i64: 128, 128>}, {pipeline_mode = #tpu.pipeline_mode<synchronous>, transform_indices = @transform_2, window_bounds = array<i64: 1, 128>}, {pipeline_mode = #tpu.pipeline_mode<synchronous>, transform_indices = @transform_3, window_bounds = array<i64: 640, 128>}, {pipeline_mode = #tpu.pipeline_mode<synchronous>, transform_indices = @transform_4, window_bounds = array<i64: 1, 128>}, {pipeline_mode = #tpu.pipeline_mode<synchronous>, transform_indices = @transform_5, window_bounds = array<i64: 384, 128>}, {pipeline_mode = #tpu.pipeline_mode<synchronous>, transform_indices = @transform_6, window_bounds = array<i64: 1, 128>}, {pipeline_mode = #tpu.pipeline_mode<synchronous>, transform_indices = @transform_7, window_bounds = array<i64: 384, 128>}, {pipeline_mode = #tpu.pipeline_mode<synchronous>, transform_indices = @transform_8, window_bounds = array<i64: 1, 128>}, {pipeline_mode = #tpu.pipeline_mode<synchronous>, transform_indices = @transform_9, window_bounds = array<i64: 256, 256>}, {pipeline_mode = #tpu.pipeline_mode<synchronous>, transform_indices = @transform_10, window_bounds = array<i64: 1, 256>}, {transform_indices = @transform_11, window_bounds = array<i64: 16, 256>}]} {
    %c0 = arith.constant 0 : index
    %c0_0 = arith.constant 0 : index
    %c0_1 = arith.constant 0 : index
    %0 = vector.load %arg1[%c0, %c0_0, %c0_1] : memref<16x16x128xbf16, #tpu.memory_space<vmem>>, vector<16x16x128xbf16>
    %1 = vector.shape_cast %0 : vector<16x16x128xbf16> to vector<256x128xbf16>
    %c0_2 = arith.constant 0 : index
    %c0_3 = arith.constant 0 : index
    %2 = vector.load %arg2[%c0_2, %c0_3] : memref<128x128xbf16, #tpu.memory_space<vmem>>, vector<128x128xbf16>
    %cst = arith.constant dense<0.000000e+00> : vector<256x128xf32>
    %3 = tpu.matmul %1, %2, %cst {dimension_numbers = #tpu.dot_dimension_numbers<[1], [0], [0], [1], [0, 0, 1, 1], [], []>} : vector<256x128xbf16>, vector<128x128xbf16>, vector<256x128xf32> -> vector<256x128xf32>
    %c0_4 = arith.constant 0 : index
    %c0_5 = arith.constant 0 : index
    %4 = vector.load %arg3[%c0_4, %c0_5] : memref<1x128xf32, #tpu.memory_space<vmem>>, vector<1x128xf32>
    %5 = vector.broadcast %4 : vector<1x128xf32> to vector<256x128xf32>
    %6 = arith.addf %3, %5 : vector<256x128xf32>
    %cst_6 = arith.constant 0.000000e+00 : f32
    %7 = vector.broadcast %cst_6 : f32 to vector<256x128xf32>
    %8 = arith.maximumf %6, %7 : vector<256x128xf32>
    %9 = vector.shape_cast %8 : vector<256x128xf32> to vector<16x16x128xf32>
    %c0_7 = arith.constant 0 : index
    %c0_8 = arith.constant 0 : index
    %10 = vector.load %arg4[%c0_7, %c0_8] : memref<640x128xbf16, #tpu.memory_space<vmem>>, vector<640x128xbf16>
    %c0_9 = arith.constant 0 : index
    %c0_10 = arith.constant 0 : index
    %11 = vector.load %arg5[%c0_9, %c0_10] : memref<1x128xf32, #tpu.memory_space<vmem>>, vector<1x128xf32>
    %cst_11 = arith.constant 0.000000e+00 : f32
    %12 = vector.broadcast %cst_11 : f32 to vector<16x8x128xf32>
    %13 = tpu.concatenate %12, %9, %12 in 1 : vector<16x8x128xf32>, vector<16x16x128xf32>, vector<16x8x128xf32> -> vector<16x32x128xf32>
    %14 = vector.extract_strided_slice %13 {offsets = [0, 6, 0], sizes = [16, 16, 128], strides = [1, 1, 1]} : vector<16x32x128xf32> to vector<16x16x128xf32>
    %15 = vector.extract_strided_slice %13 {offsets = [0, 7, 0], sizes = [16, 16, 128], strides = [1, 1, 1]} : vector<16x32x128xf32> to vector<16x16x128xf32>
    %16 = vector.extract_strided_slice %13 {offsets = [0, 8, 0], sizes = [16, 16, 128], strides = [1, 1, 1]} : vector<16x32x128xf32> to vector<16x16x128xf32>
    %17 = vector.extract_strided_slice %13 {offsets = [0, 9, 0], sizes = [16, 16, 128], strides = [1, 1, 1]} : vector<16x32x128xf32> to vector<16x16x128xf32>
    %18 = vector.extract_strided_slice %13 {offsets = [0, 10, 0], sizes = [16, 16, 128], strides = [1, 1, 1]} : vector<16x32x128xf32> to vector<16x16x128xf32>
    %19 = tpu.concatenate %14, %15, %16, %17, %18 in 2 : vector<16x16x128xf32>, vector<16x16x128xf32>, vector<16x16x128xf32>, vector<16x16x128xf32>, vector<16x16x128xf32> -> vector<16x16x640xf32>
    %20 = vector.shape_cast %19 : vector<16x16x640xf32> to vector<256x640xf32>
    %21 = arith.truncf %20 : vector<256x640xf32> to vector<256x640xbf16>
    %cst_12 = arith.constant dense<0.000000e+00> : vector<256x128xf32>
    %22 = tpu.matmul %21, %10, %cst_12 {dimension_numbers = #tpu.dot_dimension_numbers<[1], [0], [0], [1], [0, 0, 1, 1], [], []>} : vector<256x640xbf16>, vector<640x128xbf16>, vector<256x128xf32> -> vector<256x128xf32>
    %23 = vector.broadcast %11 : vector<1x128xf32> to vector<256x128xf32>
    %24 = arith.addf %22, %23 : vector<256x128xf32>
    %cst_13 = arith.constant 0.000000e+00 : f32
    %25 = vector.broadcast %cst_13 : f32 to vector<256x128xf32>
    %26 = arith.maximumf %24, %25 : vector<256x128xf32>
    %27 = vector.shape_cast %26 : vector<256x128xf32> to vector<16x16x128xf32>
    %c0_14 = arith.constant 0 : index
    %c0_15 = arith.constant 0 : index
    %28 = vector.load %arg6[%c0_14, %c0_15] : memref<384x128xbf16, #tpu.memory_space<vmem>>, vector<384x128xbf16>
    %c0_16 = arith.constant 0 : index
    %c0_17 = arith.constant 0 : index
    %29 = vector.load %arg7[%c0_16, %c0_17] : memref<1x128xf32, #tpu.memory_space<vmem>>, vector<1x128xf32>
    %cst_18 = arith.constant 0.000000e+00 : f32
    %30 = vector.broadcast %cst_18 : f32 to vector<16x8x128xf32>
    %31 = tpu.concatenate %30, %27, %30 in 1 : vector<16x8x128xf32>, vector<16x16x128xf32>, vector<16x8x128xf32> -> vector<16x32x128xf32>
    %32 = vector.extract_strided_slice %31 {offsets = [0, 6, 0], sizes = [16, 16, 128], strides = [1, 1, 1]} : vector<16x32x128xf32> to vector<16x16x128xf32>
    %33 = vector.extract_strided_slice %31 {offsets = [0, 8, 0], sizes = [16, 16, 128], strides = [1, 1, 1]} : vector<16x32x128xf32> to vector<16x16x128xf32>
    %34 = vector.extract_strided_slice %31 {offsets = [0, 10, 0], sizes = [16, 16, 128], strides = [1, 1, 1]} : vector<16x32x128xf32> to vector<16x16x128xf32>
    %35 = tpu.concatenate %32, %33, %34 in 2 : vector<16x16x128xf32>, vector<16x16x128xf32>, vector<16x16x128xf32> -> vector<16x16x384xf32>
    %36 = vector.shape_cast %35 : vector<16x16x384xf32> to vector<256x384xf32>
    %37 = arith.truncf %36 : vector<256x384xf32> to vector<256x384xbf16>
    %cst_19 = arith.constant dense<0.000000e+00> : vector<256x128xf32>
    %38 = tpu.matmul %37, %28, %cst_19 {dimension_numbers = #tpu.dot_dimension_numbers<[1], [0], [0], [1], [0, 0, 1, 1], [], []>} : vector<256x384xbf16>, vector<384x128xbf16>, vector<256x128xf32> -> vector<256x128xf32>
    %39 = vector.broadcast %29 : vector<1x128xf32> to vector<256x128xf32>
    %40 = arith.addf %38, %39 : vector<256x128xf32>
    %cst_20 = arith.constant 0.000000e+00 : f32
    %41 = vector.broadcast %cst_20 : f32 to vector<256x128xf32>
    %42 = arith.maximumf %40, %41 : vector<256x128xf32>
    %43 = vector.shape_cast %42 : vector<256x128xf32> to vector<16x16x128xf32>
    %c0_21 = arith.constant 0 : index
    %c0_22 = arith.constant 0 : index
    %44 = vector.load %arg8[%c0_21, %c0_22] : memref<384x128xbf16, #tpu.memory_space<vmem>>, vector<384x128xbf16>
    %c0_23 = arith.constant 0 : index
    %c0_24 = arith.constant 0 : index
    %45 = vector.load %arg9[%c0_23, %c0_24] : memref<1x128xf32, #tpu.memory_space<vmem>>, vector<1x128xf32>
    %cst_25 = arith.constant 0.000000e+00 : f32
    %46 = vector.broadcast %cst_25 : f32 to vector<16x8x128xf32>
    %47 = tpu.concatenate %46, %43, %46 in 1 : vector<16x8x128xf32>, vector<16x16x128xf32>, vector<16x8x128xf32> -> vector<16x32x128xf32>
    %48 = vector.extract_strided_slice %47 {offsets = [0, 5, 0], sizes = [16, 16, 128], strides = [1, 1, 1]} : vector<16x32x128xf32> to vector<16x16x128xf32>
    %49 = vector.extract_strided_slice %47 {offsets = [0, 8, 0], sizes = [16, 16, 128], strides = [1, 1, 1]} : vector<16x32x128xf32> to vector<16x16x128xf32>
    %50 = vector.extract_strided_slice %47 {offsets = [0, 11, 0], sizes = [16, 16, 128], strides = [1, 1, 1]} : vector<16x32x128xf32> to vector<16x16x128xf32>
    %51 = tpu.concatenate %48, %49, %50 in 2 : vector<16x16x128xf32>, vector<16x16x128xf32>, vector<16x16x128xf32> -> vector<16x16x384xf32>
    %52 = vector.shape_cast %51 : vector<16x16x384xf32> to vector<256x384xf32>
    %53 = arith.truncf %52 : vector<256x384xf32> to vector<256x384xbf16>
    %cst_26 = arith.constant dense<0.000000e+00> : vector<256x128xf32>
    %54 = tpu.matmul %53, %44, %cst_26 {dimension_numbers = #tpu.dot_dimension_numbers<[1], [0], [0], [1], [0, 0, 1, 1], [], []>} : vector<256x384xbf16>, vector<384x128xbf16>, vector<256x128xf32> -> vector<256x128xf32>
    %55 = vector.broadcast %45 : vector<1x128xf32> to vector<256x128xf32>
    %56 = arith.addf %54, %55 : vector<256x128xf32>
    %cst_27 = arith.constant 0.000000e+00 : f32
    %57 = vector.broadcast %cst_27 : f32 to vector<256x128xf32>
    %58 = arith.maximumf %56, %57 : vector<256x128xf32>
    %59 = vector.shape_cast %58 : vector<256x128xf32> to vector<16x16x128xf32>
    %cst_28 = arith.constant dense<0.000000e+00> : vector<16x128xf32>
    %60 = vector.multi_reduction <add>, %59, %cst_28 [1] : vector<16x16x128xf32> to vector<16x128xf32>
    %cst_29 = arith.constant 1.600000e+01 : f32
    %61 = vector.broadcast %cst_29 : f32 to vector<16x128xf32>
    %62 = arith.divf %60, %61 : vector<16x128xf32>
    %63 = vector.shape_cast %62 : vector<16x128xf32> to vector<16x1x128xf32>
    %64 = vector.broadcast %63 : vector<16x1x128xf32> to vector<16x16x128xf32>
    %65 = arith.subf %59, %64 : vector<16x16x128xf32>
    %66 = arith.mulf %65, %65 : vector<16x16x128xf32>
    %cst_30 = arith.constant dense<0.000000e+00> : vector<16x128xf32>
    %67 = vector.multi_reduction <add>, %66, %cst_30 [1] : vector<16x16x128xf32> to vector<16x128xf32>
    %cst_31 = arith.constant 1.600000e+01 : f32
    %68 = vector.broadcast %cst_31 : f32 to vector<16x128xf32>
    %69 = arith.divf %67, %68 : vector<16x128xf32>
    %cst_32 = arith.constant 9.99999997E-7 : f32
    %70 = vector.broadcast %cst_32 : f32 to vector<16x128xf32>
    %71 = arith.addf %69, %70 : vector<16x128xf32>
    %72 = math.sqrt %71 : vector<16x128xf32>
    %73 = tpu.concatenate %62, %72 in 1 : vector<16x128xf32>, vector<16x128xf32> -> vector<16x256xf32>
    %74 = arith.truncf %73 : vector<16x256xf32> to vector<16x256xbf16>
    %c0_33 = arith.constant 0 : index
    %c0_34 = arith.constant 0 : index
    %75 = vector.load %arg10[%c0_33, %c0_34] : memref<256x256xbf16, #tpu.memory_space<vmem>>, vector<256x256xbf16>
    %cst_35 = arith.constant dense<0.000000e+00> : vector<16x256xf32>
    %76 = tpu.matmul %74, %75, %cst_35 {dimension_numbers = #tpu.dot_dimension_numbers<[1], [0], [0], [1], [0, 0, 1, 1], [], []>} : vector<16x256xbf16>, vector<256x256xbf16>, vector<16x256xf32> -> vector<16x256xf32>
    %c0_36 = arith.constant 0 : index
    %c0_37 = arith.constant 0 : index
    %77 = vector.load %arg11[%c0_36, %c0_37] : memref<1x256xf32, #tpu.memory_space<vmem>>, vector<1x256xf32>
    %78 = vector.broadcast %77 : vector<1x256xf32> to vector<16x256xf32>
    %79 = arith.addf %76, %78 : vector<16x256xf32>
    %c0_38 = arith.constant 0 : index
    %c0_39 = arith.constant 0 : index
    %80 = vector.load %arg12[%c0_38, %c0_39] : memref<16x256xf32, #tpu.memory_space<vmem>>, vector<16x256xf32>
    tpu.vector_store %arg12[%c0_38, %c0_39], %79 {strides = array<i32>} : memref<16x256xf32, #tpu.memory_space<vmem>>, vector<16x256xf32>,
    return
  }
  func.func @transform_0(%arg0: i32) -> (i32, i32, i32) {
    %c0_i32 = arith.constant 0 : i32
    %c0_i32_0 = arith.constant 0 : i32
    %c0_i32_1 = arith.constant 0 : i32
    return %arg0, %c0_i32, %c0_i32_0 : i32, i32, i32
  }
  func.func @transform_1(%arg0: i32) -> (i32, i32) {
    %c0_i32 = arith.constant 0 : i32
    %c0_i32_0 = arith.constant 0 : i32
    %c0_i32_1 = arith.constant 0 : i32
    return %c0_i32, %c0_i32_0 : i32, i32
  }
  func.func @transform_2(%arg0: i32) -> (i32, i32) {
    %c0_i32 = arith.constant 0 : i32
    %c0_i32_0 = arith.constant 0 : i32
    %c0_i32_1 = arith.constant 0 : i32
    return %c0_i32, %c0_i32_0 : i32, i32
  }
  func.func @transform_3(%arg0: i32) -> (i32, i32) {
    %c0_i32 = arith.constant 0 : i32
    %c0_i32_0 = arith.constant 0 : i32
    %c0_i32_1 = arith.constant 0 : i32
    return %c0_i32, %c0_i32_0 : i32, i32
  }
  func.func @transform_4(%arg0: i32) -> (i32, i32) {
    %c0_i32 = arith.constant 0 : i32
    %c0_i32_0 = arith.constant 0 : i32
    %c0_i32_1 = arith.constant 0 : i32
    return %c0_i32, %c0_i32_0 : i32, i32
  }
  func.func @transform_5(%arg0: i32) -> (i32, i32) {
    %c0_i32 = arith.constant 0 : i32
    %c0_i32_0 = arith.constant 0 : i32
    %c0_i32_1 = arith.constant 0 : i32
    return %c0_i32, %c0_i32_0 : i32, i32
  }
  func.func @transform_6(%arg0: i32) -> (i32, i32) {
    %c0_i32 = arith.constant 0 : i32
    %c0_i32_0 = arith.constant 0 : i32
    %c0_i32_1 = arith.constant 0 : i32
    return %c0_i32, %c0_i32_0 : i32, i32
  }
  func.func @transform_7(%arg0: i32) -> (i32, i32) {
    %c0_i32 = arith.constant 0 : i32
    %c0_i32_0 = arith.constant 0 : i32
    %c0_i32_1 = arith.constant 0 : i32
    return %c0_i32, %c0_i32_0 : i32, i32
  }
  func.func @transform_8(%arg0: i32) -> (i32, i32) {
    %c0_i32 = arith.constant 0 : i32
    %c0_i32_0 = arith.constant 0 : i32
    %c0_i32_1 = arith.constant 0 : i32
    return %c0_i32, %c0_i32_0 : i32, i32
  }
  func.func @transform_9(%arg0: i32) -> (i32, i32) {
    %c0_i32 = arith.constant 0 : i32
    %c0_i32_0 = arith.constant 0 : i32
    %c0_i32_1 = arith.constant 0 : i32
    return %c0_i32, %c0_i32_0 : i32, i32
  }
  func.func @transform_10(%arg0: i32) -> (i32, i32) {
    %c0_i32 = arith.constant 0 : i32
    %c0_i32_0 = arith.constant 0 : i32
    %c0_i32_1 = arith.constant 0 : i32
    return %c0_i32, %c0_i32_0 : i32, i32
  }
  func.func @transform_11(%arg0: i32) -> (i32, i32) {
    %c0_i32 = arith.constant 0 : i32
    %c0_i32_0 = arith.constant 0 : i32
    return %arg0, %c0_i32 : i32, i32
  }
}

</mosaic_0001>

<bundles_post_ra>
// kernel: speakernet_forward.1
= control target key start
LH: loop header
LB: loop body
LE: loop exit
PB: predicated region body
PF: predicated region fallthrough
CT: control target
= control target key end

     0   :  { %s10027_s0 = inlined_call_operand.vmem [shape: bf16[32,16,128], index: 0, kind: input, shape index: {}]   ;;  %s10028_s1 = inlined_call_operand.vmem [shape: bf16[128,128], index: 1, kind: input, shape index: {}]   ;;  %s10029_s2 = inlined_call_operand.vmem [shape: f32[1,128], index: 2, kind: input, shape index: {}]   ;;  %s10030_s3 = inlined_call_operand.vmem [shape: bf16[640,128], index: 3, kind: input, shape index: {}]   ;;  %s10031_s4 = inlined_call_operand.vmem [shape: f32[1,128], index: 4, kind: input, shape index: {}]   ;;  %s10032_s5 = inlined_call_operand.vmem [shape: bf16[384,128], index: 5, kind: input, shape index: {}]   ;;  %s10033_s6 = inlined_call_operand.vmem [shape: f32[1,128], index: 6, kind: input, shape index: {}]   ;;  %s10034_s7 = inlined_call_operand.vmem [shape: bf16[384,128], index: 7, kind: input, shape index: {}]   ;;  %s10035_s8 = inlined_call_operand.vmem [shape: f32[1,128], index: 8, kind: input, shape index: {}]   ;;  %s10036_s9 = inlined_call_operand.vmem [shape: bf16[256,256], index: 9, kind: input, shape index: {}]   ;;  %s10037_s10 = inlined_call_operand.vmem [shape: f32[1,256], index: 10, kind: input, shape index: {}]   ;;  %s10038_s11 = inlined_call_operand.hbm [shape: f32[32,256], index: 11, kind: output, shape index: {}]  }
   0x1   :  { %10075 = sst [smem:[#allocation41_spill]] %s10027_s0 }
   0x2   :  { %16 = vsyncpa [#allocation3], 0 }
   0x3   :  { %18 = vsyncpa [#allocation3 + $0x1], 0  ;;  %s6778_s17 = smov 0   ;;  %s6780_s18 = smov 0  }
   0x4   :  { %s6782_s19 = smov 0   ;;  %s6784_s20 = smov 0  }
   0x5 LB: > { %s6799_s21 = sadd.s32 4294967295, %s6712_s20   ;;  %s5514_s22 = sadd.s32 4294967294, %s6712_s20   ;;  %s6712_s20 = sphi %s6784_s20, %s10274_s20   ;;  %s6708_s19 = sphi %s6782_s19, %s10273_s19   ;;  %s6704_s18 = sphi %s6780_s18, %s10272_s18   ;;  %s6700_s17 = sphi %s6778_s17, %s10271_s17  }
   0x6   : > { %s6803_s23 = sadd.s32 1, %s6712_s20   ;;  %s267_s24 = sadd.s32 1, %s6708_s19 }
   0x7   : > { %s264_s25 = ssub.s32 %s6712_s20, %s6803_s23  ;;  %p277_p0 = scmp.ne.s32.totalorder %s6708_s19, %s6704_s18 }
   0x8   : > { %p265_p1 = scmp.eq.s32.totalorder %s264_s25, 0  ;;  %p278_p2 = scmp.eq.s32.totalorder %s6799_s21, 1 }
   0x9   : > { %p283_p3 = scmp.ne.s32.totalorder %s6704_s18, %s6700_s17  ;;  %p284_p4 = scmp.eq.s32.totalorder %s5514_s22, 1 }
   0xa   : > { %s6814_s26 = scalar_select %p265_p1, %s6708_s19, %s267_s24  }
   0xb   : > { %p6816_p5 = por %p278_p2, %p277_p0  ;;  %p6820_p6 = por %p284_p4, %p283_p3 }
   0xc   : > { %p5517_p7 = scmp.ge.s32.totalorder %s6712_s20, 1  ;;  %p342_p8 = scmp.lt.s32.totalorder %s6712_s20, 3 }
   0xe   : > { %p343_p9 = pnand %p5517_p7, %p342_p8 }
  0x10   : > { %346 = sbr.rel (%p343_p9) target bundleno = 1480 (0x5c8), region = 64 }
  0x15   : > { %v6457_v0 = vld [vmem:[%s10028_s1 + $0x38] sm:$0xff]   ;;  %s5519_s12 = sshll.u32 %s6799_s21, 4  ;;  %v6458_v1 = vld [vmem:[%s10028_s1 + $0x30] sm:$0xff]   ;;  %v6459_v2 = vld [vmem:[%s10028_s1 + $0x28] sm:$0xff]   ;;  %s10078_s0 = sld [smem:[#allocation41_spill]]  ;;  %vm898_vm0 = vcmask 1046528  }
  0x16   : > { %p384_p10 = scmp.lt.s32.totalorder %s5519_s12, 31  ;;  %6223 = vmatprep.subr.bf16.mxu0 %v6457_v0  ;;  %v6460_v3 = vld [vmem:[%s10028_s1 + $0x20] sm:$0xff]   ;;  %v6461_v5 = vld [vmem:[%s10028_s1 + $0x18] sm:$0xff]   ;;  %v6462_v6 = vld [vmem:[%s10028_s1 + $0x10] sm:$0xff]   ;;  %vm1145_vm1 = vcmask 1041408   ;;  %vm1013_vm2 = vcmask 1044480  }
  0x17   : > { %6224 = vmatpush3.bf16.msra.mxu0 %v6457_v0  ;;  %v6463_v7 = vld [vmem:[%s10028_s1 + $0x8] sm:$0xff]   ;;  %v6464_v8 = vld [vmem:[%s10028_s1] sm:$0xff]   ;;  %v6481_v9 = vld [vmem:[%s10030_s3 + $0x78] sm:$0xff]   ;;  %v10039_v0 = vmov 0.0   ;;  %vm964_vm3 = vcmask 1045504   ;;  %vm1079_vm4 = vcmask 1043456  }
  0x18   : > { %s10276_s12 = smov (!%p384_p10, %s5519_s12), 31  ;;  %6225 = vmatprep.subr.bf16.mxu0 %v6458_v1  ;;  %v6482_v10 = vld [vmem:[%s10030_s3 + $0x38] sm:$0xff]   ;;  %5703 = vmatprep.subr.bf16.mxu1 %v6481_v9  ;;  %v6485_v13 = vld [vmem:[%s10030_s3 + $0x70] sm:$0xff]   ;;  %v6489_v18 = vld [vmem:[%s10030_s3 + $0x68] sm:$0xff]   ;;  %vm3790_vm5 = vcmask 1042432   ;;  %vm5129_vm6 = vcmask 1041409  }
  0x19   : > { %s5676_s22 = sshll.u32 %s10276_s12, 3  ;;  %5704 = vmatpush3.bf16.msra.mxu1 %v6482_v10  ;;  %v6483_v11 = vld [vmem:[%s10030_s3 + $0xf8] sm:$0xff]   ;;  %v6486_v15 = vld [vmem:[%s10030_s3 + $0x30] sm:$0xff]   ;;  %v6490_v19 = vld [vmem:[%s10030_s3 + $0x28] sm:$0xff]   ;;  %vm5131_vm7 = vcmask 1042434   ;;  %vm5133_vm8 = vcmask 1043459  }
  0x1a   : > { %v6484_v16 = vld [vmem:[%s10030_s3 + $0xb8] sm:$0xff]   ;;  %5705 = vmatprep.subr.bf16.mxu1 %v6485_v13  ;;  %v6487_v17 = vld [vmem:[%s10030_s3 + $0xf0] sm:$0xff]   ;;  %v6491_v21 = vld [vmem:[%s10030_s3 + $0xe8] sm:$0xff]   ;;  %vm5135_vm13 = vcmask 1044484   ;;  %vm5137_vm14 = vcmask 1045509   ;;  %s5678_s12 = sshll.u32 %s6799_s21, 9 }
  0x1b   : > { %s6839_s29 = scalar_lea.vmem %s10078_s0, %s5676_s22  ;;  %6226 = vmatpush3.bf16.msra.mxu0 %v6458_v1  ;;  %v6488_v20 = vld [vmem:[%s10030_s3 + $0xb0] sm:$0xff]   ;;  %v6493_v23 = vld [vmem:[%s10030_s3 + $0x60] sm:$0xff]   ;;  %v6492_v25 = vld [vmem:[%s10030_s3 + $0xa8] sm:$0xff]   ;;  %v6984_v1 = vrot.slane %v10039_v0, 1  ;;  %s9985_s24 = scalar_lea.hbm %s10038_s11, %s5678_s12 }
  0x1c   : > { %6227 = vmatprep.subr.bf16.mxu0 %v6459_v2  ;;  %v6465_v4 = vld [vmem:[%s6839_s29] sm:$0xff]   ;;  %v6466_v12 = vld [vmem:[%s6839_s29 + $0x8] sm:$0xff]   ;;  %v6467_v14 = vld [vmem:[%s6839_s29 + $0x10] sm:$0xff]   ;;  %s6715_s21 = smov [#allocation2]  }
  0x1d   : > { %6239 = vmatprep.mubr.bf16.mxu0 %v6465_v4  ;;  %5706 = vmatpush3.bf16.msra.mxu1 %v6486_v15  ;;  %v6468_v22 = vld [vmem:[%s6839_s29 + $0x18] sm:$0xff]   ;;  %v6469_v24 = vld [vmem:[%s6839_s29 + $0x20] sm:$0xff]   ;;  %v6470_v26 = vld [vmem:[%s6839_s29 + $0x28] sm:$0xff]   ;;  %v6990_v4 = vrot.slane %v10039_v0, 6 }
  0x1e   : > { %5707 = vmatprep.subr.bf16.mxu1 %v6489_v18  ;;  %v6471_v27 = vld [vmem:[%s6839_s29 + $0x30] sm:$0xff]   ;;  %v6472_v28 = vld [vmem:[%s6839_s29 + $0x38] sm:$0xff]   ;;  %v6473_v29 = vld [vmem:[%s6839_s29 + $0x40] sm:$0xff]  }
  0x1f   : > { %6228 = vmatpush3.bf16.msra.mxu0 %v6459_v2  ;;  %v6474_v30 = vld [vmem:[%s6839_s29 + $0x48] sm:$0xff]   ;;  %v6475_v31 = vld [vmem:[%s6839_s29 + $0x50] sm:$0xff]   ;;  %v6476_v32 = vld [vmem:[%s6839_s29 + $0x58] sm:$0xff]   ;;  %10079 = vst [vmem:[#allocation5_spill] sm:$0xff] %v6990_v4 }
  0x20   : > { %6229 = vmatprep.subr.bf16.mxu0 %v6460_v3  ;;  %v6477_v33 = vld [vmem:[%s6839_s29 + $0x60] sm:$0xff]   ;;  %v6478_v34 = vld [vmem:[%s6839_s29 + $0x68] sm:$0xff]   ;;  %v6479_v35 = vld [vmem:[%s6839_s29 + $0x70] sm:$0xff]  }
  0x21   : > { %5708 = vmatpush3.bf16.msra.mxu1 %v6490_v19  ;;  %v6480_v36 = vld [vmem:[%s6839_s29 + $0x78] sm:$0xff]   ;;  %v6495_v37 = vld [vmem:[%s10030_s3 + $0xe0] sm:$0xff]   ;;  %v6501_v44 = vld [vmem:[%s10030_s3 + $0x50] sm:$0xff]   ;;  %s380_s29 = sand.u32 1, %s6704_s18  }
  0x22   : > { %5709 = vmatprep.subr.bf16.mxu1 %v6493_v23  ;;  %v6494_v38 = vld [vmem:[%s10030_s3 + $0x20] sm:$0xff]   ;;  %v6497_v40 = vld [vmem:[%s10030_s3 + $0x58] sm:$0xff]   ;;  %v6503_v45 = vld [vmem:[%s10030_s3 + $0xd0] sm:$0xff]   ;;  %s5518_s13 = sshll.u32 %s380_s29, 5  ;;  %s9987_s25 = scalar_lea.sflag [#allocation3], %s380_s29 }
  0x23   : > { %6230 = vmatpush3.bf16.msra.mxu0 %v6460_v3  ;;  %v6496_v39 = vld [vmem:[%s10030_s3 + $0xa0] sm:$0xff]   ;;  %v6499_v41 = vld [vmem:[%s10030_s3 + $0xd8] sm:$0xff]   ;;  %v6502_v46 = vld [vmem:[%s10030_s3 + $0x10] sm:$0xff]   ;;  %s382_s14 = scalar_lea.vmem [#allocation2], %s5518_s13  ;;  %s6656_s13 = sshll.u32 %s6715_s21, 4  ;;  %s6657_s13 = int_to_ptr.vmem [resolvable:$false] %s6656_s13 }
  0x24   : > { %6231 = vmatprep.subr.bf16.mxu0 %v6461_v5  ;;  %v6498_v42 = vld [vmem:[%s10030_s3 + $0x18] sm:$0xff]   ;;  %v6504_v47 = vld [vmem:[%s10030_s3 + $0x90] sm:$0xff]   ;;  %v6505_v48 = vld [vmem:[%s10030_s3 + $0x48] sm:$0xff]   ;;  %s5452_s15 = sshll.u32 %s382_s14, 4  ;;  %s6658_s0 = scalar_lea.vmem %s6657_s13, 1024  ;;  %s9980_s15 = int_to_ptr.vmem [resolvable:$true] %s5452_s15 }
  0x25   : > { %5710 = vmatpush3.bf16.msra.mxu1 %v6494_v38  ;;  %v6500_v43 = vld [vmem:[%s10030_s3 + $0x98] sm:$0xff]   ;;  %v6507_v49 = vld [vmem:[%s10030_s3 + $0xc8] sm:$0xff]   ;;  %v6509_v52 = vld [vmem:[%s10030_s3 + $0x40] sm:$0xff]   ;;  %s6652_s30 = scalar_lea.vmem %s9980_s15, 512  ;;  %p6659_p0 = scmp.lt.s32.totalorder %s9980_s15, %s6657_s13 }
  0x26   : > { %5711 = vmatprep.subr.bf16.mxu1 %v6497_v40  ;;  %v6506_v50 = vld [vmem:[%s10030_s3 + $0x8] sm:$0xff]   ;;  %v6511_v53 = vld [vmem:[%s10030_s3 + $0xc0] sm:$0xff]   ;;  %v6971_v56 = vld [vmem:[%s10030_s3 + $0x138] sm:$0xff]   ;;  %p6653_p11 = scmp.ne.s32.totalorder %s9980_s15, %s6652_s30  ;;  %p6660_p1 = scmp.lt.s32.totalorder %s6658_s0, %s6652_s30 }
  0x27   : > { %6232 = vmatpush3.bf16.msra.mxu0 %v6461_v5  ;;  %v6508_v51 = vld [vmem:[%s10030_s3 + $0x88] sm:$0xff]   ;;  %v6510_v54 = vld [vmem:[%s10030_s3] sm:$0xff]  }
  0x28   : > { %6233 = vmatprep.subr.bf16.mxu0 %v6462_v6  ;;  %v6512_v55 = vld [vmem:[%s10030_s3 + $0x80] sm:$0xff]   ;;  %p6654_p12 = pnand %p6653_p11, %p6816_p5  ;;  %p6661_p2 = por %p6660_p1, %p6659_p0 }
  0x29   : > { %5712 = vmatpush3.bf16.msra.mxu1 %v6498_v42  ;;  %v6977_v57 = vld [vmem:[%s10029_s2] ss:$0 sm:$0xff] }
  0x2a   : > { %5713 = vmatprep.subr.bf16.mxu1 %v6501_v44  ;;  %p6655_p13 = pneg %p6654_p12 }
  0x2b   : > { %6234 = vmatpush3.bf16.msra.mxu0 %v6462_v6 }
  0x2c   : > { %6235 = vmatprep.subr.bf16.mxu0 %v6463_v7  ;;  %p6662_p3 = pnand %p6661_p2, %p6655_p13 }
  0x2d   : > { %5714 = vmatpush3.bf16.msra.mxu1 %v6502_v46 }
  0x2e   : > { %5715 = vmatprep.subr.bf16.mxu1 %v6505_v48 }
  0x2f   : > { %6236 = vmatpush3.bf16.msra.mxu0 %v6463_v7 }
  0x30   : > { %6237 = vmatprep.subr.bf16.mxu0 %v6464_v8 }
  0x31   : > { %5716 = vmatpush3.bf16.msra.mxu1 %v6506_v50 }
  0x32   : > { %5717 = vmatprep.subr.bf16.mxu1 %v6509_v52 }
  0x33   : > { %6238 = vmatpush3.bf16.msra.mxu0 %v6464_v8  ;;  %v6995_v8 = vrot.slane %v10039_v0, 4 }
  0x34   : > { %5815 = vmatprep.subr.bf16.mxu0 %v6483_v11 }
  0x35   : > { %5718 = vmatpush3.bf16.msra.mxu1 %v6510_v54  ;;  %10080 = vst [vmem:[#allocation6_spill] sm:$0xff] %v6995_v8 }
  0x36   : > { %6240 = vmatmul.mubr.bf16.vlgmr.msra.gmra.mxu0 %v6466_v12  ;;  %6271 = vmatprep.subr.bf16.mxu1 %v6971_v56  ;;  %v7002_v12 = vrot.slane %v10039_v0, 3 }
  0x37   : > { %6243 = vmatprep.mubr.bf16.mxu0 %v6467_v14  ;;  %5816 = vmatpush3.bf16.msra.mxu0 %v6484_v16 }
  0x38   : > { %5817 = vmatprep.subr.bf16.mxu0 %v6487_v17 }
  0x3b   : > { %5818 = vmatpush3.bf16.msra.mxu0 %v6488_v20 }
  0x3c   : > { %5819 = vmatprep.subr.bf16.mxu0 %v6491_v21 }
  0x3e   : > { %6244 = vmatmul.mubr.bf16.gmra.mxu0 %v6468_v22 }
  0x3f   : > { %6247 = vmatprep.mubr.bf16.mxu0 %v6469_v24  ;;  %5820 = vmatpush3.bf16.msra.mxu0 %v6492_v25 }
  0x40   : > { %5821 = vmatprep.subr.bf16.mxu0 %v6495_v37 }
  0x43   : > { %5822 = vmatpush3.bf16.msra.mxu0 %v6496_v39 }
  0x44   : > { %5823 = vmatprep.subr.bf16.mxu0 %v6499_v41 }
  0x46   : > { %6248 = vmatmul.mubr.bf16.gmra.mxu0 %v6470_v26 }
  0x47   : > { %6251 = vmatprep.mubr.bf16.mxu0 %v6471_v27  ;;  %5824 = vmatpush3.bf16.msra.mxu0 %v6500_v43 }
  0x48   : > { %5825 = vmatprep.subr.bf16.mxu0 %v6503_v45 }
  0x4b   : > { %5826 = vmatpush3.bf16.msra.mxu0 %v6504_v47 }
  0x4c   : > { %5827 = vmatprep.subr.bf16.mxu0 %v6507_v49 }
  0x4e   : > { %6252 = vmatmul.mubr.bf16.gmra.mxu0 %v6472_v28 }
  0x4f   : > { %6255 = vmatprep.mubr.bf16.mxu0 %v6473_v29  ;;  %5828 = vmatpush3.bf16.msra.mxu0 %v6508_v51 }
  0x50   : > { %5829 = vmatprep.subr.bf16.mxu0 %v6511_v53 }
  0x53   : > { %5830 = vmatpush3.bf16.msra.mxu0 %v6512_v55 }
  0x56   : > { %6256 = vmatmul.mubr.bf16.gmra.mxu0 %v6474_v30 }
  0x57   : > { %6259 = vmatprep.mubr.bf16.mxu0 %v6475_v31 }
  0x5e   : > { %6260 = vmatmul.mubr.bf16.gmra.mxu0 %v6476_v32 }
  0x5f   : > { %6263 = vmatprep.mubr.bf16.mxu0 %v6477_v33 }
  0x66   : > { %6264 = vmatmul.mubr.bf16.gmra.mxu0 %v6478_v34 }
  0x67   : > { %6267 = vmatprep.mubr.bf16.mxu0 %v6479_v35 }
  0x6e   : > { %6268 = vmatmul.mubr.bf16.gmra.mxu0 %v6480_v36 }
  0xf6   : > { %v6241_v58 = vpop.f32.mrf.mxu0 }
  0xf7   : > { %v634_v59 = vadd.f32 %v6241_v58, %v6977_v57 }
  0xf8   : > { %v625_v60 = vpop.f32.mrf.mxu0 }
  0xf9   : > { %v6980_v61 = vmax.f32 %v634_v59, 0.0  ;;  %v626_v62 = vadd.f32 %v6977_v57, %v625_v60 }
  0xfa   : > { %v6242_v63 = vpop.f32.mrf.mxu0 }
  0xfb   : > { %v6986_v2 = vmax.f32 %v626_v62, 0.0  ;;  %v637_v3 = vadd.f32 %v6242_v63, %v6977_v57  ;;  %v904_v5 = vrot.slane %v6980_v61, 1  ;;  %v10040_v6 = vrot.slane %v6980_v61, 4 }
  0xfc   : > { %v628_v7 = vpop.f32.mrf.mxu0  ;;  %v1019_v18 = vrot.slane %v6980_v61, 3  ;;  %v1171_v19 = vrot.slane %v6980_v61, 6  ;;  %v968_v20 = vrot.slane %v6980_v61, 2 }
  0xfd   : > { %v965_v9 = vrot.slane %v6986_v2, 2  ;;  %v6998_v10 = vmax.f32 %v637_v3, 0.0  ;;  %v629_v11 = vadd.f32 %v6977_v57, %v628_v7  ;;  %v900_v14 = vrot.slane %v6986_v2, 1 }
  0xfe   : > { %v6245_v13 = vpop.f32.mrf.mxu0  ;;  %v1014_v15 = vrot.slane %v6986_v2, 3  ;;  %v1147_v16 = vrot.slane %v6986_v2, 6  ;;  %v7014_v21 = vrot.slane %v10040_v6, 6  ;;  %v905_v25 = vsel %vm898_vm0, %v6984_v1, %v904_v5 }
  0xff   : > { %v7007_v17 = vmax.f32 %v629_v11, 0.0  ;;  %v1152_v22 = vrot.slane %v965_v9, 6  ;;  %v901_v24 = vsel %vm898_vm0, %v6984_v1, %v900_v14  ;;  %v1020_v26 = vrot.slane %v6998_v10, 3 }
 0x100   : > { %v641_v23 = vpop.f32.mrf.mxu0  ;;  %v650_v28 = vadd.f32 %v6245_v13, %v6977_v57  ;;  %v1086_v30 = vrot.slane %v6998_v10, 4  ;;  %v1155_v33 = vrot.slane %v1014_v15, 6  ;;  %v1148_v34 = vsel %vm1145_vm1, %v6990_v4, %v1147_v16 }
 0x101   : > { %v966_v27 = vrot.slane %v7007_v17, 2  ;;  %v902_v29 = vrot.slane %v7007_v17, 1  ;;  %v1015_v32 = vrot.slane %v7007_v17, 3  ;;  %v642_v35 = vadd.f32 %v6977_v57, %v641_v23 }
 0x102   : > { %v6246_v31 = vpop.f32.mrf.mxu0  ;;  %v1149_v38 = vrot.slane %v901_v24, 6  ;;  %v1161_v43 = vrot.slane %v7007_v17, 6  ;;  %v7035_v45 = vmax.f32 %v650_v28, 0.0  ;;  %v906_v47 = vrot.slane %v6998_v10, 1 }
 0x103   : > { %v653_v36 = vadd.f32 %v6246_v31, %v6977_v57  ;;  %v903_v37 = vsel %vm898_vm0, %v900_v14, %v902_v29  ;;  %v1163_v41 = vrot.slane %v902_v29, 6  ;;  %v1016_v42 = vsel %vm1013_vm2, %v1014_v15, %v1015_v32  ;;  %v6514_v14 = vld [vmem:[%s10030_s3 + $0x130] sm:$0xff]  }
 0x104   : > { %v644_v39 = vpop.f32.mrf.mxu0  ;;  %v1150_v40 = vrot.slane %v903_v37, 6  ;;  %v1165_v44 = vrot.slane %v966_v27, 6  ;;  %v1018_v46 = vsel %vm1013_vm2, %v1015_v32, %v7002_v12  ;;  %v1156_v50 = vrot.slane %v1016_v42, 6 }
 0x105   : > { %v1167_v51 = vrot.slane %v1018_v46, 6  ;;  %v7042_v52 = vmax.f32 %v642_v35, 0.0  ;;  %v7044_v53 = vmax.f32 %v653_v36, 0.0  ;;  %v645_v54 = vadd.f32 %v6977_v57, %v644_v39 }
 0x106   : > { %v1151_v48 = vsel %vm1145_vm1, %v1149_v38, %v1150_v40  ;;  %v1164_v49 = vsel %vm1145_vm1, %v1150_v40, %v1163_v41  ;;  %v1157_v58 = vsel %vm1145_vm1, %v1155_v33, %v1156_v50  ;;  %v1162_v60 = vsel %vm1145_vm1, %v1147_v16, %v1161_v43  ;;  %v6249_v13 = vpop.f32.mrf.mxu0 }
 0x107   : > { %v1692_v55 = vpack.c.bf16 %v1164_v49, %v1151_v48  ;;  %v1168_v59 = vsel %vm1145_vm1, %v1156_v50, %v1167_v51  ;;  %v967_v62 = vsel %vm964_vm3, %v965_v9, %v966_v27  ;;  %v1691_v3 = vpack.c.bf16 %v1162_v60, %v1148_v34 }
 0x108   : > { %v1694_v63 = vpack.c.bf16 %v1168_v59, %v1157_v58  ;;  %v1153_v7 = vrot.slane %v967_v62, 6  ;;  %v907_v11 = vsel %vm898_vm0, %v904_v5, %v906_v47  ;;  %v1173_v15 = vrot.slane %v905_v25, 6  ;;  %v657_v36 = vpop.f32.mrf.mxu0 }
 0x109   : > { %2049 = vmatprep.mubr.bf16.mxu1 %v1692_v55  ;;  %v1174_v23 = vrot.slane %v907_v11, 6  ;;  %v1187_v24 = vrot.slane %v906_v47, 6  ;;  %v1021_v16 = vsel %vm1013_vm2, %v1019_v18, %v1020_v26  ;;  %v1022_v28 = vsel %vm1013_vm2, %v1020_v26, %v7002_v12 }
 0x10a   : > { %2210 = vmatprep.mubr.bf16.mxu0 %v1694_v63  ;;  %2050 = vmatmul.mubr.bf16.vlgmr.msra.gmra.mxu1 %v1691_v3  ;;  %v1154_v9 = vsel %vm1145_vm1, %v1152_v22, %v1153_v7  ;;  %v1166_v27 = vsel %vm1145_vm1, %v1153_v7, %v1165_v44  ;;  %v1179_v5 = vrot.slane %v1019_v18, 6  ;;  %v1180_v32 = vrot.slane %v1021_v16, 6  ;;  %v6515_v18 = vld [vmem:[%s10030_s3 + $0x128] sm:$0xff]   ;;  %v6250_v55 = vpop.f32.mrf.mxu0 }
 0x10b   : > { %v1693_v29 = vpack.c.bf16 %v1166_v27, %v1154_v9  ;;  %6272 = vmatpush3.bf16.msra.mxu1 %v6971_v56  ;;  %v1175_v31 = vsel %vm1145_vm1, %v1173_v15, %v1174_v23  ;;  %v1188_v25 = vsel %vm1145_vm1, %v1174_v23, %v1187_v24  ;;  %v908_v33 = vrot.slane %v7042_v52, 1  ;;  %v6517_v9 = vld [vmem:[%s10030_s3 + $0x118] sm:$0xff]  }
 0x10c   : > { %v7066_v34 = vmax.f32 %v645_v54, 0.0  ;;  %v1697_v35 = vpack.c.bf16 %v1188_v25, %v1175_v31  ;;  %v1191_v22 = vrot.slane %v1022_v28, 6  ;;  %6273 = vmatprep.subr.bf16.mxu1 %v6514_v14  ;;  %v1181_v56 = vsel %vm1145_vm1, %v1179_v5, %v1180_v32  ;;  %v6516_v54 = vld [vmem:[%s10030_s3 + $0x120] sm:$0xff]   ;;  %v660_v31 = vpop.f32.mrf.mxu0 }
 0x10d   : > { %2211 = vmatmul.mubr.bf16.vlgmr.msra.gmra.mxu0 %v1693_v29  ;;  %v658_v26 = vadd.f32 %v6977_v57, %v657_v36  ;;  %v1185_v37 = vrot.slane %v6998_v10, 6  ;;  %v969_v38 = vrot.slane %v6998_v10, 2  ;;  %v912_v39 = vrot.slane %v7035_v45, 1 }
 0x10e   : > { %v1028_v40 = vrot.slane %v7044_v53, 3  ;;  %2057 = vmatprep.mubr.bf16.mxu1 %v1697_v35  ;;  %v1192_v41 = vsel %vm1145_vm1, %v1180_v32, %v1191_v22  ;;  %v1172_v42 = vsel %vm1145_vm1, %v6990_v4, %v1171_v19  ;;  %v666_v48 = vadd.f32 %v6249_v13, %v6977_v57 }
 0x10f   : > { %v1699_v43 = vpack.c.bf16 %v1192_v41, %v1181_v56  ;;  %v1186_v44 = vsel %vm1145_vm1, %v1171_v19, %v1185_v37  ;;  %v970_v46 = vsel %vm964_vm3, %v968_v20, %v969_v38  ;;  %v1189_v47 = vrot.slane %v969_v38, 6  ;;  %6274 = vmatpush3.bf16.msra.mxu1 %v6514_v14 }
 0x110   : > { %v1696_v49 = vpack.c.bf16 %v1186_v44, %v1172_v42  ;;  %v1176_v50 = vrot.slane %v968_v20, 6  ;;  %v1177_v51 = vrot.slane %v970_v46, 6  ;;  %6275 = vmatprep.subr.bf16.mxu1 %v6515_v18  ;;  %v7094_v19 = vmax.f32 %v658_v26, 0.0  ;;  %v6518_v42 = vld [vmem:[%s10030_s3 + $0x110] sm:$0xff]  }
 0x111   : > { %2218 = vmatprep.mubr.bf16.mxu0 %v1699_v43  ;;  %v909_v58 = vsel %vm898_vm0, %v6984_v1, %v908_v33  ;;  %v910_v59 = vrot.slane %v7066_v34, 1  ;;  %v1023_v60 = vrot.slane %v7042_v52, 3  ;;  %v1024_v3 = vrot.slane %v7066_v34, 3 }
 0x112   : > { %2058 = vmatmul.mubr.bf16.gmra.mxu1 %v1696_v49  ;;  %v1178_v20 = vsel %vm1145_vm1, %v1176_v50, %v1177_v51  ;;  %v1190_v62 = vsel %vm1145_vm1, %v1177_v51, %v1189_v47  ;;  %v1197_v63 = vrot.slane %v909_v58, 6  ;;  %v7111_v27 = vmax.f32 %v666_v48, 0.0 }
 0x113   : > { %v1698_v11 = vpack.c.bf16 %v1190_v62, %v1178_v20  ;;  %v911_v13 = vsel %vm898_vm0, %v908_v33, %v910_v59  ;;  %v1211_v14 = vrot.slane %v910_v59, 6  ;;  %6276 = vmatpush3.bf16.msra.mxu1 %v6515_v18  ;;  %v1025_v23 = vsel %vm1013_vm2, %v1023_v60, %v1024_v3 }
 0x114   : > { %v1198_v15 = vrot.slane %v911_v13, 6  ;;  %v1026_v24 = vsel %vm1013_vm2, %v1024_v3, %v7002_v12  ;;  %v1203_v16 = vrot.slane %v1023_v60, 6  ;;  %6277 = vmatprep.subr.bf16.mxu1 %v6516_v54  ;;  %v916_v28 = vrot.slane %v7094_v19, 1  ;;  %v6253_v3 = vpop.f32.mrf.mxu0 }
 0x115   : > { %2219 = vmatmul.mubr.bf16.gmra.mxu0 %v1698_v11  ;;  %v1204_v5 = vrot.slane %v1025_v23, 6  ;;  %v1215_v29 = vrot.slane %v1026_v24, 6  ;;  %v669_v25 = vadd.f32 %v6250_v55, %v6977_v57  ;;  %v1195_v35 = vrot.slane %v7042_v52, 6 }
 0x116   : > { %v1199_v32 = vsel %vm1145_vm1, %v1197_v63, %v1198_v15  ;;  %v1212_v33 = vsel %vm1145_vm1, %v1198_v15, %v1211_v14  ;;  %v1209_v56 = vrot.slane %v7066_v34, 6  ;;  %v661_v37 = vadd.f32 %v6977_v57, %v660_v31 }
 0x117   : > { %v1702_v22 = vpack.c.bf16 %v1212_v33, %v1199_v32  ;;  %v1205_v36 = vsel %vm1145_vm1, %v1203_v16, %v1204_v5  ;;  %v1216_v18 = vsel %vm1145_vm1, %v1204_v5, %v1215_v29  ;;  %6278 = vmatpush3.bf16.msra.mxu1 %v6516_v54  ;;  %v1196_v38 = vsel %vm1145_vm1, %v6990_v4, %v1195_v35 }
 0x118   : > { %v1704_v26 = vpack.c.bf16 %v1216_v18, %v1205_v36  ;;  %v971_v41 = vrot.slane %v7042_v52, 2  ;;  %6279 = vmatprep.subr.bf16.mxu1 %v6517_v9  ;;  %v1210_v43 = vsel %vm1145_vm1, %v1195_v35, %v1209_v56  ;;  %v972_v44 = vrot.slane %v7066_v34, 2  ;;  %v673_v35 = vpop.f32.mrf.mxu0  ;;  %v6520_v36 = vld [vmem:[%s10030_s3 + $0x100] sm:$0xff]  }
 0x119   : > { %2065 = vmatprep.mubr.bf16.mxu1 %v1702_v22  ;;  %v913_v46 = vsel %vm898_vm0, %v6984_v1, %v912_v39  ;;  %v914_v47 = vrot.slane %v7044_v53, 1  ;;  %v1701_v48 = vpack.c.bf16 %v1210_v43, %v1196_v38  ;;  %v1027_v51 = vrot.slane %v7035_v45, 3 }
 0x11a   : > { %2226 = vmatprep.mubr.bf16.mxu0 %v1704_v26  ;;  %v1200_v49 = vrot.slane %v971_v41, 6  ;;  %v1221_v50 = vrot.slane %v913_v46, 6  ;;  %v973_v54 = vsel %vm964_vm3, %v971_v41, %v972_v44  ;;  %v1213_v55 = vrot.slane %v972_v44, 6 }
 0x11b   : > { %v915_v58 = vsel %vm898_vm0, %v912_v39, %v914_v47  ;;  %v1235_v59 = vrot.slane %v914_v47, 6  ;;  %6280 = vmatpush3.bf16.msra.mxu1 %v6517_v9  ;;  %v1201_v60 = vrot.slane %v973_v54, 6  ;;  %v1029_v62 = vsel %vm1013_vm2, %v1027_v51, %v1028_v40  ;;  %v6519_v39 = vld [vmem:[%s10030_s3 + $0x108] sm:$0xff]  }
 0x11c   : > { %2066 = vmatmul.mubr.bf16.gmra.mxu1 %v1701_v48  ;;  %v1222_v20 = vrot.slane %v915_v58, 6  ;;  %v1030_v63 = vsel %vm1013_vm2, %v1028_v40, %v7002_v12  ;;  %6281 = vmatprep.subr.bf16.mxu1 %v6518_v42  ;;  %v7150_v11 = vmax.f32 %v669_v25, 0.0  ;;  %v1227_v13 = vrot.slane %v1027_v51, 6 }
 0x11d   : > { %v1228_v14 = vrot.slane %v1029_v62, 6  ;;  %v1239_v15 = vrot.slane %v1030_v63, 6  ;;  %v1202_v23 = vsel %vm1145_vm1, %v1200_v49, %v1201_v60  ;;  %v1214_v24 = vsel %vm1145_vm1, %v1201_v60, %v1213_v55  ;;  %v6254_v55 = vpop.f32.mrf.mxu0 }
 0x11e   : > { %v1223_v16 = vsel %vm1145_vm1, %v1221_v50, %v1222_v20  ;;  %v1236_v9 = vsel %vm1145_vm1, %v1222_v20, %v1235_v59  ;;  %v1703_v40 = vpack.c.bf16 %v1214_v24, %v1202_v23  ;;  %v7158_v25 = vmax.f32 %v661_v37, 0.0 }
 0x11f   : > { %v1707_v5 = vpack.c.bf16 %v1236_v9, %v1223_v16  ;;  %v1229_v29 = vsel %vm1145_vm1, %v1227_v13, %v1228_v14  ;;  %v1240_v31 = vsel %vm1145_vm1, %v1228_v14, %v1239_v15  ;;  %6282 = vmatpush3.bf16.msra.mxu1 %v6518_v42  ;;  %v682_v33 = vadd.f32 %v6253_v3, %v6977_v57 }
 0x120   : > { %v1709_v32 = vpack.c.bf16 %v1240_v31, %v1229_v29  ;;  %v1219_v22 = vrot.slane %v7035_v45, 6  ;;  %6283 = vmatprep.subr.bf16.mxu1 %v6519_v39  ;;  %2227 = vmatmul.mubr.bf16.gmra.mxu0 %v1703_v40  ;;  %v674_v18 = vadd.f32 %v6977_v57, %v673_v35  ;;  %v1233_v56 = vrot.slane %v7044_v53, 6 }
 0x121   : > { %2073 = vmatprep.mubr.bf16.mxu1 %v1707_v5  ;;  %v974_v26 = vrot.slane %v7035_v45, 2  ;;  %v975_v37 = vrot.slane %v7044_v53, 2  ;;  %v920_v38 = vrot.slane %v7111_v27, 1  ;;  %v1036_v41 = vrot.slane %v7150_v11, 3  ;;  %v676_v5 = vpop.f32.mrf.mxu0 }
 0x122   : > { %2234 = vmatprep.mubr.bf16.mxu0 %v1709_v32  ;;  %v1220_v42 = vsel %vm1145_vm1, %v6990_v4, %v1219_v22  ;;  %v917_v43 = vsel %vm898_vm0, %v6984_v1, %v916_v28  ;;  %v1234_v44 = vsel %vm1145_vm1, %v1219_v22, %v1233_v56  ;;  %v7180_v50 = vmax.f32 %v682_v33, 0.0 }
 0x123   : > { %v976_v46 = vsel %vm964_vm3, %v974_v26, %v975_v37  ;;  %v1224_v47 = vrot.slane %v974_v26, 6  ;;  %v1237_v48 = vrot.slane %v975_v37, 6  ;;  %6284 = vmatpush3.bf16.msra.mxu1 %v6519_v39  ;;  %v1706_v51 = vpack.c.bf16 %v1234_v44, %v1220_v42 }
 0x124   : > { %v1225_v54 = vrot.slane %v976_v46, 6  ;;  %6285 = vmatprep.subr.bf16.mxu1 %v6520_v36  ;;  %v7182_v58 = vmax.f32 %v674_v18, 0.0  ;;  %v918_v59 = vrot.slane %v7158_v25, 1  ;;  %v1031_v60 = vrot.slane %v7094_v19, 3 }
 0x125   : > { %v1032_v20 = vrot.slane %v7158_v25, 3  ;;  %2074 = vmatmul.mubr.bf16.gmra.mxu1 %v1706_v51  ;;  %v685_v3 = vadd.f32 %v6254_v55, %v6977_v57  ;;  %v1245_v39 = vrot.slane %v917_v43, 6  ;;  %v1243_v32 = vrot.slane %v7094_v19, 6 }
 0x126   : > { %v1226_v62 = vsel %vm1145_vm1, %v1224_v47, %v1225_v54  ;;  %v1238_v63 = vsel %vm1145_vm1, %v1225_v54, %v1237_v48  ;;  %v919_v14 = vsel %vm898_vm0, %v916_v28, %v918_v59  ;;  %v1259_v15 = vrot.slane %v918_v59, 6  ;;  %v6257_v47 = vpop.f32.mrf.mxu0 }
 0x127   : > { %v1708_v13 = vpack.c.bf16 %v1238_v63, %v1226_v62  ;;  %v1033_v23 = vsel %vm1013_vm2, %v1031_v60, %v1032_v20  ;;  %6286 = vmatpush3.bf16.msra.mxu1 %v6520_v36  ;;  %v1246_v24 = vrot.slane %v919_v14, 6  ;;  %v1034_v16 = vsel %vm1013_vm2, %v1032_v20, %v7002_v12 }
 0x128   : > { %v1251_v9 = vrot.slane %v1031_v60, 6  ;;  %v1252_v40 = vrot.slane %v1033_v23, 6  ;;  %v924_v29 = vrot.slane %v7182_v58, 1  ;;  %v1263_v31 = vrot.slane %v1034_v16, 6 }
 0x129   : > { %2235 = vmatmul.mubr.bf16.gmra.mxu0 %v1708_v13  ;;  %v1257_v33 = vrot.slane %v7158_v25, 6  ;;  %v1247_v28 = vsel %vm1145_vm1, %v1245_v39, %v1246_v24  ;;  %v1260_v35 = vsel %vm1145_vm1, %v1246_v24, %v1259_v15  ;;  %v977_v36 = vrot.slane %v7094_v19, 2 }
 0x12a   : > { %v1253_v22 = vsel %vm1145_vm1, %v1251_v9, %v1252_v40  ;;  %v1712_v18 = vpack.c.bf16 %v1260_v35, %v1247_v28  ;;  %v1264_v56 = vsel %vm1145_vm1, %v1252_v40, %v1263_v31  ;;  %v677_v26 = vadd.f32 %v6977_v57, %v676_v5  ;;  %v689_v9 = vpop.f32.mrf.mxu0 }
 0x12b   : > { %v1244_v37 = vsel %vm1145_vm1, %v6990_v4, %v1243_v32  ;;  %v1714_v42 = vpack.c.bf16 %v1264_v56, %v1253_v22  ;;  %v1258_v43 = vsel %vm1145_vm1, %v1243_v32, %v1257_v33  ;;  %v978_v44 = vrot.slane %v7158_v25, 2 }
 0x12c   : > { %v1248_v46 = vrot.slane %v977_v36, 6  ;;  %2081 = vmatprep.mubr.bf16.mxu1 %v1712_v18  ;;  %v1711_v48 = vpack.c.bf16 %v1258_v43, %v1244_v37  ;;  %v921_v51 = vsel %vm898_vm0, %v6984_v1, %v920_v38  ;;  %v922_v54 = vrot.slane %v7150_v11, 1  ;;  %v6258_v43 = vpop.f32.mrf.mxu0 }
 0x12d   : > { %v1035_v55 = vrot.slane %v7111_v27, 3  ;;  %2242 = vmatprep.mubr.bf16.mxu0 %v1714_v42  ;;  %v979_v59 = vsel %vm964_vm3, %v977_v36, %v978_v44  ;;  %v1261_v60 = vrot.slane %v978_v44, 6  ;;  %v1269_v20 = vrot.slane %v921_v51, 6 }
 0x12e   : > { %v1038_v62 = vsel %vm1013_vm2, %v1036_v41, %v7002_v12  ;;  %2082 = vmatmul.mubr.bf16.gmra.mxu1 %v1711_v48  ;;  %v1249_v63 = vrot.slane %v979_v59, 6  ;;  %v923_v39 = vsel %vm898_vm0, %v920_v38, %v922_v54  ;;  %v1283_v13 = vrot.slane %v922_v54, 6 }
 0x12f   : > { %v1037_v14 = vsel %vm1013_vm2, %v1035_v55, %v1036_v41  ;;  %v1270_v15 = vrot.slane %v923_v39, 6  ;;  %v1275_v23 = vrot.slane %v1035_v55, 6  ;;  %v1287_v16 = vrot.slane %v1038_v62, 6 }
 0x130   : > { %v1276_v24 = vrot.slane %v1037_v14, 6  ;;  %v7226_v40 = vmax.f32 %v685_v3, 0.0  ;;  %v1250_v5 = vsel %vm1145_vm1, %v1248_v46, %v1249_v63  ;;  %v1262_v31 = vsel %vm1145_vm1, %v1249_v63, %v1261_v60 }
 0x131   : > { %v690_v32 = vadd.f32 %v6977_v57, %v689_v9  ;;  %v1713_v33 = vpack.c.bf16 %v1262_v31, %v1250_v5  ;;  %v1271_v38 = vsel %vm1145_vm1, %v1269_v20, %v1270_v15  ;;  %v1284_v28 = vsel %vm1145_vm1, %v1270_v15, %v1283_v13  ;;  %v692_v9 = vpop.f32.mrf.mxu0 }
 0x132   : > { %v1277_v41 = vsel %vm1145_vm1, %v1275_v23, %v1276_v24  ;;  %v7234_v35 = vmax.f32 %v677_v26, 0.0  ;;  %v1717_v22 = vpack.c.bf16 %v1284_v28, %v1271_v38  ;;  %v1288_v36 = vsel %vm1145_vm1, %v1276_v24, %v1287_v16 }
 0x133   : > { %v698_v3 = vadd.f32 %v6257_v47, %v6977_v57  ;;  %2243 = vmatmul.mubr.bf16.gmra.mxu0 %v1713_v33  ;;  %v1719_v18 = vpack.c.bf16 %v1288_v36, %v1277_v41  ;;  %v1267_v56 = vrot.slane %v7111_v27, 6  ;;  %v1281_v37 = vrot.slane %v7150_v11, 6 }
 0x134   : > { %v980_v42 = vrot.slane %v7111_v27, 2  ;;  %v928_v44 = vrot.slane %v7180_v50, 1  ;;  %2089 = vmatprep.mubr.bf16.mxu1 %v1717_v22  ;;  %v7242_v46 = vmax.f32 %v690_v32, 0.0  ;;  %v981_v26 = vrot.slane %v7150_v11, 2 }
 0x135   : > { %v701_v48 = vadd.f32 %v6258_v43, %v6977_v57  ;;  %2250 = vmatprep.mubr.bf16.mxu0 %v1719_v18  ;;  %v1268_v47 = vsel %vm1145_vm1, %v6990_v4, %v1267_v56  ;;  %v1282_v51 = vsel %vm1145_vm1, %v1267_v56, %v1281_v37  ;;  %v925_v55 = vsel %vm898_vm0, %v6984_v1, %v924_v29 }
 0x136   : > { %v1272_v54 = vrot.slane %v980_v42, 6  ;;  %v1044_v59 = vrot.slane %v7226_v40, 3  ;;  %v1716_v60 = vpack.c.bf16 %v1282_v51, %v1268_v47  ;;  %v982_v20 = vsel %vm964_vm3, %v980_v42, %v981_v26 }
 0x137   : > { %v1285_v62 = vrot.slane %v981_v26, 6  ;;  %v7255_v63 = vmax.f32 %v698_v3, 0.0  ;;  %v1273_v39 = vrot.slane %v982_v20, 6  ;;  %v926_v13 = vrot.slane %v7234_v35, 1 }
 0x138   : > { %v1039_v14 = vrot.slane %v7182_v58, 3  ;;  %v932_v15 = vrot.slane %v7242_v46, 1  ;;  %2090 = vmatmul.mubr.bf16.gmra.mxu1 %v1716_v60  ;;  %v7260_v23 = vmax.f32 %v701_v48, 0.0  ;;  %v1293_v24 = vrot.slane %v925_v55, 6 }
 0x139   : > { %v1040_v16 = vrot.slane %v7234_v35, 3  ;;  %v1274_v5 = vsel %vm1145_vm1, %v1272_v54, %v1273_v39  ;;  %v1286_v31 = vsel %vm1145_vm1, %v1273_v39, %v1285_v62  ;;  %v927_v32 = vsel %vm898_vm0, %v924_v29, %v926_v13 }
 0x13a   : > { %v1307_v33 = vrot.slane %v926_v13, 6  ;;  %v1718_v38 = vpack.c.bf16 %v1286_v31, %v1274_v5  ;;  %v1294_v28 = vrot.slane %v927_v32, 6  ;;  %v1299_v36 = vrot.slane %v1039_v14, 6 }
 0x13b   : > { %v1041_v41 = vsel %vm1013_vm2, %v1039_v14, %v1040_v16  ;;  %v1042_v22 = vsel %vm1013_vm2, %v1040_v16, %v7002_v12  ;;  %v693_v56 = vadd.f32 %v6977_v57, %v692_v9  ;;  %v1291_v29 = vrot.slane %v7182_v58, 6 }
 0x13c   : > { %v1300_v3 = vrot.slane %v1041_v41, 6  ;;  %v1311_v18 = vrot.slane %v1042_v22, 6  ;;  %2251 = vmatmul.mubr.bf16.gmra.mxu0 %v1718_v38  ;;  %v1295_v37 = vsel %vm1145_vm1, %v1293_v24, %v1294_v28  ;;  %v1308_v42 = vsel %vm1145_vm1, %v1294_v28, %v1307_v33  ;;  %v6261_v24 = vpop.f32.mrf.mxu0 }
 0x13d   : > { %v1305_v43 = vrot.slane %v7234_v35, 6  ;;  %v1722_v26 = vpack.c.bf16 %v1308_v42, %v1295_v37  ;;  %v983_v51 = vrot.slane %v7182_v58, 2  ;;  %v1292_v55 = vsel %vm1145_vm1, %v6990_v4, %v1291_v29 }
 0x13e   : > { %v1301_v48 = vsel %vm1145_vm1, %v1299_v36, %v1300_v3  ;;  %v1312_v47 = vsel %vm1145_vm1, %v1300_v3, %v1311_v18  ;;  %v984_v20 = vrot.slane %v7234_v35, 2  ;;  %v929_v13 = vsel %vm898_vm0, %v6984_v1, %v928_v44 }
 0x13f   : > { %v1724_v54 = vpack.c.bf16 %v1312_v47, %v1301_v48  ;;  %v1306_v60 = vsel %vm1145_vm1, %v1291_v29, %v1305_v43  ;;  %2097 = vmatprep.mubr.bf16.mxu1 %v1722_v26  ;;  %v1296_v39 = vrot.slane %v983_v51, 6  ;;  %v930_v14 = vrot.slane %v7226_v40, 1  ;;  %v705_v43 = vpop.f32.mrf.mxu0 }
 0x140   : > { %v1721_v62 = vpack.c.bf16 %v1306_v60, %v1292_v55  ;;  %v985_v16 = vsel %vm964_vm3, %v983_v51, %v984_v20  ;;  %v1309_v9 = vrot.slane %v984_v20, 6  ;;  %v1317_v5 = vrot.slane %v929_v13, 6 }
 0x141   : > { %2258 = vmatprep.mubr.bf16.mxu0 %v1724_v54  ;;  %v1043_v31 = vrot.slane %v7180_v50, 3  ;;  %v1297_v32 = vrot.slane %v985_v16, 6  ;;  %v931_v33 = vsel %vm898_vm0, %v928_v44, %v930_v14  ;;  %v1331_v38 = vrot.slane %v930_v14, 6  ;;  %v6262_v16 = vpop.f32.mrf.mxu0 }
 0x142   : > { %2098 = vmatmul.mubr.bf16.gmra.mxu1 %v1721_v62  ;;  %v1046_v28 = vsel %vm1013_vm2, %v1044_v59, %v7002_v12  ;;  %v1318_v41 = vrot.slane %v931_v33, 6  ;;  %v714_v29 = vadd.f32 %v6261_v24, %v6977_v57  ;;  %v706_v47 = vadd.f32 %v6977_v57, %v705_v43 }
 0x143   : > { %v1045_v22 = vsel %vm1013_vm2, %v1043_v31, %v1044_v59  ;;  %v1323_v36 = vrot.slane %v1043_v31, 6  ;;  %v1335_v3 = vrot.slane %v1046_v28, 6  ;;  %v1298_v18 = vsel %vm1145_vm1, %v1296_v39, %v1297_v32 }
 0x144   : > { %v1310_v37 = vsel %vm1145_vm1, %v1297_v32, %v1309_v9  ;;  %v1324_v42 = vrot.slane %v1045_v22, 6  ;;  %v1319_v44 = vsel %vm1145_vm1, %v1317_v5, %v1318_v41  ;;  %v1332_v48 = vsel %vm1145_vm1, %v1318_v41, %v1331_v38 }
 0x145   : > { %v1723_v26 = vpack.c.bf16 %v1310_v37, %v1298_v18  ;;  %v7302_v51 = vmax.f32 %v693_v56, 0.0  ;;  %v1727_v59 = vpack.c.bf16 %v1332_v48, %v1319_v44  ;;  %v7306_v20 = vmax.f32 %v714_v29, 0.0 }
 0x146   : > { %v1325_v54 = vsel %vm1145_vm1, %v1323_v36, %v1324_v42  ;;  %v1336_v55 = vsel %vm1145_vm1, %v1324_v42, %v1335_v3  ;;  %v1315_v62 = vrot.slane %v7180_v50, 6  ;;  %v1329_v39 = vrot.slane %v7226_v40, 6 }
 0x147   : > { %2259 = vmatmul.mubr.bf16.gmra.mxu0 %v1723_v26  ;;  %v1729_v60 = vpack.c.bf16 %v1336_v55, %v1325_v54  ;;  %v936_v13 = vrot.slane %v7255_v63, 1  ;;  %2105 = vmatprep.mubr.bf16.mxu1 %v1727_v59  ;;  %v7311_v14 = vmax.f32 %v706_v47, 0.0  ;;  %v986_v56 = vrot.slane %v7180_v50, 2  ;;  %v708_v59 = vpop.f32.mrf.mxu0 }
 0x148   : > { %v987_v24 = vrot.slane %v7226_v40, 2  ;;  %v1316_v9 = vsel %vm1145_vm1, %v6990_v4, %v1315_v62  ;;  %v1330_v5 = vsel %vm1145_vm1, %v1315_v62, %v1329_v39  ;;  %v717_v31 = vadd.f32 %v6262_v16, %v6977_v57 }
 0x149   : > { %2266 = vmatprep.mubr.bf16.mxu0 %v1729_v60  ;;  %v933_v32 = vsel %vm898_vm0, %v6984_v1, %v932_v15  ;;  %v1726_v33 = vpack.c.bf16 %v1330_v5, %v1316_v9  ;;  %v1320_v28 = vrot.slane %v986_v56, 6  ;;  %v1052_v22 = vrot.slane %v7260_v23, 3 }
 0x14a   : > { %v988_v38 = vsel %vm964_vm3, %v986_v56, %v987_v24  ;;  %v1333_v41 = vrot.slane %v987_v24, 6  ;;  %v944_v36 = vrot.slane %v7306_v20, 1  ;;  %v934_v18 = vrot.slane %v7302_v51, 1 }
 0x14b   : > { %v1321_v3 = vrot.slane %v988_v38, 6  ;;  %v940_v37 = vrot.slane %v7311_v14, 1  ;;  %2106 = vmatmul.mubr.bf16.gmra.mxu1 %v1726_v33  ;;  %v1047_v42 = vrot.slane %v7242_v46, 3  ;;  %v1048_v29 = vrot.slane %v7302_v51, 3 }
 0x14c   : > { %v1339_v43 = vrot.slane %v7242_v46, 6  ;;  %v7333_v48 = vmax.f32 %v717_v31, 0.0  ;;  %v1341_v47 = vrot.slane %v933_v32, 6  ;;  %v935_v55 = vsel %vm898_vm0, %v932_v15, %v934_v18 }
 0x14d   : > { %v1322_v26 = vsel %vm1145_vm1, %v1320_v28, %v1321_v3  ;;  %v1334_v44 = vsel %vm1145_vm1, %v1321_v3, %v1333_v41  ;;  %v1355_v60 = vrot.slane %v934_v18, 6  ;;  %v1049_v62 = vsel %vm1013_vm2, %v1047_v42, %v1048_v29  ;;  %v6265_v41 = vpop.f32.mrf.mxu0 }
 0x14e   : > { %v1728_v54 = vpack.c.bf16 %v1334_v44, %v1322_v26  ;;  %v1342_v39 = vrot.slane %v935_v55, 6  ;;  %v1050_v56 = vsel %vm1013_vm2, %v1048_v29, %v7002_v12  ;;  %v1347_v24 = vrot.slane %v1047_v42, 6 }
 0x14f   : > { %v1348_v16 = vrot.slane %v1049_v62, 6  ;;  %v1359_v9 = vrot.slane %v1050_v56, 6  ;;  %v709_v5 = vadd.f32 %v6977_v57, %v708_v59  ;;  %v1340_v31 = vsel %vm1145_vm1, %v6990_v4, %v1339_v43 }
 0x150   : > { %2267 = vmatmul.mubr.bf16.gmra.mxu0 %v1728_v54  ;;  %v1353_v32 = vrot.slane %v7302_v51, 6  ;;  %v1343_v15 = vsel %vm1145_vm1, %v1341_v47, %v1342_v39  ;;  %v1356_v33 = vsel %vm1145_vm1, %v1342_v39, %v1355_v60  ;;  %v989_v28 = vrot.slane %v7242_v46, 2 }
 0x151   : > { %v1349_v38 = vsel %vm1145_vm1, %v1347_v24, %v1348_v16  ;;  %v1732_v3 = vpack.c.bf16 %v1356_v33, %v1343_v15  ;;  %v1360_v18 = vsel %vm1145_vm1, %v1348_v16, %v1359_v9  ;;  %v990_v29 = vrot.slane %v7302_v51, 2  ;;  %v721_v16 = vpop.f32.mrf.mxu0 }
 0x152   : > { %v1354_v42 = vsel %vm1145_vm1, %v1339_v43, %v1353_v32  ;;  %v1734_v26 = vpack.c.bf16 %v1360_v18, %v1349_v38  ;;  %v1344_v59 = vrot.slane %v989_v28, 6  ;;  %v937_v47 = vsel %vm898_vm0, %v6984_v1, %v936_v13 }
 0x153   : > { %v1731_v44 = vpack.c.bf16 %v1354_v42, %v1340_v31  ;;  %2113 = vmatprep.mubr.bf16.mxu1 %v1732_v3  ;;  %v991_v54 = vsel %vm964_vm3, %v989_v28, %v990_v29  ;;  %v1357_v55 = vrot.slane %v990_v29, 6  ;;  %v938_v60 = vrot.slane %v7260_v23, 1 }
 0x154   : > { %v1365_v62 = vrot.slane %v937_v47, 6  ;;  %2274 = vmatprep.mubr.bf16.mxu0 %v1734_v26  ;;  %v1345_v43 = vrot.slane %v991_v54, 6  ;;  %v1051_v39 = vrot.slane %v7255_v63, 3  ;;  %v1054_v56 = vsel %vm1013_vm2, %v1052_v22, %v7002_v12 }
 0x155   : > { %2114 = vmatmul.mubr.bf16.gmra.mxu1 %v1731_v44  ;;  %v730_v24 = vadd.f32 %v6265_v41, %v6977_v57  ;;  %v939_v9 = vsel %vm898_vm0, %v936_v13, %v938_v60  ;;  %v1379_v31 = vrot.slane %v938_v60, 6  ;;  %v1383_v32 = vrot.slane %v1054_v56, 6  ;;  %v6266_v60 = vpop.f32.mrf.mxu0 }
 0x156   : > { %v722_v15 = vadd.f32 %v6977_v57, %v721_v16  ;;  %v1346_v33 = vsel %vm1145_vm1, %v1344_v59, %v1345_v43  ;;  %v1358_v38 = vsel %vm1145_vm1, %v1345_v43, %v1357_v55  ;;  %v1366_v28 = vrot.slane %v939_v9, 6 }
 0x157   : > { %v1053_v3 = vsel %vm1013_vm2, %v1051_v39, %v1052_v22  ;;  %v1060_v18 = vrot.slane %v7333_v48, 3  ;;  %v1733_v42 = vpack.c.bf16 %v1358_v38, %v1346_v33  ;;  %v1371_v41 = vrot.slane %v1051_v39, 6 }
 0x158   : > { %v1372_v29 = vrot.slane %v1053_v3, 6  ;;  %v7370_v26 = vmax.f32 %v709_v5, 0.0  ;;  %v1367_v13 = vsel %vm1145_vm1, %v1365_v62, %v1366_v28  ;;  %v1380_v44 = vsel %vm1145_vm1, %v1366_v28, %v1379_v31 }
 0x159   : > { %v1363_v47 = vrot.slane %v7255_v63, 6  ;;  %2275 = vmatmul.mubr.bf16.gmra.mxu0 %v1733_v42  ;;  %v1737_v59 = vpack.c.bf16 %v1380_v44, %v1367_v13  ;;  %v7377_v22 = vmax.f32 %v730_v24, 0.0  ;;  %v7379_v39 = vmax.f32 %v722_v15, 0.0 }
 0x15a   : > { %v1373_v54 = vsel %vm1145_vm1, %v1371_v41, %v1372_v29  ;;  %v1384_v55 = vsel %vm1145_vm1, %v1372_v29, %v1383_v32  ;;  %v1377_v62 = vrot.slane %v7260_v23, 6  ;;  %v992_v56 = vrot.slane %v7255_v63, 2  ;;  %v724_v41 = vpop.f32.mrf.mxu0 }
 0x15b   : > { %v1739_v43 = vpack.c.bf16 %v1384_v55, %v1373_v54  ;;  %v1364_v5 = vsel %vm1145_vm1, %v6990_v4, %v1363_v47  ;;  %2121 = vmatprep.mubr.bf16.mxu1 %v1737_v59  ;;  %v993_v16 = vrot.slane %v7260_v23, 2  ;;  %v733_v9 = vadd.f32 %v6266_v60, %v6977_v57 }
 0x15c   : > { %v941_v24 = vsel %vm898_vm0, %v6984_v1, %v940_v37  ;;  %v1378_v31 = vsel %vm1145_vm1, %v1363_v47, %v1377_v62  ;;  %v942_v32 = vrot.slane %v7370_v26, 1  ;;  %v1055_v33 = vrot.slane %v7311_v14, 3 }
 0x15d   : > { %2282 = vmatprep.mubr.bf16.mxu0 %v1739_v43  ;;  %v1389_v15 = vrot.slane %v941_v24, 6  ;;  %v1736_v38 = vpack.c.bf16 %v1378_v31, %v1364_v5  ;;  %v994_v28 = vsel %vm964_vm3, %v992_v56, %v993_v16  ;;  %v1368_v3 = vrot.slane %v992_v56, 6 }
 0x15e   : > { %v1381_v42 = vrot.slane %v993_v16, 6  ;;  %v1369_v29 = vrot.slane %v994_v28, 6  ;;  %v7395_v13 = vmax.f32 %v733_v9, 0.0  ;;  %v943_v44 = vsel %vm898_vm0, %v940_v37, %v942_v32 }
 0x15f   : > { %v1403_v59 = vrot.slane %v942_v32, 6  ;;  %v952_v47 = vrot.slane %v7377_v22, 1  ;;  %v948_v54 = vrot.slane %v7379_v39, 1  ;;  %2122 = vmatmul.mubr.bf16.gmra.mxu1 %v1736_v38  ;;  %v1390_v55 = vrot.slane %v943_v44, 6 }
 0x160   : > { %v1056_v60 = vrot.slane %v7370_v26, 3  ;;  %v1370_v43 = vsel %vm1145_vm1, %v1368_v3, %v1369_v29  ;;  %v1382_v5 = vsel %vm1145_vm1, %v1369_v29, %v1381_v42  ;;  %v1395_v62 = vrot.slane %v1055_v33, 6  ;;  %v6269_v3 = vpop.f32.mrf.mxu0 }
 0x161   : > { %v725_v56 = vadd.f32 %v6977_v57, %v724_v41  ;;  %v1738_v16 = vpack.c.bf16 %v1382_v5, %v1370_v43  ;;  %v1391_v9 = vsel %vm1145_vm1, %v1389_v15, %v1390_v55  ;;  %v1404_v37 = vsel %vm1145_vm1, %v1390_v55, %v1403_v59 }
 0x162   : > { %v1057_v24 = vsel %vm1013_vm2, %v1055_v33, %v1056_v60  ;;  %v1068_v31 = vrot.slane %v7395_v13, 3  ;;  %v1742_v32 = vpack.c.bf16 %v1404_v37, %v1391_v9  ;;  %v1058_v38 = vsel %vm1013_vm2, %v1056_v60, %v7002_v12  ;;  %v6521_v33 = vld [vmem:[%s10032_s5 + $0x78] sm:$0xff]  }
 0x163   : > { %v1396_v28 = vrot.slane %v1057_v24, 6  ;;  %2283 = vmatmul.mubr.bf16.gmra.mxu0 %v1738_v16  ;;  %v1407_v42 = vrot.slane %v1058_v38, 6  ;;  %v1387_v29 = vrot.slane %v7311_v14, 6  ;;  %v1401_v57 = vrot.slane %v7370_v26, 6  ;;  %v6522_v60 = vld [vmem:[%s10032_s5 + $0x38] sm:$0xff]   ;;  %5951 = vmatprep.subr.bf16.mxu0 %v6521_v33  ;;  %v737_v38 = vpop.f32.mrf.mxu0 }
 0x164   : > { %v995_v15 = vrot.slane %v7311_v14, 2  ;;  %2129 = vmatprep.mubr.bf16.mxu1 %v1742_v32  ;;  %v996_v44 = vrot.slane %v7370_v26, 2  ;;  %v945_v59 = vsel %vm898_vm0, %v6984_v1, %v944_v36  ;;  %v946_v55 = vrot.slane %v7333_v48, 1  ;;  %5952 = vmatpush3.bf16.msra.mxu0 %v6522_v60 }
 0x165   : > { %v1397_v41 = vsel %vm1145_vm1, %v1395_v62, %v1396_v28  ;;  %v1408_v43 = vsel %vm1145_vm1, %v1396_v28, %v1407_v42  ;;  %v1388_v5 = vsel %vm1145_vm1, %v6990_v4, %v1387_v29  ;;  %v1402_v62 = vsel %vm1145_vm1, %v1387_v29, %v1401_v57 }
 0x166   : > { %v1392_v16 = vrot.slane %v995_v15, 6  ;;  %v1744_v9 = vpack.c.bf16 %v1408_v43, %v1397_v41  ;;  %v1741_v37 = vpack.c.bf16 %v1402_v62, %v1388_v5  ;;  %v997_v24 = vsel %vm964_vm3, %v995_v15, %v996_v44  ;;  %v6649_v15 = vld [vmem:[%s10029_s2] ss:$0 sm:$0xff]  ;;  %v6270_v5 = vpop.f32.mrf.mxu0 }
 0x167   : > { %v1405_v32 = vrot.slane %v996_v44, 6  ;;  %v1393_v0 = vrot.slane %v997_v24, 6  ;;  %v947_v49 = vsel %vm898_vm0, %v944_v36, %v946_v55  ;;  %v1413_v28 = vrot.slane %v945_v59, 6 }
 0x168   : > { %v1427_v42 = vrot.slane %v946_v55, 6  ;;  %2290 = vmatprep.mubr.bf16.mxu0 %v1744_v9  ;;  %2130 = vmatmul.mubr.bf16.gmra.mxu1 %v1741_v37  ;;  %v1414_v7 = vrot.slane %v947_v49, 6  ;;  %v1059_v29 = vrot.slane %v7306_v20, 3  ;;  %v1062_v57 = vsel %vm1013_vm2, %v1060_v18, %v7002_v12 }
 0x169   : > { %v746_v33 = vadd.f32 %v6649_v15, %v6269_v3  ;;  %v1394_v41 = vsel %vm1145_vm1, %v1392_v16, %v1393_v0  ;;  %v1406_v36 = vsel %vm1145_vm1, %v1393_v0, %v1405_v32  ;;  %v1431_v44 = vrot.slane %v1062_v57, 6 }
 0x16a   : > { %v738_v59 = vadd.f32 %v6649_v15, %v737_v38  ;;  %v1743_v55 = vpack.c.bf16 %v1406_v36, %v1394_v41  ;;  %v1415_v49 = vsel %vm1145_vm1, %v1413_v28, %v1414_v7  ;;  %v1428_v60 = vsel %vm1145_vm1, %v1414_v7, %v1427_v42 }
 0x16b   : > { %v1061_v43 = vsel %vm1013_vm2, %v1059_v29, %v1060_v18  ;;  %v1747_v62 = vpack.c.bf16 %v1428_v60, %v1415_v49  ;;  %v1419_v9 = vrot.slane %v1059_v29, 6  ;;  %v7451_v3 = vmax.f32 %v746_v33, 0.0  ;;  %v740_v33 = vpop.f32.mrf.mxu0 }
 0x16c   : > { %v1420_v37 = vrot.slane %v1061_v43, 6  ;;  %v7453_v16 = vmax.f32 %v725_v56, 0.0  ;;  %2291 = vmatmul.mubr.bf16.gmra.mxu0 %v1743_v55  ;;  %v1411_v0 = vrot.slane %v7306_v20, 6  ;;  %v1425_v24 = vrot.slane %v7333_v48, 6 }
 0x16d   : > { %v998_v32 = vrot.slane %v7306_v20, 2  ;;  %2137 = vmatprep.mubr.bf16.mxu1 %v1747_v62  ;;  %v7460_v38 = vmax.f32 %v738_v59, 0.0  ;;  %v999_v28 = vrot.slane %v7333_v48, 2  ;;  %v960_v56 = vrot.slane %v7451_v3, 1 }
 0x16e   : > { %v1421_v7 = vsel %vm1145_vm1, %v1419_v9, %v1420_v37  ;;  %v1432_v18 = vsel %vm1145_vm1, %v1420_v37, %v1431_v44  ;;  %v1412_v29 = vsel %vm1145_vm1, %v6990_v4, %v1411_v0  ;;  %v1426_v57 = vsel %vm1145_vm1, %v1411_v0, %v1425_v24 }
 0x16f   : > { %v1749_v42 = vpack.c.bf16 %v1432_v18, %v1421_v7  ;;  %v1746_v41 = vpack.c.bf16 %v1426_v57, %v1412_v29  ;;  %v1000_v36 = vsel %vm964_vm3, %v998_v32, %v999_v28  ;;  %v1416_v55 = vrot.slane %v998_v32, 6 }
 0x170   : > { %v1429_v49 = vrot.slane %v999_v28, 6  ;;  %v1417_v44 = vrot.slane %v1000_v36, 6  ;;  %v749_v59 = vadd.f32 %v6649_v15, %v6270_v5  ;;  %v949_v60 = vsel %vm898_vm0, %v6984_v1, %v948_v54 }
 0x171   : > { %2298 = vmatprep.mubr.bf16.mxu0 %v1749_v42  ;;  %v950_v43 = vrot.slane %v7453_v16, 1  ;;  %2138 = vmatmul.mubr.bf16.gmra.mxu1 %v1746_v41  ;;  %v1437_v62 = vrot.slane %v949_v60, 6  ;;  %v1063_v9 = vrot.slane %v7379_v39, 3  ;;  %v1064_v37 = vrot.slane %v7453_v16, 3 }
 0x172   : > { %v741_v0 = vadd.f32 %v6649_v15, %v740_v33  ;;  %v1418_v24 = vsel %vm1145_vm1, %v1416_v55, %v1417_v44  ;;  %v1430_v32 = vsel %vm1145_vm1, %v1417_v44, %v1429_v49  ;;  %v7477_v7 = vmax.f32 %v749_v59, 0.0 }
 0x173   : > { %v951_v5 = vsel %vm898_vm0, %v948_v54, %v950_v43  ;;  %v1748_v18 = vpack.c.bf16 %v1430_v32, %v1418_v24  ;;  %v1451_v42 = vrot.slane %v950_v43, 6  ;;  %v1065_v29 = vsel %vm1013_vm2, %v1063_v9, %v1064_v37  ;;  %v6523_v24 = vld [vmem:[%s10032_s5 + $0x70] sm:$0xff]  }
 0x174   : > { %v1438_v28 = vrot.slane %v951_v5, 6  ;;  %v956_v57 = vrot.slane %v7460_v38, 1  ;;  %v1076_v41 = vrot.slane %v7477_v7, 3  ;;  %v1066_v15 = vsel %vm1013_vm2, %v1064_v37, %v7002_v12  ;;  %5953 = vmatprep.subr.bf16.mxu0 %v6523_v24 }
 0x175   : > { %v1443_v33 = vrot.slane %v1063_v9, 6  ;;  %2299 = vmatmul.mubr.bf16.gmra.mxu0 %v1748_v18  ;;  %v1444_v49 = vrot.slane %v1065_v29, 6  ;;  %v1455_v54 = vrot.slane %v1066_v15, 6  ;;  %v7489_v59 = vmax.f32 %v741_v0, 0.0  ;;  %v6524_v0 = vld [vmem:[%s10032_s5 + $0x30] sm:$0xff]  }
 0x176   : > { %v1439_v36 = vsel %vm1145_vm1, %v1437_v62, %v1438_v28  ;;  %v1452_v55 = vsel %vm1145_vm1, %v1438_v28, %v1451_v42  ;;  %v1435_v60 = vrot.slane %v7379_v39, 6  ;;  %v1449_v43 = vrot.slane %v7453_v16, 6  ;;  %5954 = vmatpush3.bf16.msra.mxu0 %v6524_v0 }
 0x177   : > { %v1752_v44 = vpack.c.bf16 %v1452_v55, %v1439_v36  ;;  %v1445_v9 = vsel %vm1145_vm1, %v1443_v33, %v1444_v49  ;;  %v1456_v37 = vsel %vm1145_vm1, %v1444_v49, %v1455_v54  ;;  %v1001_v62 = vrot.slane %v7379_v39, 2 }
 0x178   : > { %v1002_v32 = vrot.slane %v7453_v16, 2  ;;  %v1754_v5 = vpack.c.bf16 %v1456_v37, %v1445_v9  ;;  %v1436_v18 = vsel %vm1145_vm1, %v6990_v4, %v1435_v60  ;;  %v1450_v28 = vsel %vm1145_vm1, %v1435_v60, %v1449_v43 }
 0x179   : > { %2145 = vmatprep.mubr.bf16.mxu1 %v1752_v44  ;;  %v953_v42 = vsel %vm898_vm0, %v6984_v1, %v952_v47  ;;  %v1751_v29 = vpack.c.bf16 %v1450_v28, %v1436_v18  ;;  %v1440_v33 = vrot.slane %v1001_v62, 6  ;;  %v954_v49 = vrot.slane %v7395_v13, 1 }
 0x17a   : > { %v1003_v15 = vsel %vm964_vm3, %v1001_v62, %v1002_v32  ;;  %v1453_v36 = vrot.slane %v1002_v32, 6  ;;  %2306 = vmatprep.mubr.bf16.mxu0 %v1754_v5  ;;  %v1461_v54 = vrot.slane %v953_v42, 6  ;;  %v1067_v44 = vrot.slane %v7377_v22, 3 }
 0x17b   : > { %v1441_v55 = vrot.slane %v1003_v15, 6  ;;  %2146 = vmatmul.mubr.bf16.gmra.mxu1 %v1751_v29  ;;  %v1070_v60 = vsel %vm1013_vm2, %v1068_v31, %v7002_v12  ;;  %v1459_v43 = vrot.slane %v7377_v22, 6  ;;  %v1473_v9 = vrot.slane %v7395_v13, 6 }
 0x17c   : > { %v1004_v24 = vrot.slane %v7377_v22, 2  ;;  %v955_v32 = vsel %vm898_vm0, %v952_v47, %v954_v49  ;;  %v1475_v0 = vrot.slane %v954_v49, 6  ;;  %v1069_v28 = vsel %vm1013_vm2, %v1067_v44, %v1068_v31 }
 0x17d   : > { %v1442_v37 = vsel %vm1145_vm1, %v1440_v33, %v1441_v55  ;;  %v1454_v62 = vsel %vm1145_vm1, %v1441_v55, %v1453_v36  ;;  %v1462_v18 = vrot.slane %v955_v32, 6  ;;  %v1467_v42 = vrot.slane %v1067_v44, 6 }
 0x17e   : > { %v1753_v5 = vpack.c.bf16 %v1454_v62, %v1442_v37  ;;  %v1468_v29 = vrot.slane %v1069_v28, 6  ;;  %v1479_v15 = vrot.slane %v1070_v60, 6  ;;  %v1460_v6 = vsel %vm1145_vm1, %v6990_v4, %v1459_v43 }
 0x17f   : > { %v1474_v33 = vsel %vm1145_vm1, %v1459_v43, %v1473_v9  ;;  %v1463_v36 = vsel %vm1145_vm1, %v1461_v54, %v1462_v18  ;;  %v1476_v47 = vsel %vm1145_vm1, %v1462_v18, %v1475_v0  ;;  %v1005_v49 = vrot.slane %v7395_v13, 2 }
 0x180   : > { %2307 = vmatmul.mubr.bf16.gmra.mxu0 %v1753_v5  ;;  %v1756_v55 = vpack.c.bf16 %v1474_v33, %v1460_v6  ;;  %v1757_v37 = vpack.c.bf16 %v1476_v47, %v1463_v36  ;;  %v1469_v62 = vsel %vm1145_vm1, %v1467_v42, %v1468_v29  ;;  %v1480_v31 = vsel %vm1145_vm1, %v1468_v29, %v1479_v15 }
 0x181   : > { %v1464_v44 = vrot.slane %v1004_v24, 6  ;;  %v1759_v60 = vpack.c.bf16 %v1480_v31, %v1469_v62  ;;  %v1006_v32 = vsel %vm964_vm3, %v1004_v24, %v1005_v49  ;;  %v1477_v28 = vrot.slane %v1005_v49, 6 }
 0x182   : > { %v957_v54 = vsel %vm898_vm0, %v6984_v1, %v956_v57  ;;  %2153 = vmatprep.mubr.bf16.mxu1 %v1757_v37  ;;  %v1465_v43 = vrot.slane %v1006_v32, 6  ;;  %v958_v6 = vrot.slane %v7489_v59, 1  ;;  %v1071_v0 = vrot.slane %v7460_v38, 3 }
 0x183   : > { %v1485_v9 = vrot.slane %v957_v54, 6  ;;  %2314 = vmatprep.mubr.bf16.mxu0 %v1759_v60  ;;  %2154 = vmatmul.mubr.bf16.gmra.mxu1 %v1756_v55  ;;  %v1072_v5 = vrot.slane %v7489_v59, 3  ;;  %v1483_v18 = vrot.slane %v7460_v38, 6  ;;  %v1497_v24 = vrot.slane %v7489_v59, 6 }
 0x184   : > { %v1007_v42 = vrot.slane %v7460_v38, 2  ;;  %v1466_v29 = vsel %vm1145_vm1, %v1464_v44, %v1465_v43  ;;  %v1478_v15 = vsel %vm1145_vm1, %v1465_v43, %v1477_v28  ;;  %v959_v33 = vsel %vm898_vm0, %v956_v57, %v958_v6 }
 0x185   : > { %v1499_v36 = vrot.slane %v958_v6, 6  ;;  %v1758_v47 = vpack.c.bf16 %v1478_v15, %v1466_v29  ;;  %v1486_v49 = vrot.slane %v959_v33, 6  ;;  %v1073_v55 = vsel %vm1013_vm2, %v1071_v0, %v1072_v5 }
 0x186   : > { %v1074_v37 = vsel %vm1013_vm2, %v1072_v5, %v7002_v12  ;;  %v1491_v62 = vrot.slane %v1071_v0, 6  ;;  %v1492_v31 = vrot.slane %v1073_v55, 6  ;;  %v1484_v44 = vsel %vm1145_vm1, %v6990_v4, %v1483_v18 }
 0x187   : > { %v1503_v60 = vrot.slane %v1074_v37, 6  ;;  %v1487_v32 = vsel %vm1145_vm1, %v1485_v9, %v1486_v49  ;;  %v1500_v28 = vsel %vm1145_vm1, %v1486_v49, %v1499_v36  ;;  %v1498_v57 = vsel %vm1145_vm1, %v1483_v18, %v1497_v24  ;;  %v6525_v9 = vld [vmem:[%s10032_s5 + $0x68] sm:$0xff]  }
 0x188   : > { %2315 = vmatmul.mubr.bf16.gmra.mxu0 %v1758_v47  ;;  %v1008_v54 = vrot.slane %v7489_v59, 2  ;;  %v1762_v43 = vpack.c.bf16 %v1500_v28, %v1487_v32  ;;  %v1493_v6 = vsel %vm1145_vm1, %v1491_v62, %v1492_v31  ;;  %v1761_v5 = vpack.c.bf16 %v1498_v57, %v1484_v44  ;;  %5955 = vmatprep.subr.bf16.mxu0 %v6525_v9 }
 0x189   : > { %v1504_v0 = vsel %vm1145_vm1, %v1492_v31, %v1503_v60  ;;  %v1488_v33 = vrot.slane %v1007_v42, 6  ;;  %v961_v24 = vsel %vm898_vm0, %v6984_v1, %v960_v56  ;;  %v962_v36 = vrot.slane %v7477_v7, 1 }
 0x18a   : > { %v1764_v29 = vpack.c.bf16 %v1504_v0, %v1493_v6  ;;  %v1009_v15 = vsel %vm964_vm3, %v1007_v42, %v1008_v54  ;;  %v1501_v47 = vrot.slane %v1008_v54, 6  ;;  %2161 = vmatprep.mubr.bf16.mxu1 %v1762_v43  ;;  %v1075_v49 = vrot.slane %v7451_v3, 3  ;;  %v6526_v42 = vld [vmem:[%s10032_s5 + $0x28] sm:$0xff]  }
 0x18b   : > { %v1489_v18 = vrot.slane %v1009_v15, 6  ;;  %2162 = vmatmul.mubr.bf16.gmra.mxu1 %v1761_v5  ;;  %v1509_v55 = vrot.slane %v961_v24, 6  ;;  %v1078_v37 = vsel %vm1013_vm2, %v1076_v41, %v7002_v12  ;;  %v1507_v62 = vrot.slane %v7451_v3, 6  ;;  %5956 = vmatpush3.bf16.msra.mxu0 %v6526_v42 }
 0x18c   : > { %2322 = vmatprep.mubr.bf16.mxu0 %v1764_v29  ;;  %v1521_v1 = vrot.slane %v7477_v7, 6  ;;  %v963_v44 = vsel %vm898_vm0, %v960_v56, %v962_v36  ;;  %v1523_v32 = vrot.slane %v962_v36, 6  ;;  %v1077_v12 = vsel %vm1013_vm2, %v1075_v49, %v1076_v41 }
 0x18d   : > { %v1490_v31 = vsel %vm1145_vm1, %v1488_v33, %v1489_v18  ;;  %v1502_v60 = vsel %vm1145_vm1, %v1489_v18, %v1501_v47  ;;  %v1510_v57 = vrot.slane %v963_v44, 6  ;;  %v1515_v54 = vrot.slane %v1075_v49, 6 }
 0x18e   : > { %v1763_v28 = vpack.c.bf16 %v1502_v60, %v1490_v31  ;;  %v1516_v43 = vrot.slane %v1077_v12, 6  ;;  %v1527_v6 = vrot.slane %v1078_v37, 6  ;;  %v1508_v0 = vsel %vm1145_vm1, %v6990_v4, %v1507_v62 }
 0x18f   : > { %v1522_v5 = vsel %vm1145_vm1, %v1507_v62, %v1521_v1  ;;  %v1511_v56 = vsel %vm1145_vm1, %v1509_v55, %v1510_v57  ;;  %v1524_v29 = vsel %vm1145_vm1, %v1510_v57, %v1523_v32  ;;  %v1010_v33 = vrot.slane %v7451_v3, 2 }
 0x190   : > { %2323 = vmatmul.mubr.bf16.gmra.mxu0 %v1763_v28  ;;  %v1766_v15 = vpack.c.bf16 %v1522_v5, %v1508_v0  ;;  %v1767_v47 = vpack.c.bf16 %v1524_v29, %v1511_v56  ;;  %v1517_v41 = vsel %vm1145_vm1, %v1515_v54, %v1516_v43  ;;  %v1528_v9 = vsel %vm1145_vm1, %v1516_v43, %v1527_v6 }
 0x191   : > { %v1011_v18 = vrot.slane %v7477_v7, 2  ;;  %v1769_v24 = vpack.c.bf16 %v1528_v9, %v1517_v41  ;;  %v1512_v36 = vrot.slane %v1010_v33, 6  ;;  %v1080_v49 = vrot.slane %v6986_v2, 4 }
 0x192   : > { %v1081_v42 = vrot.slane %v7007_v17, 4  ;;  %2169 = vmatprep.mubr.bf16.mxu1 %v1767_v47  ;;  %v10081_v62 = vrot.slane %v6980_v61, 4  ;;  %v1088_v31 = vsel %vm1079_vm4, %v1086_v30, %v6995_v8  ;;  %v1089_v10 = vrot.slane %v7042_v52, 4 }
 0x193   : > { %v1012_v55 = vsel %vm964_vm3, %v1010_v33, %v1011_v18  ;;  %v1525_v37 = vrot.slane %v1011_v18, 6  ;;  %2330 = vmatprep.mubr.bf16.mxu0 %v1769_v24  ;;  %2170 = vmatmul.mubr.bf16.gmra.mxu1 %v1766_v15  ;;  %v1158_v44 = vrot.slane %v1080_v49, 6  ;;  %v1193_v61 = vrot.slane %v1088_v31, 6 }
 0x194   : > { %v1087_v1 = vsel %vm1079_vm4, %v10081_v62, %v1086_v30  ;;  %v1513_v2 = vrot.slane %v1012_v55, 6  ;;  %v1082_v17 = vsel %vm1079_vm4, %v1080_v49, %v1081_v42  ;;  %v1084_v60 = vsel %vm1079_vm4, %v1081_v42, %v6995_v8 }
 0x195   : > { %v1159_v32 = vrot.slane %v1082_v17, 6  ;;  %v1169_v28 = vrot.slane %v1084_v60, 6  ;;  %v1183_v57 = vrot.slane %v1087_v1, 6  ;;  %v1090_v30 = vrot.slane %v7066_v34, 4 }
 0x196   : > { %v1514_v12 = vsel %vm1145_vm1, %v1512_v36, %v1513_v2  ;;  %v1526_v54 = vsel %vm1145_vm1, %v1513_v2, %v1525_v37  ;;  %v1206_v47 = vrot.slane %v1089_v10, 6  ;;  %v1093_v9 = vrot.slane %v7035_v45, 4 }
 0x197   : > { %v1768_v43 = vpack.c.bf16 %v1526_v54, %v1514_v12  ;;  %v1160_v6 = vsel %vm1145_vm1, %v1158_v44, %v1159_v32  ;;  %v1170_v0 = vsel %vm1145_vm1, %v1159_v32, %v1169_v28  ;;  %v1184_v5 = vsel %vm1145_vm1, %v7014_v21, %v1183_v57  ;;  %v6527_v44 = vld [vmem:[%s10032_s5 + $0x60] sm:$0xff]  }
 0x198   : > { %v1695_v56 = vpack.c.bf16 %v1170_v0, %v1160_v6  ;;  %v1194_v29 = vsel %vm1145_vm1, %v1183_v57, %v1193_v61  ;;  %v1091_v15 = vsel %vm1079_vm4, %v1089_v10, %v1090_v30  ;;  %v1092_v33 = vsel %vm1079_vm4, %v1090_v30, %v6995_v8  ;;  %5957 = vmatprep.subr.bf16.mxu0 %v6527_v44 }
 0x199   : > { %2331 = vmatmul.mubr.bf16.gmra.mxu0 %v1768_v43  ;;  %v1700_v52 = vpack.c.bf16 %v1194_v29, %v1184_v5  ;;  %v1207_v34 = vrot.slane %v1091_v15, 6  ;;  %v1217_v41 = vrot.slane %v1092_v33, 6  ;;  %v10082_v18 = vrot.slane %v7044_v53, 4  ;;  %v6528_v53 = vld [vmem:[%s10032_s5 + $0x20] sm:$0xff]  }
 0x19a   : > { %6287 = vmatprep.mubr.bf16.mxu1 %v1695_v56  ;;  %v1097_v24 = vrot.slane %v7094_v19, 4  ;;  %v1098_v36 = vrot.slane %v7158_v25, 4  ;;  %v1101_v37 = vrot.slane %v7111_v27, 4  ;;  %v1230_v31 = vrot.slane %v1093_v9, 6  ;;  %5958 = vmatpush3.bf16.msra.mxu0 %v6528_v53 }
 0x19b   : > { %v1096_v21 = vsel %vm1079_vm4, %v10082_v18, %v6995_v8  ;;  %v1208_v49 = vsel %vm1145_vm1, %v1206_v47, %v1207_v34  ;;  %v1218_v42 = vsel %vm1145_vm1, %v1207_v34, %v1217_v41  ;;  %6288 = vmatmul.mubr.bf16.vlgmr.msra.gmra.mxu1 %v1700_v52  ;;  %v10083_v45 = vmov %v10082_v18 }
 0x19c   : > { %v1241_v55 = vrot.slane %v1096_v21, 6  ;;  %v1705_v62 = vpack.c.bf16 %v1218_v42, %v1208_v49  ;;  %v1095_v1 = vsel %vm1079_vm4, %v1093_v9, %v10083_v45  ;;  %v1099_v2 = vsel %vm1079_vm4, %v1097_v24, %v1098_v36 }
 0x19d   : > { %v1231_v17 = vrot.slane %v1095_v1, 6  ;;  %v1100_v19 = vsel %vm1079_vm4, %v1098_v36, %v6995_v8  ;;  %v1254_v25 = vrot.slane %v1097_v24, 6  ;;  %v1255_v60 = vrot.slane %v1099_v2, 6 }
 0x19e   : > { %6291 = vmatprep.mubr.bf16.mxu1 %v1705_v62  ;;  %v1265_v27 = vrot.slane %v1100_v19, 6  ;;  %v10084_v57 = vrot.slane %v7150_v11, 4  ;;  %v1105_v43 = vrot.slane %v7182_v58, 4  ;;  %v1106_v6 = vrot.slane %v7234_v35, 4 }
 0x19f   : > { %v1232_v32 = vsel %vm1145_vm1, %v1230_v31, %v1231_v17  ;;  %v1242_v28 = vsel %vm1145_vm1, %v1231_v17, %v1241_v55  ;;  %v1256_v12 = vsel %vm1145_vm1, %v1254_v25, %v1255_v60  ;;  %v1110_v0 = vrot.slane %v7226_v40, 4 }
 0x1a0   : > { %v1103_v61 = vsel %vm1079_vm4, %v1101_v37, %v10084_v57  ;;  %v1266_v54 = vsel %vm1145_vm1, %v1255_v60, %v1265_v27  ;;  %v10085_v10 = vmov %v10084_v57  ;;  %v1710_v5 = vpack.c.bf16 %v1242_v28, %v1232_v32  ;;  %v6530_v28 = vld [vmem:[%s10032_s5 + $0x18] sm:$0xff]  }
 0x1a1   : > { %v1104_v30 = vsel %vm1079_vm4, %v10085_v10, %v6995_v8  ;;  %v1278_v56 = vrot.slane %v1101_v37, 6  ;;  %v1279_v29 = vrot.slane %v1103_v61, 6  ;;  %v1715_v15 = vpack.c.bf16 %v1266_v54, %v1256_v12 }
 0x1a2   : > { %v1289_v33 = vrot.slane %v1104_v30, 6  ;;  %v1107_v52 = vsel %vm1079_vm4, %v1105_v43, %v1106_v6  ;;  %v1108_v47 = vsel %vm1079_vm4, %v1106_v6, %v6995_v8  ;;  %v1302_v11 = vrot.slane %v1105_v43, 6 }
 0x1a3   : > { %6292 = vmatmul.mubr.bf16.gmra.mxu1 %v1710_v5  ;;  %v1303_v34 = vrot.slane %v1107_v52, 6  ;;  %v1313_v41 = vrot.slane %v1108_v47, 6  ;;  %v1109_v58 = vrot.slane %v7180_v50, 4  ;;  %v1113_v35 = vrot.slane %v7242_v46, 4 }
 0x1a4   : > { %6295 = vmatprep.mubr.bf16.mxu1 %v1715_v15  ;;  %v1114_v40 = vrot.slane %v7302_v51, 4  ;;  %v1280_v9 = vsel %vm1145_vm1, %v1278_v56, %v1279_v29  ;;  %v1290_v18 = vsel %vm1145_vm1, %v1279_v29, %v1289_v33  ;;  %v1112_v49 = vsel %vm1079_vm4, %v1110_v0, %v6995_v8  ;;  %v6531_v56 = vld [vmem:[%s10032_s5 + $0xb8] sm:$0xff]  }
 0x1a5   : > { %v1304_v21 = vsel %vm1145_vm1, %v1302_v11, %v1303_v34  ;;  %v1314_v24 = vsel %vm1145_vm1, %v1303_v34, %v1313_v41  ;;  %v1111_v36 = vsel %vm1079_vm4, %v1109_v58, %v1110_v0  ;;  %v1118_v51 = vrot.slane %v7260_v23, 4  ;;  %6319 = vmatprep.subr.bf16.mxu1 %v6531_v56 }
 0x1a6   : > { %v1115_v50 = vsel %vm1079_vm4, %v1113_v35, %v1114_v40  ;;  %v1116_v46 = vsel %vm1079_vm4, %v1114_v40, %v6995_v8  ;;  %v1720_v42 = vpack.c.bf16 %v1290_v18, %v1280_v9  ;;  %v1725_v55 = vpack.c.bf16 %v1314_v24, %v1304_v21  ;;  %6320 = vmatpush3.bf16.msra.mxu1 %v6531_v56 }
 0x1a7   : > { %v1326_v37 = vrot.slane %v1109_v58, 6  ;;  %v1327_v62 = vrot.slane %v1111_v36, 6  ;;  %v1337_v45 = vrot.slane %v1112_v49, 6  ;;  %v1350_v1 = vrot.slane %v1113_v35, 6 }
 0x1a8   : > { %v1351_v31 = vrot.slane %v1115_v50, 6  ;;  %v1361_v2 = vrot.slane %v1116_v46, 6  ;;  %v1117_v17 = vrot.slane %v7255_v63, 4  ;;  %v1121_v19 = vrot.slane %v7311_v14, 4  ;;  %v6529_v63 = vld [vmem:[%s10032_s5 + $0x58] sm:$0xff]  }
 0x1a9   : > { %v1122_v25 = vrot.slane %v7370_v26, 4  ;;  %v1328_v60 = vsel %vm1145_vm1, %v1326_v37, %v1327_v62  ;;  %v1338_v23 = vsel %vm1145_vm1, %v1327_v62, %v1337_v45  ;;  %v1120_v32 = vsel %vm1079_vm4, %v1118_v51, %v6995_v8  ;;  %5959 = vmatprep.subr.bf16.mxu0 %v6529_v63 }
 0x1aa   : > { %v1352_v44 = vsel %vm1145_vm1, %v1350_v1, %v1351_v31  ;;  %v1362_v27 = vsel %vm1145_vm1, %v1351_v31, %v1361_v2  ;;  %v1119_v53 = vsel %vm1079_vm4, %v1117_v17, %v1118_v51  ;;  %v1126_v57 = vrot.slane %v7333_v48, 4  ;;  %5960 = vmatpush3.bf16.msra.mxu0 %v6530_v28 }
 0x1ab   : > { %6296 = vmatmul.mubr.bf16.gmra.mxu1 %v1720_v42  ;;  %v1123_v14 = vsel %vm1079_vm4, %v1121_v19, %v1122_v25  ;;  %v1124_v26 = vsel %vm1079_vm4, %v1122_v25, %v6995_v8  ;;  %v1730_v61 = vpack.c.bf16 %v1338_v23, %v1328_v60  ;;  %v1735_v12 = vpack.c.bf16 %v1362_v27, %v1352_v44  ;;  %v6534_v27 = vld [vmem:[%s10032_s5 + $0x10] sm:$0xff]  }
 0x1ac   : > { %6299 = vmatprep.mubr.bf16.mxu1 %v1725_v55  ;;  %v1374_v54 = vrot.slane %v1117_v17, 6  ;;  %v1375_v10 = vrot.slane %v1119_v53, 6  ;;  %v1385_v30 = vrot.slane %v1120_v32, 6  ;;  %v1398_v43 = vrot.slane %v1121_v19, 6  ;;  %v6533_v19 = vld [vmem:[%s10032_s5 + $0x50] sm:$0xff]   ;;  %v6535_v32 = vld [vmem:[%s10032_s5 + $0xa8] sm:$0xff]  }
 0x1ad   : > { %v1399_v6 = vrot.slane %v1123_v14, 6  ;;  %v1409_v0 = vrot.slane %v1124_v26, 6  ;;  %v1125_v5 = vrot.slane %v7306_v20, 4  ;;  %v1129_v48 = vrot.slane %v7379_v39, 4  ;;  %5961 = vmatprep.subr.bf16.mxu0 %v6533_v19  ;;  %v6543_v19 = vld [vmem:[%s10032_s5 + $0x88] sm:$0xff]  }
 0x1ae   : > { %v1130_v29 = vrot.slane %v7453_v16, 4  ;;  %v1376_v15 = vsel %vm1145_vm1, %v1374_v54, %v1375_v10  ;;  %v1386_v33 = vsel %vm1145_vm1, %v1375_v10, %v1385_v30  ;;  %v1128_v11 = vsel %vm1079_vm4, %v1126_v57, %v6995_v8  ;;  %5962 = vmatpush3.bf16.msra.mxu0 %v6534_v27 }
 0x1af   : > { %v1400_v52 = vsel %vm1145_vm1, %v1398_v43, %v1399_v6  ;;  %v1410_v47 = vsel %vm1145_vm1, %v1399_v6, %v1409_v0  ;;  %v1127_v20 = vsel %vm1079_vm4, %v1125_v5, %v1126_v57  ;;  %v1134_v16 = vrot.slane %v7395_v13, 4  ;;  %v6532_v13 = vld [vmem:[%s10032_s5 + $0xb0] sm:$0xff]  }
 0x1b0   : > { %v1131_v34 = vsel %vm1079_vm4, %v1129_v48, %v1130_v29  ;;  %v1132_v39 = vsel %vm1079_vm4, %v1130_v29, %v6995_v8  ;;  %v1740_v41 = vpack.c.bf16 %v1386_v33, %v1376_v15  ;;  %v1745_v58 = vpack.c.bf16 %v1410_v47, %v1400_v52  ;;  %6321 = vmatprep.subr.bf16.mxu1 %v6532_v13  ;;  %v6536_v29 = vld [vmem:[%s10032_s5 + $0xa0] sm:$0xff]  }
 0x1b1   : > { %v1422_v35 = vrot.slane %v1125_v5, 6  ;;  %v1423_v40 = vrot.slane %v1127_v20, 6  ;;  %v1433_v9 = vrot.slane %v1128_v11, 6  ;;  %v1446_v18 = vrot.slane %v1129_v48, 6  ;;  %6322 = vmatpush3.bf16.msra.mxu1 %v6532_v13  ;;  %v6537_v11 = vld [vmem:[%s10032_s5 + $0x48] sm:$0xff]   ;;  %v6540_v13 = vld [vmem:[%s10032_s5 + $0x90] sm:$0xff]  }
 0x1b2   : > { %v1447_v21 = vrot.slane %v1131_v34, 6  ;;  %v1457_v24 = vrot.slane %v1132_v39, 6  ;;  %v1133_v36 = vrot.slane %v7377_v22, 4  ;;  %v1137_v49 = vrot.slane %v7460_v38, 4  ;;  %6323 = vmatprep.subr.bf16.mxu1 %v6535_v32  ;;  %v6538_v39 = vld [vmem:[%s10032_s5 + $0x8] sm:$0xff]   ;;  %5963 = vmatprep.subr.bf16.mxu0 %v6537_v11 }
 0x1b3   : > { %6300 = vmatmul.mubr.bf16.gmra.mxu1 %v1730_v61  ;;  %v1138_v50 = vrot.slane %v7489_v59, 4  ;;  %v1424_v46 = vsel %vm1145_vm1, %v1422_v35, %v1423_v40  ;;  %v1434_v51 = vsel %vm1145_vm1, %v1423_v40, %v1433_v9  ;;  %v1136_v38 = vsel %vm1079_vm4, %v1134_v16, %v6995_v8  ;;  %5964 = vmatpush3.bf16.msra.mxu0 %v6538_v39  ;;  %v6539_v40 = vld [vmem:[%s10032_s5 + $0x98] sm:$0xff]  }
 0x1b4   : > { %6303 = vmatprep.mubr.bf16.mxu1 %v1735_v12  ;;  %v1448_v42 = vsel %vm1145_vm1, %v1446_v18, %v1447_v21  ;;  %v1458_v55 = vsel %vm1145_vm1, %v1447_v21, %v1457_v24  ;;  %v1135_v22 = vsel %vm1079_vm4, %v1133_v36, %v1134_v16  ;;  %v1142_v62 = vrot.slane %v7477_v7, 4 }
 0x1b5   : > { %v1139_v59 = vsel %vm1079_vm4, %v1137_v49, %v1138_v50  ;;  %v1140_v37 = vsel %vm1079_vm4, %v1138_v50, %v6995_v8  ;;  %v1750_v45 = vpack.c.bf16 %v1434_v51, %v1424_v46  ;;  %v1755_v1 = vpack.c.bf16 %v1458_v55, %v1448_v42  ;;  %6324 = vmatpush3.bf16.msra.mxu1 %v6535_v32 }
 0x1b6   : > { %v1470_v31 = vrot.slane %v1133_v36, 6  ;;  %v1471_v2 = vrot.slane %v1135_v22, 6  ;;  %v1481_v17 = vrot.slane %v1136_v38, 6  ;;  %v1494_v25 = vrot.slane %v1137_v49, 6  ;;  %6325 = vmatprep.subr.bf16.mxu1 %v6536_v29  ;;  %v6541_v38 = vld [vmem:[%s10032_s5 + $0x40] sm:$0xff]  }
 0x1b7   : > { %v1495_v60 = vrot.slane %v1139_v59, 6  ;;  %v1505_v23 = vrot.slane %v1140_v37, 6  ;;  %v1141_v44 = vrot.slane %v7451_v3, 4  ;;  %v1144_v26 = vsel %vm1079_vm4, %v1142_v62, %v6995_v8  ;;  %5965 = vmatprep.subr.bf16.mxu0 %v6541_v38 }
 0x1b8   : > { %v1472_v7 = vsel %vm1145_vm1, %v1470_v31, %v1471_v2  ;;  %v1482_v53 = vsel %vm1145_vm1, %v1471_v2, %v1481_v17  ;;  %v1529_v10 = vrot.slane %v1144_v26, 6 }
 0x1b9   : > { %v1496_v63 = vsel %vm1145_vm1, %v1494_v25, %v1495_v60  ;;  %v1506_v14 = vsel %vm1145_vm1, %v1495_v60, %v1505_v23  ;;  %v1143_v3 = vsel %vm1079_vm4, %v1141_v44, %v1142_v62  ;;  %v1760_v28 = vpack.c.bf16 %v1482_v53, %v1472_v7  ;;  %6326 = vmatpush3.bf16.msra.mxu1 %v6536_v29  ;;  %v6544_v7 = vld [vmem:[%s10032_s5 + $0x80] sm:$0xff]  }
 0x1ba   : > { %v1765_v61 = vpack.c.bf16 %v1506_v14, %v1496_v63  ;;  %v1518_v12 = vrot.slane %v1141_v44, 6  ;;  %v1519_v54 = vrot.slane %v1143_v3, 6  ;;  %6327 = vmatprep.subr.bf16.mxu1 %v6539_v40 }
 0x1bb   : > { %6304 = vmatmul.mubr.bf16.gmra.mxu1 %v1740_v41 }
 0x1bc   : > { %6307 = vmatprep.mubr.bf16.mxu1 %v1745_v58  ;;  %v1520_v5 = vsel %vm1145_vm1, %v1518_v12, %v1519_v54  ;;  %v1530_v56 = vsel %vm1145_vm1, %v1519_v54, %v1529_v10 }
 0x1bd   : > { %v1770_v52 = vpack.c.bf16 %v1530_v56, %v1520_v5  ;;  %6328 = vmatpush3.bf16.msra.mxu1 %v6539_v40 }
 0x1be   : > { %6329 = vmatprep.subr.bf16.mxu1 %v6540_v13 }
 0x1c1   : > { %6330 = vmatpush3.bf16.msra.mxu1 %v6540_v13 }
 0x1c2   : > { %6331 = vmatprep.subr.bf16.mxu1 %v6543_v19 }
 0x1c3   : > { %6308 = vmatmul.mubr.bf16.gmra.mxu1 %v1750_v45 }
 0x1c4   : > { %6311 = vmatprep.mubr.bf16.mxu1 %v1755_v1  ;;  %v6542_v1 = vld [vmem:[%s10032_s5] sm:$0xff]  }
 0x1c5   : > { %5966 = vmatpush3.bf16.msra.mxu0 %v6542_v1  ;;  %6332 = vmatpush3.bf16.msra.mxu1 %v6543_v19 }
 0x1c6   : > { %6333 = vmatprep.subr.bf16.mxu1 %v6544_v7 }
 0x1c9   : > { %6334 = vmatpush3.bf16.msra.mxu1 %v6544_v7 }
 0x1ca   : > { %v5719_v57 = vpop.f32.mrf.mxu1 }
 0x1cb   : > { %6312 = vmatmul.mubr.bf16.gmra.mxu1 %v1760_v28 }
 0x1cc   : > { %v5720_v30 = vpop.f32.mrf.mxu1  ;;  %6315 = vmatprep.mubr.bf16.mxu1 %v1765_v61 }
 0x1cd   : > { %v7750_v43 = vpop.f32.mrf.mxu0  ;;  %v7752_v6 = vadd.f32 %v5720_v30, %v5719_v57 }
 0x1ce   : > { %v7754_v0 = vpop.f32.mrf.mxu1 }
 0x1cf   : > { %v7758_v48 = vpop.f32.mrf.mxu0 }
 0x1d0   : > { %v7763_v15 = vpop.f32.mrf.mxu1 }
 0x1d1   : > { %v7765_v33 = vpop.f32.mrf.mxu0 }
 0x1d2   : > { %v5725_v47 = vpop.f32.mrf.mxu1 }
 0x1d3   : > { %v7767_v20 = vpop.f32.mrf.mxu0  ;;  %6316 = vmatmul.mubr.bf16.gmra.mxu1 %v1770_v52 }
 0x1d4   : > { %v5726_v34 = vpop.f32.mrf.mxu1 }
 0x1d5   : > { %v7775_v16 = vpop.f32.mrf.mxu0  ;;  %v7777_v41 = vadd.f32 %v5726_v34, %v5725_v47 }
 0x1d6   : > { %v7779_v58 = vpop.f32.mrf.mxu1 }
 0x1d7   : > { %v7781_v35 = vpop.f32.mrf.mxu0 }
 0x1d8   : > { %v7786_v9 = vpop.f32.mrf.mxu1 }
 0x1d9   : > { %v7788_v18 = vpop.f32.mrf.mxu0 }
 0x1db   : > { %v7790_v24 = vpop.f32.mrf.mxu0 }
 0x1dc   : > { %v5731_v21 = vpop.f32.mrf.mxu1 }
 0x1de   : > { %v5732_v36 = vpop.f32.mrf.mxu1 }
 0x1df   : > { %v7792_v49 = vadd.f32 %v5732_v36, %v5731_v21 }
 0x1e0   : > { %v7794_v50 = vpop.f32.mrf.mxu1  ;;  %v7799_v46 = vpop.f32.mrf.mxu0 }
 0x1e2   : > { %v7801_v51 = vpop.f32.mrf.mxu1  ;;  %v7803_v42 = vpop.f32.mrf.mxu0 }
 0x1e4   : > { %v7805_v55 = vpop.f32.mrf.mxu0 }
 0x1e5   : > { %v5737_v22 = vpop.f32.mrf.mxu1 }
 0x1e6   : > { %v7810_v59 = vpop.f32.mrf.mxu0 }
 0x1e7   : > { %v5738_v37 = vpop.f32.mrf.mxu1 }
 0x1e8   : > { %v7814_v45 = vadd.f32 %v5738_v37, %v5737_v22 }
 0x1e9   : > { %v7812_v62 = vpop.f32.mrf.mxu0  ;;  %v7819_v31 = vpop.f32.mrf.mxu1 }
 0x1eb   : > { %v7821_v2 = vpop.f32.mrf.mxu0  ;;  %v7823_v17 = vpop.f32.mrf.mxu1 }
 0x1ed   : > { %v7828_v25 = vpop.f32.mrf.mxu0 }
 0x1ee   : > { %v5743_v60 = vpop.f32.mrf.mxu1 }
 0x1ef   : > { %v7830_v23 = vpop.f32.mrf.mxu0 }
 0x1f0   : > { %v5744_v44 = vpop.f32.mrf.mxu1 }
 0x1f1   : > { %v7832_v27 = vadd.f32 %v5744_v44, %v5743_v60 }
 0x1f2   : > { %v7837_v53 = vpop.f32.mrf.mxu1 }
 0x1f3   : > { %v7839_v32 = vpop.f32.mrf.mxu0 }
 0x1f4   : > { %v7841_v63 = vpop.f32.mrf.mxu1 }
 0x1f5   : > { %v7843_v14 = vpop.f32.mrf.mxu0 }
 0x1f7   : > { %v7845_v3 = vpop.f32.mrf.mxu0 }
 0x1f8   : > { %v5749_v26 = vpop.f32.mrf.mxu1 }
 0x1f9   : > { %v7847_v28 = vpop.f32.mrf.mxu0 }
 0x1fa   : > { %v5750_v57 = vpop.f32.mrf.mxu1 }
 0x1fb   : > { %v7849_v61 = vadd.f32 %v5750_v57, %v5749_v26 }
 0x1fc   : > { %v7851_v12 = vpop.f32.mrf.mxu0  ;;  %v7853_v54 = vpop.f32.mrf.mxu1 }
 0x1fe   : > { %v7855_v10 = vpop.f32.mrf.mxu0  ;;  %v7857_v30 = vpop.f32.mrf.mxu1 }
 0x200   : > { %v7859_v5 = vpop.f32.mrf.mxu0 }
 0x202   : > { %v5755_v56 = vpop.f32.mrf.mxu1  ;;  %v7861_v29 = vpop.f32.mrf.mxu0 }
 0x204   : > { %v5756_v52 = vpop.f32.mrf.mxu1 }
 0x205   : > { %v7863_v47 = vadd.f32 %v5756_v52, %v5755_v56 }
 0x206   : > { %v7865_v11 = vpop.f32.mrf.mxu1 }
 0x207   : > { %v7867_v34 = vpop.f32.mrf.mxu0 }
 0x208   : > { %v7869_v39 = vpop.f32.mrf.mxu1 }
 0x209   : > { %v7871_v40 = vpop.f32.mrf.mxu0 }
 0x20b   : > { %v7873_v21 = vpop.f32.mrf.mxu0  ;;  %v5761_v36 = vpop.f32.mrf.mxu1 }
 0x20c   : > { %10086 = vst [vmem:[#allocation7_spill] sm:$0xff] %v7873_v21 }
 0x20d   : > { %v7875_v13 = vpop.f32.mrf.mxu0  ;;  %v5762_v22 = vpop.f32.mrf.mxu1 }
 0x20e   : > { %10087 = vst [vmem:[#allocation8_spill] sm:$0xff] %v7875_v13  ;;  %v7877_v38 = vadd.f32 %v5762_v22, %v5761_v36 }
 0x20f   : > { %v7881_v1 = vpop.f32.mrf.mxu1 }
 0x210   : > { %10088 = vst [vmem:[#allocation9_spill] sm:$0xff] %v7877_v38  ;;  %v7879_v37 = vpop.f32.mrf.mxu0 }
 0x211   : > { %10089 = vst [vmem:[#allocation10_spill] sm:$0xff] %v7879_v37  ;;  %v7885_v60 = vpop.f32.mrf.mxu1 }
 0x212   : > { %v7883_v19 = vpop.f32.mrf.mxu0 }
 0x213   : > { %10090 = vst [vmem:[#allocation11_spill] sm:$0xff] %v7883_v19 }
 0x214   : > { %v7887_v44 = vpop.f32.mrf.mxu0 }
 0x215   : > { %10091 = vst [vmem:[#allocation12_spill] sm:$0xff] %v7887_v44  ;;  %v5767_v7 = vpop.f32.mrf.mxu1 }
 0x216   : > { %v7889_v26 = vpop.f32.mrf.mxu0 }
 0x217   : > { %10092 = vst [vmem:[#allocation13_spill] sm:$0xff] %v7889_v26  ;;  %v5768_v57 = vpop.f32.mrf.mxu1 }
 0x218   : > { %v7891_v56 = vadd.f32 %v5768_v57, %v5767_v7 }
 0x219   : > { %v7893_v52 = vpop.f32.mrf.mxu1  ;;  %v7895_v36 = vpop.f32.mrf.mxu0 }
 0x21a   : > { %10093 = vst [vmem:[#allocation14_spill] sm:$0xff] %v7891_v56  ;;  %10094 = vst [vmem:[#allocation15_spill] sm:$0xff] %v7895_v36 }
 0x21b   : > { %v7897_v22 = vpop.f32.mrf.mxu0  ;;  %v7899_v8 = vpop.f32.mrf.mxu1 }
 0x21c   : > { %10095 = vst [vmem:[#allocation16_spill] sm:$0xff] %v7897_v22 }
 0x21d   : > { %v7901_v4 = vpop.f32.mrf.mxu0 }
 0x21e   : > { %10096 = vst [vmem:[#allocation17_spill] sm:$0xff] %v7901_v4 }
 0x21f   : > { %v7903_v19 = vpop.f32.mrf.mxu0  ;;  %v5773_v37 = vpop.f32.mrf.mxu1 }
 0x220   : > { %10097 = vst [vmem:[#allocation18_spill] sm:$0xff] %v7903_v19 }
 0x221   : > { %v5774_v44 = vpop.f32.mrf.mxu1 }
 0x222   : > { %v7905_v38 = vadd.f32 %v5774_v44, %v5773_v37 }
 0x223   : > { %v7907_v26 = vpop.f32.mrf.mxu0  ;;  %v7909_v7 = vpop.f32.mrf.mxu1 }
 0x224   : > { %10098 = vst [vmem:[#allocation19_spill] sm:$0xff] %v7905_v38  ;;  %10099 = vst [vmem:[#allocation20_spill] sm:$0xff] %v7907_v26 }
 0x225   : > { %10100 = vst [vmem:[#allocation21_spill] sm:$0xff] %v7909_v7  ;;  %v7911_v57 = vpop.f32.mrf.mxu0  ;;  %v7913_v56 = vpop.f32.mrf.mxu1 }
 0x226   : > { %10101 = vst [vmem:[#allocation22_spill] sm:$0xff] %v7911_v57  ;;  %10102 = vst [vmem:[#allocation23_spill] sm:$0xff] %v7913_v56 }
 0x227   : > { %v7915_v36 = vpop.f32.mrf.mxu0 }
 0x228   : > { %10103 = vst [vmem:[#allocation24_spill] sm:$0xff] %v7915_v36  ;;  %v5779_v22 = vpop.f32.mrf.mxu1 }
 0x229   : > { %v7917_v13 = vpop.f32.mrf.mxu0 }
 0x22a   : > { %10104 = vst [vmem:[#allocation25_spill] sm:$0xff] %v7917_v13  ;;  %v5780_v4 = vpop.f32.mrf.mxu1 }
 0x22b   : > { %v7919_v21 = vadd.f32 %v5780_v4, %v5779_v22 }
 0x22c   : > { %v7921_v19 = vpop.f32.mrf.mxu0  ;;  %v7923_v37 = vpop.f32.mrf.mxu1 }
 0x22d   : > { %10105 = vst [vmem:[#allocation26_spill] sm:$0xff] %v7919_v21  ;;  %10106 = vst [vmem:[#allocation27_spill] sm:$0xff] %v7921_v19 }
 0x22e   : > { %10107 = vst [vmem:[#allocation28_spill] sm:$0xff] %v7923_v37  ;;  %v7925_v44 = vpop.f32.mrf.mxu0  ;;  %v7927_v26 = vpop.f32.mrf.mxu1 }
 0x22f   : > { %10108 = vst [vmem:[#allocation29_spill] sm:$0xff] %v7925_v44  ;;  %10109 = vst [vmem:[#allocation30_spill] sm:$0xff] %v7927_v26 }
 0x230   : > { %v7929_v38 = vpop.f32.mrf.mxu0 }
 0x231   : > { %10110 = vst [vmem:[#allocation31_spill] sm:$0xff] %v7929_v38  ;;  %v5785_v57 = vpop.f32.mrf.mxu1 }
 0x232   : > { %v7931_v56 = vpop.f32.mrf.mxu0 }
 0x233   : > { %10111 = vst [vmem:[#allocation32_spill] sm:$0xff] %v7931_v56  ;;  %v5786_v36 = vpop.f32.mrf.mxu1 }
 0x234   : > { %v7933_v7 = vadd.f32 %v5786_v36, %v5785_v57  ;;  %v7956_v57 = vld [vmem:[%s10031_s4] ss:$0 sm:$0xff] }
 0x235   : > { %v7935_v13 = vpop.f32.mrf.mxu0  ;;  %v7937_v4 = vpop.f32.mrf.mxu1 }
 0x236   : > { %10112 = vst [vmem:[#allocation33_spill] sm:$0xff] %v7933_v7  ;;  %10113 = vst [vmem:[#allocation34_spill] sm:$0xff] %v7935_v13  ;;  %v5833_v7 = vadd.f32 %v7758_v48, %v7750_v43  ;;  %v5839_v48 = vadd.f32 %v7781_v35, %v7775_v16  ;;  %v5748_v16 = vadd.f32 %v7841_v63, %v7837_v53 }
 0x237   : > { %v7939_v22 = vpop.f32.mrf.mxu0  ;;  %v7941_v19 = vpop.f32.mrf.mxu1  ;;  %v5754_v35 = vadd.f32 %v7857_v30, %v7853_v54  ;;  %v2084_v54 = vadd.f32 %v7832_v27, %v7956_v57 }
 0x238   : > { %10114 = vst [vmem:[#allocation35_spill] sm:$0xff] %v7939_v22  ;;  %v5724_v22 = vadd.f32 %v7763_v15, %v7754_v0  ;;  %v5836_v15 = vadd.f32 %v7767_v20, %v7765_v33  ;;  %v5842_v33 = vadd.f32 %v7790_v24, %v7788_v18  ;;  %v5848_v18 = vadd.f32 %v7810_v59, %v7805_v55 }
 0x239   : > { %v7943_v21 = vpop.f32.mrf.mxu0  ;;  %v5760_v24 = vadd.f32 %v7869_v39, %v7865_v11  ;;  %v5854_v59 = vadd.f32 %v7830_v23, %v7828_v25  ;;  %v5860_v25 = vadd.f32 %v7847_v28, %v7845_v3  ;;  %v2100_v23 = vadd.f32 %v7863_v47, %v7956_v57 }
 0x23a   : > { %10115 = vst [vmem:[#allocation36_spill] sm:$0xff] %v7943_v21  ;;  %v2055_v0 = vadd.f32 %v5724_v22, %v7956_v57  ;;  %v5772_v3 = vadd.f32 %v7899_v8, %v7893_v52  ;;  %v5869_v47 = vadd.f32 %v7871_v40, %v7867_v34  ;;  %v10124_v34 = vld [vmem:[#allocation9_spill] sm:$0xff] }
 0x23b   : > { %v7945_v44 = vpop.f32.mrf.mxu0  ;;  %v5791_v26 = vpop.f32.mrf.mxu1  ;;  %v2103_v27 = vadd.f32 %v5760_v24, %v7956_v57  ;;  %v2108_v40 = vadd.f32 %v10124_v34, %v7956_v57  ;;  %v10128_v24 = vld [vmem:[#allocation13_spill] sm:$0xff]  ;;  %v10138_v34 = vld [vmem:[#allocation20_spill] sm:$0xff] }
 0x23c   : > { %10116 = vst [vmem:[#allocation37_spill] sm:$0xff] %v7945_v44 }
 0x23d   : > { %v5792_v38 = vpop.f32.mrf.mxu1 }
 0x23e   : > { %v7947_v37 = vadd.f32 %v5792_v38, %v5791_v26  ;;  %v5730_v38 = vadd.f32 %v7786_v9, %v7779_v58  ;;  %v5736_v26 = vadd.f32 %v7801_v51, %v7794_v50  ;;  %v2060_v58 = vadd.f32 %v7777_v41, %v7956_v57 }
 0x23f   : > { %v7951_v36 = vpop.f32.mrf.mxu1  ;;  %v5742_v41 = vadd.f32 %v7823_v17, %v7819_v31 }
 0x240   : > { %10117 = vst [vmem:[#allocation38_spill] sm:$0xff] %v7947_v37  ;;  %v7949_v56 = vpop.f32.mrf.mxu0  ;;  %v2052_v37 = vadd.f32 %v7752_v6, %v7956_v57  ;;  %v2063_v51 = vadd.f32 %v5730_v38, %v7956_v57  ;;  %v2076_v6 = vadd.f32 %v7814_v45, %v7956_v57  ;;  %v2071_v20 = vadd.f32 %v5736_v26, %v7956_v57 }
 0x241   : > { %10118 = vst [vmem:[#allocation39_spill] sm:$0xff] %v7949_v56  ;;  %v7962_v21 = vpop.f32.mrf.mxu1  ;;  %v5851_v45 = vadd.f32 %v7821_v2, %v7812_v62  ;;  %v8021_v2 = vadd.f32 %v5836_v15, %v2055_v0  ;;  %v2079_v55 = vadd.f32 %v5742_v41, %v7956_v57  ;;  %v5766_v26 = vadd.f32 %v7885_v60, %v7881_v1  ;;  %v10120_v15 = vld [vmem:[#allocation7_spill] sm:$0xff]  ;;  %v10122_v60 = vld [vmem:[#allocation21_spill] sm:$0xff] }
 0x242   : > { %v7960_v13 = vpop.f32.mrf.mxu0  ;;  %v8019_v62 = vadd.f32 %v5842_v33, %v2063_v51  ;;  %v8034_v39 = vadd.f32 %v5848_v18, %v2071_v20  ;;  %v8082_v41 = vadd.f32 %v5869_v47, %v2100_v23  ;;  %v10127_v18 = vld [vmem:[#allocation12_spill] sm:$0xff]  ;;  %v10135_v47 = vld [vmem:[#allocation17_spill] sm:$0xff] }
 0x243   : > { %v5797_v44 = vpop.f32.mrf.mxu1  ;;  %v8023_v53 = vadd.f32 %v5851_v45, %v2076_v6  ;;  %v10125_v45 = vld [vmem:[#allocation10_spill] sm:$0xff] }
 0x244   : > { %v7968_v56 = vpop.f32.mrf.mxu0 }
 0x245   : > { %10119 = vst [vmem:[#allocation40_spill] sm:$0xff] %v7968_v56  ;;  %v5798_v50 = vpop.f32.mrf.mxu1  ;;  %v2068_v56 = vadd.f32 %v7792_v49, %v7956_v57  ;;  %v5845_v49 = vadd.f32 %v7803_v42, %v7799_v46  ;;  %v8015_v46 = vadd.f32 %v5839_v48, %v2060_v58  ;;  %v8017_v42 = vadd.f32 %v5833_v7, %v2052_v37  ;;  %v10121_v58 = vld [vmem:[#allocation8_spill] sm:$0xff] }
 0x246   : > { %v7979_v9 = vpop.f32.mrf.mxu0  ;;  %v7986_v43 = vadd.f32 %v5798_v50, %v5797_v44  ;;  %v5857_v7 = vadd.f32 %v7843_v14, %v7839_v32  ;;  %v2087_v37 = vadd.f32 %v5748_v16, %v7956_v57  ;;  %v2095_v44 = vadd.f32 %v5754_v35, %v7956_v57  ;;  %v10123_v50 = vld [vmem:[#allocation23_spill] sm:$0xff] }
 0x247   : > { %v7997_v38 = vpop.f32.mrf.mxu1  ;;  %v8025_v63 = vadd.f32 %v5845_v49, %v2068_v56  ;;  %v2092_v56 = vadd.f32 %v7849_v61, %v7956_v57  ;;  %v5863_v14 = vadd.f32 %v7855_v10, %v7851_v12  ;;  %v5866_v61 = vadd.f32 %v7861_v29, %v7859_v5  ;;  %v10126_v16 = vld [vmem:[#allocation11_spill] sm:$0xff] }
 0x248   : > { %v7995_v22 = vpop.f32.mrf.mxu0  ;;  %v5872_v1 = vadd.f32 %v10121_v58, %v10120_v15  ;;  %v5778_v51 = vadd.f32 %v10123_v50, %v10122_v60  ;;  %v8067_v10 = vadd.f32 %v5854_v59, %v2079_v55  ;;  %v8071_v29 = vadd.f32 %v5857_v7, %v2084_v54  ;;  %v10129_v59 = vld [vmem:[#allocation14_spill] sm:$0xff]  ;;  %v10130_v7 = vld [vmem:[#allocation15_spill] sm:$0xff] }
 0x249   : > { %v8013_v17 = vpop.f32.mrf.mxu1  ;;  %v8069_v5 = vadd.f32 %v5863_v14, %v2092_v56  ;;  %v8073_v8 = vadd.f32 %v5866_v61, %v2095_v44  ;;  %v8075_v52 = vadd.f32 %v5860_v25, %v2087_v37  ;;  %v2111_v48 = vadd.f32 %v5766_v26, %v7956_v57  ;;  %v10131_v37 = vld [vmem:[#allocation16_spill] sm:$0xff]  ;;  %v10132_v44 = vld [vmem:[#allocation19_spill] sm:$0xff]  ;;  %v10134_v26 = vld [vmem:[#allocation30_spill] sm:$0xff] }
 0x24a   : > { %v8011_v31 = vpop.f32.mrf.mxu0  ;;  %v8084_v49 = vadd.f32 %v5872_v1, %v2103_v27  ;;  %v5875_v35 = vadd.f32 %v10126_v16, %v10125_v45  ;;  %v5878_v55 = vadd.f32 %v10128_v24, %v10127_v18  ;;  %v2116_v54 = vadd.f32 %v10129_v59, %v7956_v57  ;;  %v10133_v27 = vld [vmem:[#allocation28_spill] sm:$0xff]  ;;  %v10136_v15 = vld [vmem:[#allocation18_spill] sm:$0xff]  ;;  %v10141_v18 = vld [vmem:[#allocation25_spill] sm:$0xff] }
 0x24b   : > { %v5803_v11 = vpop.f32.mrf.mxu1  ;;  %v5881_v56 = vadd.f32 %v10131_v37, %v10130_v7  ;;  %v2124_v25 = vadd.f32 %v10132_v44, %v7956_v57  ;;  %v2127_v23 = vadd.f32 %v5778_v51, %v7956_v57  ;;  %v5884_v58 = vadd.f32 %v10136_v15, %v10135_v47  ;;  %v10137_v1 = vld [vmem:[#allocation26_spill] sm:$0xff]  ;;  %v10140_v16 = vld [vmem:[#allocation24_spill] sm:$0xff] }
 0x24c   : > { %v8032_v30 = vpop.f32.mrf.mxu0  ;;  %v2132_v60 = vadd.f32 %v10137_v1, %v7956_v57  ;;  %v5796_v50 = vadd.f32 %v7962_v21, %v7951_v36  ;;  %v10139_v45 = vld [vmem:[#allocation22_spill] sm:$0xff]  ;;  %v5890_v24 = vadd.f32 %v10141_v18, %v10140_v16  ;;  %v8112_v37 = vadd.f32 %v5875_v35, %v2108_v40  ;;  %v10144_v36 = vld [vmem:[#allocation33_spill] sm:$0xff]  ;;  %v10149_v18 = vld [vmem:[#allocation35_spill] sm:$0xff] }
 0x24d   : > { %v5804_v32 = vpop.f32.mrf.mxu1  ;;  %v5887_v51 = vadd.f32 %v10139_v45, %v10138_v34  ;;  %v8114_v44 = vadd.f32 %v5878_v55, %v2111_v48  ;;  %v2140_v1 = vadd.f32 %v10144_v36, %v7956_v57  ;;  %v10145_v35 = vld [vmem:[#allocation38_spill] sm:$0xff] }
 0x24e   : > { %v8049_v0 = vpop.f32.mrf.mxu0  ;;  %v8057_v28 = vadd.f32 %v5804_v32, %v5803_v11  ;;  %v2119_v11 = vadd.f32 %v5772_v3, %v7956_v57  ;;  %v5784_v32 = vadd.f32 %v10134_v26, %v10133_v27  ;;  %v5790_v3 = vadd.f32 %v7941_v19, %v7937_v4  ;;  %v10142_v27 = vld [vmem:[#allocation27_spill] sm:$0xff]  ;;  %v10143_v26 = vld [vmem:[#allocation29_spill] sm:$0xff]  ;;  %v10148_v16 = vld [vmem:[#allocation34_spill] sm:$0xff] }
 0x24f   : > { %v5806_v12 = vpop.f32.mrf.mxu1  ;;  %v5893_v47 = vadd.f32 %v10143_v26, %v10142_v27  ;;  %v8118_v19 = vadd.f32 %v5881_v56, %v2116_v54  ;;  %v8125_v45 = vadd.f32 %v5887_v51, %v2124_v25  ;;  %v8127_v40 = vadd.f32 %v5890_v24, %v2127_v23  ;;  %v10150_v51 = vld [vmem:[#allocation36_spill] sm:$0xff]  ;;  %v10151_v24 = vld [vmem:[#allocation37_spill] sm:$0xff] }
 0x250   : > { %v8065_v6 = vpop.f32.mrf.mxu0  ;;  %v8120_v4 = vadd.f32 %v5884_v58, %v2119_v11  ;;  %v2135_v21 = vadd.f32 %v5784_v32, %v7956_v57  ;;  %v2143_v48 = vadd.f32 %v5790_v3, %v7956_v57  ;;  %v2148_v55 = vadd.f32 %v10145_v35, %v7956_v57  ;;  %v10147_v32 = vld [vmem:[#allocation32_spill] sm:$0xff] }
 0x251   : > { %v5807_v20 = vpop.f32.mrf.mxu1  ;;  %v2151_v54 = vadd.f32 %v5796_v50, %v7956_v57  ;;  %v8133_v11 = vadd.f32 %v5893_v47, %v2132_v60  ;;  %v2156_v25 = vadd.f32 %v7986_v43, %v7956_v57  ;;  %v5802_v23 = vadd.f32 %v8013_v17, %v7997_v38  ;;  %v10152_v50 = vld [vmem:[#allocation39_spill] sm:$0xff]  ;;  %v10153_v26 = vld [vmem:[#allocation40_spill] sm:$0xff] }
 0x252   : > { %v8080_v33 = vpop.f32.mrf.mxu0  ;;  %v5902_v27 = vadd.f32 %v10151_v24, %v10150_v51  ;;  %v5905_v60 = vadd.f32 %v7960_v13, %v10152_v50  ;;  %v5908_v47 = vadd.f32 %v7979_v9, %v10153_v26  ;;  %v5808_v36 = vadd.f32 %v5807_v20, %v5806_v12 }
 0x253   : > { %v5809_v61 = vpop.f32.mrf.mxu1  ;;  %v2159_v9 = vadd.f32 %v5802_v23, %v7956_v57 }
 0x254   : > { %v5918_v14 = vpop.f32.mrf.mxu0  ;;  %v8156_v51 = vadd.f32 %v5902_v27, %v2143_v48  ;;  %v8158_v13 = vadd.f32 %v5905_v60, %v2148_v55  ;;  %v8160_v24 = vadd.f32 %v5908_v47, %v2151_v54  ;;  %v5917_v55 = vadd.f32 %v8080_v33, %v8065_v6 }
 0x255   : > { %v5810_v7 = vpop.f32.mrf.mxu1 }
 0x256   : > { %v5919_v59 = vpop.f32.mrf.mxu0  ;;  %v5811_v15 = vadd.f32 %v5810_v7, %v5809_v61  ;;  %v10146_v61 = vld [vmem:[#allocation31_spill] sm:$0xff]  ;;  %v5899_v7 = vadd.f32 %v10149_v18, %v10148_v16 }
 0x257   : > { %v5812_v34 = vpop.f32.mrf.mxu1  ;;  %v5896_v58 = vadd.f32 %v10147_v32, %v10146_v61  ;;  %v5911_v61 = vadd.f32 %v8011_v31, %v7995_v22  ;;  %v5914_v22 = vadd.f32 %v8049_v0, %v8032_v30  ;;  %v2164_v31 = vadd.f32 %v8057_v28, %v7956_v57 }
 0x258   : > { %v8151_v16 = vadd.f32 %v5899_v7, %v2140_v1  ;;  %v5920_v54 = vadd.f32 %v5919_v59, %v5918_v14 }
 0x259   : > { %v5921_v56 = vpop.f32.mrf.mxu0  ;;  %v5813_v3 = vpop.f32.mrf.mxu1  ;;  %v8153_v38 = vadd.f32 %v5896_v58, %v2135_v21  ;;  %v8167_v20 = vadd.f32 %v5911_v61, %v2156_v25  ;;  %v2167_v21 = vadd.f32 %v5808_v36, %v7956_v57  ;;  %v8183_v50 = vadd.f32 %v5917_v55, %v2164_v31  ;;  %v10157_v61 = vld [vmem:[#allocation5_spill] sm:$0xff] }
 0x25a   : > { %v5814_v32 = vadd.f32 %v5813_v3, %v5812_v34 }
 0x25b   : > { %v5922_v35 = vpop.f32.mrf.mxu0  ;;  %v6289_v43 = vpop.f32.mrf.mxu1  ;;  %10154 = vst [vmem:[#allocation7_spill] sm:$0xff] %v8183_v50 }
 0x25c   : > { %v2382_v18 = vadd.f32 %v6289_v43, %v8015_v46  ;;  %v2172_v46 = vadd.f32 %v5811_v15, %v7956_v57  ;;  %v5923_v30 = vadd.f32 %v5922_v35, %v5921_v56  ;;  %v2175_v0 = vadd.f32 %v5814_v32, %v7956_v57 }
 0x25d   : > { %v5924_v17 = vpop.f32.mrf.mxu0  ;;  %v2373_v12 = vpop.f32.mrf.mxu1  ;;  %v8187_v57 = vadd.f32 %v5920_v54, %v2167_v21 }
 0x25e   : > { %v8171_v34 = vmax.f32 %v2382_v18, 0.0  ;;  %v2374_v48 = vadd.f32 %v2373_v12, %v8017_v42  ;;  %v8181_v42 = vadd.f32 %v5914_v22, %v2159_v9  ;;  %v8185_v14 = vadd.f32 %v5923_v30, %v2172_v46  ;;  %v10158_v46 = vld [vmem:[#allocation6_spill] sm:$0xff] }
 0x25f   : > { %v5925_v1 = vpop.f32.mrf.mxu0  ;;  %v6290_v28 = vpop.f32.mrf.mxu1  ;;  %10155 = vst [vmem:[#allocation8_spill] sm:$0xff] %v8187_v57 }
 0x260   : > { %v2616_v58 = vrot.slane %v8171_v34, 2  ;;  %v2665_v7 = vrot.slane %v8171_v34, 4  ;;  %v10045_v25 = vrot.slane %v8171_v34, 6  ;;  %v2500_v15 = vmax.f32 %v2374_v48, 0.0 }
 0x261   : > { %v5926_v23 = vadd.f32 %v5925_v1, %v5924_v17  ;;  %v2385_v3 = vadd.f32 %v6290_v28, %v8019_v62  ;;  %v2376_v27 = vpop.f32.mrf.mxu1 }
 0x262   : > { %v2613_v6 = vrot.slane %v2500_v15, 2  ;;  %v2661_v33 = vrot.slane %v2500_v15, 4  ;;  %v2725_v59 = vrot.slane %v2500_v15, 6  ;;  %v2377_v60 = vadd.f32 %v2376_v27, %v8021_v2 }
 0x263   : > { %v8189_v56 = vmax.f32 %v2385_v3, 0.0  ;;  %v6293_v26 = vpop.f32.mrf.mxu1  ;;  %v8192_v47 = vadd.f32 %v5926_v23, %v2175_v0  ;;  %v8194_v62 = vrot.slane %v2616_v58, 6  ;;  %v8196_v36 = vrot.slane %v2665_v7, 6 }
 0x264   : > { %v2398_v35 = vadd.f32 %v6293_v26, %v8023_v53  ;;  %v8203_v32 = vsel %vm1145_vm1, %v10157_v61, %v10045_v25  ;;  %v2727_v43 = vrot.slane %v2613_v6, 6  ;;  %v8205_v17 = vrot.slane %v2661_v33, 6 }
 0x265   : > { %10156 = vst [vmem:[#allocation21_spill] sm:$0xff] %v8192_v47  ;;  %v2617_v2 = vrot.slane %v8189_v56, 2  ;;  %v2666_v18 = vrot.slane %v8189_v56, 4  ;;  %v2389_v9 = vpop.f32.mrf.mxu1  ;;  %v8211_v22 = vsel %vm1145_vm1, %v10157_v61, %v2725_v59  ;;  %v2501_v31 = vmax.f32 %v2377_v60, 0.0 }
 0x266   : > { %v8213_v53 = vmax.f32 %v2398_v35, 0.0  ;;  %v2390_v12 = vadd.f32 %v2389_v9, %v8025_v63 }
 0x267   : > { %v8217_v21 = vsel %vm1079_vm4, %v2665_v7, %v2666_v18  ;;  %v8221_v1 = vsel %vm1079_vm4, %v2666_v18, %v10158_v46  ;;  %v6294_v55 = vpop.f32.mrf.mxu1  ;;  %v8225_v54 = vsel %vm964_vm3, %v2616_v58, %v2617_v2  ;;  %v8228_v0 = vrot.slane %v2617_v2, 6 }
 0x268   : > { %v2614_v63 = vrot.slane %v2501_v31, 2  ;;  %v2662_v15 = vrot.slane %v2501_v31, 4  ;;  %v2733_v7 = vrot.slane %v2501_v31, 6  ;;  %v10046_v23 = vrot.slane %v8213_v53, 2 }
 0x269   : > { %v10047_v3 = vrot.slane %v8213_v53, 4  ;;  %v2392_v27 = vpop.f32.mrf.mxu1  ;;  %v8234_v26 = vmax.f32 %v2390_v12, 0.0  ;;  %v2401_v58 = vadd.f32 %v6294_v55, %v8067_v10 }
 0x26a   : > { %v2393_v35 = vadd.f32 %v2392_v27, %v8034_v39  ;;  %v2734_v2 = vsel %vm1145_vm1, %v2725_v59, %v2733_v7  ;;  %v2735_v18 = vrot.slane %v2614_v63, 6  ;;  %v8241_v9 = vrot.slane %v10046_v23, 6 }
 0x26b   : > { %v6297_v31 = vpop.f32.mrf.mxu1  ;;  %v2615_v25 = vsel %vm964_vm3, %v2613_v6, %v2614_v63  ;;  %v8246_v48 = vrot.slane %v10047_v3, 6  ;;  %v10048_v12 = vrot.slane %v8234_v26, 2  ;;  %v2669_v10 = vrot.slane %v8234_v26, 4 }
 0x26c   : > { %v8250_v55 = vmax.f32 %v2401_v58, 0.0  ;;  %v8252_v39 = vmax.f32 %v2393_v35, 0.0  ;;  %v2414_v59 = vadd.f32 %v6297_v31, %v8069_v5  ;;  %v2728_v27 = vrot.slane %v2615_v25, 6 }
 0x26d   : > { %v2405_v7 = vpop.f32.mrf.mxu1  ;;  %v2663_v60 = vsel %vm1079_vm4, %v2661_v33, %v2662_v15  ;;  %v8259_v63 = vrot.slane %v10048_v12, 6  ;;  %v8261_v23 = vrot.slane %v2669_v10, 6  ;;  %v2664_v35 = vsel %vm1079_vm4, %v2662_v15, %v10158_v46 }
 0x26e   : > { %v10049_v3 = vrot.slane %v8250_v55, 2  ;;  %v2670_v25 = vrot.slane %v8252_v39, 4  ;;  %v8269_v6 = vmax.f32 %v2414_v59, 0.0  ;;  %v2406_v12 = vadd.f32 %v2405_v7, %v8071_v29 }
 0x26f   : > { %v6298_v31 = vpop.f32.mrf.mxu1  ;;  %v2729_v28 = vsel %vm1145_vm1, %v2727_v43, %v2728_v27  ;;  %v2736_v58 = vsel %vm1145_vm1, %v2728_v27, %v2735_v18  ;;  %v2731_v5 = vrot.slane %v2663_v60, 6  ;;  %v10159_v47 = vrot.slane %v8252_v39, 2 }
 0x270   : > { %v8275_v30 = vrot.slane %v10049_v3, 6  ;;  %v10050_v59 = vrot.slane %v8269_v6, 2  ;;  %v8286_v43 = vmax.f32 %v2406_v12, 0.0  ;;  %v3046_v7 = vpack.c.bf16 %v2736_v58, %v2729_v28 }
 0x271   : > { %v2408_v57 = vpop.f32.mrf.mxu1  ;;  %v8282_v33 = vrot.slane %v10159_v47, 6  ;;  %v2732_v3 = vsel %vm1145_vm1, %v8205_v17, %v2731_v5  ;;  %v2737_v18 = vrot.slane %v2664_v35, 6  ;;  %v2417_v27 = vadd.f32 %v6298_v31, %v8073_v8 }
 0x272   : > { %v8294_v47 = vrot.slane %v10050_v59, 6  ;;  %v10051_v50 = vrot.slane %v8286_v43, 2  ;;  %v10160_v12 = vrot.slane %v8269_v6, 4  ;;  %3275 = vmatprep.mubr.bf16.mxu0 %v3046_v7  ;;  %v3045_v8 = vpack.c.bf16 %v2734_v2, %v8211_v22 }
 0x273   : > { %v6301_v15 = vpop.f32.mrf.mxu1  ;;  %v2738_v17 = vsel %vm1145_vm1, %v2731_v5, %v2737_v18  ;;  %v8303_v58 = vmax.f32 %v2417_v27, 0.0  ;;  %v10161_v29 = vrot.slane %v8217_v21, 6  ;;  %v10162_v7 = vrot.slane %v8286_v43, 4 }
 0x274   : > { %v8300_v28 = vrot.slane %v10160_v12, 6  ;;  %v8309_v60 = vrot.slane %v10051_v50, 6  ;;  %v3047_v59 = vpack.c.bf16 %v2738_v17, %v2732_v3  ;;  %3276 = vmatmul.mubr.bf16.vlgmr.msra.gmra.mxu0 %v3045_v8  ;;  %v10163_v2 = vrot.slane %v8221_v1, 6 }
 0x275   : > { %v2421_v35 = vpop.f32.mrf.mxu1  ;;  %v2746_v12 = vsel %vm1145_vm1, %v8196_v36, %v10161_v29  ;;  %v8317_v5 = vrot.slane %v10162_v7, 6  ;;  %v10053_v18 = vrot.slane %v8303_v58, 2  ;;  %v10164_v27 = vmov %v10161_v29 }
 0x276   : > { %v2752_v3 = vsel %vm1145_vm1, %v10164_v27, %v10163_v2  ;;  %6335 = vmatprep.mubr.bf16.mxu1 %v3047_v59  ;;  %v2742_v36 = vrot.slane %v8225_v54, 6  ;;  %v2409_v29 = vadd.f32 %v2408_v57, %v8075_v52  ;;  %v2430_v7 = vadd.f32 %v6301_v15, %v8112_v37 }
 0x277   : > { %v6302_v17 = vpop.f32.mrf.mxu1  ;;  %v3050_v31 = vpack.c.bf16 %v2752_v3, %v2746_v12  ;;  %v2422_v22 = vadd.f32 %v2421_v35, %v8082_v41  ;;  %v2671_v8 = vsel %vm1079_vm4, %v2669_v10, %v2670_v25  ;;  %v2672_v21 = vsel %vm1079_vm4, %v2670_v25, %v10158_v46 }
 0x278   : > { %v2743_v59 = vsel %vm1145_vm1, %v8194_v62, %v2742_v36  ;;  %v2750_v54 = vsel %vm1145_vm1, %v2742_v36, %v8228_v0  ;;  %v8338_v52 = vmax.f32 %v2409_v29, 0.0  ;;  %v8340_v37 = vmax.f32 %v2430_v7, 0.0 }
 0x279   : > { %v2424_v1 = vpop.f32.mrf.mxu1  ;;  %6336 = vmatmul.mubr.bf16.vlgmr.msra.gmra.mxu1 %v3050_v31  ;;  %v3049_v57 = vpack.c.bf16 %v2750_v54, %v2743_v59  ;;  %v8342_v15 = vmax.f32 %v2422_v22, 0.0  ;;  %v2759_v41 = vrot.slane %v2671_v8, 6  ;;  %v2765_v10 = vrot.slane %v2672_v21, 6 }
 0x27a   : > { %v8346_v25 = vrot.slane %v10053_v18, 6  ;;  %v10054_v31 = vrot.slane %v8338_v52, 2  ;;  %v2678_v62 = vrot.slane %v8338_v52, 4  ;;  %v10052_v0 = vrot.slane %v8340_v37, 2 }
 0x27b   : > { %v6305_v35 = vpop.f32.mrf.mxu1  ;;  %3283 = vmatprep.mubr.bf16.mxu0 %v3049_v57  ;;  %v10056_v2 = vrot.slane %v8340_v37, 4  ;;  %v10055_v27 = vrot.slane %v8342_v15, 2  ;;  %v10059_v7 = vrot.slane %v8342_v15, 4  ;;  %v2760_v8 = vsel %vm1145_vm1, %v8261_v23, %v2759_v41 }
 0x27c   : > { %v8357_v36 = vrot.slane %v10054_v31, 6  ;;  %v8361_v29 = vrot.slane %v10052_v0, 6  ;;  %v2766_v57 = vsel %vm1145_vm1, %v2759_v41, %v2765_v10  ;;  %v2433_v50 = vadd.f32 %v6302_v17, %v8114_v44 }
 0x27d   : > { %v2437_v3 = vpop.f32.mrf.mxu1  ;;  %v8368_v21 = vrot.slane %v10056_v2, 6  ;;  %v8373_v54 = vrot.slane %v10055_v27, 6  ;;  %v3053_v0 = vpack.c.bf16 %v2766_v57, %v2760_v8  ;;  %v10165_v18 = vrot.slane %v8189_v56, 6 }
 0x27e   : > { %v10166_v23 = vrot.slane %v8171_v34, 6  ;;  %v10167_v31 = vrot.slane %v8250_v55, 4  ;;  %v10168_v59 = vrot.slane %v8213_v53, 4  ;;  %v10170_v56 = vrot.slane %v8252_v39, 2 }
 0x27f   : > { %v8376_v22 = vpop.f32.mrf.mxu1  ;;  %v10171_v34 = vrot.slane %v8234_v26, 2  ;;  %6339 = vmatprep.mubr.bf16.mxu1 %v3053_v0  ;;  %v8401_v8 = vmax.f32 %v2433_v50, 0.0  ;;  %v2438_v57 = vadd.f32 %v2437_v3, %v8118_v19  ;;  %v8415_v50 = vrot.slane %v10059_v7, 6  ;;  %v6545_v3 = vld [vmem:[%s10034_s7 + $0x78] sm:$0xff]  }
 0x280   : > { %v2748_v12 = vsel %vm1145_vm1, %v10166_v23, %v10165_v18  ;;  %v2675_v27 = vsel %vm1079_vm4, %v10168_v59, %v10167_v31  ;;  %v10169_v41 = vmov %v10167_v31  ;;  %v10172_v23 = vrot.slane %v8286_v43, 4  ;;  %6087 = vmatprep.subr.bf16.mxu1 %v6545_v3 }
 0x281   : > { %v3048_v2 = vpack.c.bf16 %v2748_v12, %v8203_v32  ;;  %v2676_v10 = vsel %vm1079_vm4, %v10169_v41, %v10158_v46  ;;  %v2773_v44 = vrot.slane %v2675_v27, 6  ;;  %v2621_v18 = vsel %vm964_vm3, %v10171_v34, %v10170_v56  ;;  %v8399_v17 = vpop.f32.mrf.mxu1 }
 0x282   : > { %v2779_v31 = vrot.slane %v2676_v10, 6  ;;  %v2756_v59 = vrot.slane %v2621_v18, 6  ;;  %v2425_v32 = vadd.f32 %v2424_v1, %v8084_v49  ;;  %v2446_v27 = vadd.f32 %v6305_v35, %v8125_v45  ;;  %v6546_v10 = vld [vmem:[%s10034_s7 + $0x38] sm:$0xff]  }
 0x283   : > { %3284 = vmatmul.mubr.bf16.gmra.mxu0 %v3048_v2  ;;  %v2774_v12 = vsel %vm1145_vm1, %v8246_v48, %v2773_v44  ;;  %v2679_v41 = vsel %vm1079_vm4, %v10172_v23, %v2678_v62  ;;  %v8411_v56 = vpop.f32.mrf.mxu1  ;;  %v10057_v49 = vrot.slane %v8401_v8, 2  ;;  %v8440_v18 = vmax.f32 %v2438_v57, 0.0  ;;  %6088 = vmatpush3.bf16.msra.mxu1 %v6546_v10  ;;  %v6550_v10 = vld [vmem:[%s10034_s7 + $0x68] sm:$0xff]  }
 0x284   : > { %v2780_v48 = vsel %vm1145_vm1, %v2773_v44, %v2779_v31  ;;  %v2757_v19 = vsel %vm1145_vm1, %v8259_v63, %v2756_v59  ;;  %v2764_v45 = vsel %vm1145_vm1, %v2756_v59, %v8282_v33  ;;  %v8424_v35 = vmax.f32 %v2425_v32, 0.0  ;;  %v6547_v44 = vld [vmem:[%s10034_s7 + $0xb8] sm:$0xff]   ;;  %v6548_v31 = vld [vmem:[%s10034_s7 + $0x70] sm:$0xff]  }
 0x285   : > { %v3056_v0 = vpack.c.bf16 %v2780_v48, %v2774_v12  ;;  %v8426_v2 = vpop.f32.mrf.mxu1  ;;  %v3052_v34 = vpack.c.bf16 %v2764_v45, %v2757_v19  ;;  %v8438_v33 = vmax.f32 %v2446_v27, 0.0  ;;  %v8447_v59 = vrot.slane %v10057_v49, 6  ;;  %v6552_v27 = vld [vmem:[%s10034_s7 + $0xb0] sm:$0xff]   ;;  %6367 = vmatprep.subr.bf16.mxu0 %v6547_v44  ;;  %6089 = vmatprep.subr.bf16.mxu1 %v6548_v31 }
 0x286   : > { %v10058_v32 = vrot.slane %v8424_v35, 2  ;;  %v2680_v23 = vsel %vm1079_vm4, %v2678_v62, %v10158_v46  ;;  %v6549_v45 = vld [vmem:[%s10034_s7 + $0x30] sm:$0xff]   ;;  %v2787_v63 = vrot.slane %v2679_v41, 6  ;;  %6368 = vmatpush3.bf16.msra.mxu0 %v6547_v44  ;;  %v2449_v7 = vadd.f32 %v8376_v22, %v8127_v40 }
 0x287   : > { %6340 = vmatmul.mubr.bf16.gmra.mxu1 %v3056_v0  ;;  %3291 = vmatprep.mubr.bf16.mxu0 %v3052_v34  ;;  %v10060_v48 = vrot.slane %v8438_v33, 2  ;;  %v2697_v19 = vrot.slane %v8438_v33, 4  ;;  %v10061_v0 = vrot.slane %v8440_v18, 2  ;;  %v8469_v49 = vpop.f32.mrf.mxu1  ;;  %v2793_v3 = vrot.slane %v2680_v23, 6 }
 0x288   : > { %v8465_v62 = vrot.slane %v10058_v32, 6  ;;  %v2788_v31 = vsel %vm1145_vm1, %v8317_v5, %v2787_v63  ;;  %v10175_v12 = vrot.slane %v8234_v26, 6  ;;  %6369 = vmatprep.subr.bf16.mxu0 %v6552_v27  ;;  %v10176_v44 = vrot.slane %v8252_v39, 6  ;;  %6090 = vmatpush3.bf16.msra.mxu1 %v6549_v45  ;;  %v6551_v39 = vld [vmem:[%s10034_s7 + $0x28] sm:$0xff]   ;;  %v6553_v45 = vld [vmem:[%s10034_s7 + $0x60] sm:$0xff]  }
 0x289   : > { %v8476_v57 = vrot.slane %v10060_v48, 6  ;;  %v8478_v1 = vrot.slane %v2697_v19, 6  ;;  %v8483_v41 = vrot.slane %v10061_v0, 6  ;;  %v2794_v32 = vsel %vm1145_vm1, %v2787_v63, %v2793_v3  ;;  %v6557_v26 = vld [vmem:[%s10034_s7 + $0xa8] sm:$0xff]   ;;  %6091 = vmatprep.subr.bf16.mxu1 %v6550_v10 }
 0x28a   : > { %v2754_v48 = vsel %vm1145_vm1, %v10157_v61, %v10175_v12  ;;  %v10177_v23 = vmov %v10175_v12  ;;  %v10178_v34 = vrot.slane %v8303_v58, 4  ;;  %v10179_v5 = vrot.slane %v8269_v6, 4  ;;  %6370 = vmatpush3.bf16.msra.mxu0 %v6552_v27 }
 0x28b   : > { %10173 = vst [vmem:[#allocation23_spill] sm:$0xff] %v8476_v57  ;;  %10174 = vst [vmem:[#allocation9_spill] sm:$0xff] %v8483_v41  ;;  %v2762_v0 = vsel %vm1145_vm1, %v10177_v23, %v10176_v44  ;;  %v3059_v63 = vpack.c.bf16 %v2794_v32, %v2788_v31  ;;  %v8514_v3 = vmax.f32 %v2449_v7, 0.0  ;;  %v10182_v57 = vrot.slane %v8213_v53, 2  ;;  %6371 = vmatprep.subr.bf16.mxu0 %v6557_v26 }
 0x28c   : > { %v2683_v40 = vsel %vm1079_vm4, %v10179_v5, %v10178_v34  ;;  %v10180_v22 = vmov %v10178_v34  ;;  %v3051_v44 = vpack.c.bf16 %v2762_v0, %v2754_v48  ;;  %v8516_v34 = vpop.f32.mrf.mxu1  ;;  %v2441_v7 = vadd.f32 %v8399_v17, %v8120_v4  ;;  %6092 = vmatpush3.bf16.msra.mxu1 %v6551_v39  ;;  %v6555_v39 = vld [vmem:[%s10034_s7 + $0x58] sm:$0xff]  }
 0x28d   : > { %v2684_v12 = vsel %vm1079_vm4, %v10180_v22, %v10158_v46  ;;  %v2801_v23 = vrot.slane %v2683_v40, 6  ;;  %v10181_v22 = vrot.slane %v8250_v55, 2  ;;  %v2462_v32 = vadd.f32 %v8411_v56, %v8151_v16  ;;  %6343 = vmatprep.mubr.bf16.mxu1 %v3059_v63  ;;  %v6554_v56 = vld [vmem:[%s10034_s7 + $0x20] sm:$0xff]   ;;  %6093 = vmatprep.subr.bf16.mxu1 %v6553_v45 }
 0x28e   : > { %v2807_v5 = vrot.slane %v2684_v12, 6  ;;  %v10183_v48 = vrot.slane %v8440_v18, 4  ;;  %v10062_v10 = vrot.slane %v8514_v3, 2  ;;  %v2698_v31 = vrot.slane %v8514_v3, 4  ;;  %3292 = vmatmul.mubr.bf16.gmra.mxu0 %v3051_v44  ;;  %v8554_v63 = vpop.f32.mrf.mxu1 }
 0x28f   : > { %v2624_v41 = vsel %vm964_vm3, %v10182_v57, %v10181_v22  ;;  %v2802_v57 = vsel %vm1145_vm1, %v8300_v28, %v2801_v23  ;;  %v8539_v17 = vmax.f32 %v2441_v7, 0.0  ;;  %v8541_v16 = vmax.f32 %v2462_v32, 0.0  ;;  %6372 = vmatpush3.bf16.msra.mxu0 %v6557_v26 }
 0x290   : > { %v8532_v0 = vrot.slane %v10183_v48, 6  ;;  %v2808_v40 = vsel %vm1145_vm1, %v2801_v23, %v2807_v5  ;;  %v2770_v4 = vrot.slane %v2624_v41, 6  ;;  %v8547_v27 = vsel %vm1079_vm4, %v2697_v19, %v2698_v31  ;;  %6094 = vmatpush3.bf16.msra.mxu1 %v6554_v56  ;;  %v6558_v56 = vld [vmem:[%s10034_s7 + $0x50] sm:$0xff]  }
 0x291   : > { %v8551_v12 = vsel %vm1079_vm4, %v2698_v31, %v10158_v46  ;;  %v3062_v41 = vpack.c.bf16 %v2808_v40, %v2802_v57  ;;  %v8562_v19 = vrot.slane %v10062_v10, 6  ;;  %v10063_v7 = vrot.slane %v8539_v17, 2  ;;  %6095 = vmatprep.subr.bf16.mxu1 %v6555_v39 }
 0x292   : > { %v2771_v23 = vsel %vm1145_vm1, %v8241_v9, %v2770_v4  ;;  %v2778_v5 = vsel %vm1145_vm1, %v2770_v4, %v8275_v30  ;;  %v2694_v32 = vrot.slane %v8539_v17, 4  ;;  %v10064_v31 = vrot.slane %v8541_v16, 2  ;;  %v6556_v30 = vld [vmem:[%s10034_s7 + $0x18] sm:$0xff]  }
 0x293   : > { %6344 = vmatmul.mubr.bf16.gmra.mxu1 %v3062_v41  ;;  %v3055_v45 = vpack.c.bf16 %v2778_v5, %v2771_v23  ;;  %v2705_v57 = vrot.slane %v8541_v16, 4  ;;  %v2454_v9 = vadd.f32 %v8426_v2, %v8133_v11  ;;  %v10184_v40 = vrot.slane %v8424_v35, 4  ;;  %v2469_v2 = vpop.f32.mrf.mxu1 }
 0x294   : > { %v10185_v4 = vrot.slane %v8342_v15, 4  ;;  %v2465_v11 = vadd.f32 %v8469_v49, %v8156_v51  ;;  %v10187_v39 = vrot.slane %v8250_v55, 6  ;;  %v10188_v28 = vrot.slane %v8213_v53, 6  ;;  %6096 = vmatpush3.bf16.msra.mxu1 %v6556_v30 }
 0x295   : > { %3299 = vmatprep.mubr.bf16.mxu0 %v3055_v45  ;;  %v10186_v23 = vmov %v10184_v40  ;;  %v8596_v45 = vrot.slane %v10063_v7, 6  ;;  %v8604_v26 = vrot.slane %v2705_v57, 6  ;;  %6097 = vmatprep.subr.bf16.mxu1 %v6558_v56  ;;  %v10190_v56 = vrot.slane %v8401_v8, 4 }
 0x296   : > { %v2687_v41 = vsel %vm1079_vm4, %v10185_v4, %v10184_v40  ;;  %v2688_v5 = vsel %vm1079_vm4, %v10186_v23, %v10158_v46  ;;  %v8600_v40 = vrot.slane %v10064_v31, 6  ;;  %v8602_v4 = vmax.f32 %v2454_v9, 0.0 }
 0x297   : > { %v2815_v23 = vrot.slane %v2687_v41, 6  ;;  %v2821_v51 = vrot.slane %v2688_v5, 6  ;;  %v8606_v49 = vmax.f32 %v2465_v11, 0.0  ;;  %v2776_v10 = vsel %vm1145_vm1, %v10188_v28, %v10187_v39  ;;  %v6314_v39 = vpop.f32.mrf.mxu1 }
 0x298   : > { %v10065_v48 = vrot.slane %v8602_v4, 2  ;;  %v10070_v7 = vrot.slane %v8602_v4, 4  ;;  %v10189_v41 = vmov %v10188_v28  ;;  %v10193_v11 = vrot.slane %v8338_v52, 2 }
 0x299   : > { %v2816_v9 = vsel %vm1145_vm1, %v8415_v50, %v2815_v23  ;;  %v2768_v5 = vsel %vm1145_vm1, %v10157_v61, %v10189_v41  ;;  %v2822_v55 = vsel %vm1145_vm1, %v2815_v23, %v2821_v51  ;;  %v10066_v31 = vrot.slane %v8606_v49, 2 }
 0x29a   : > { %v2706_v28 = vrot.slane %v8606_v49, 4  ;;  %v8627_v22 = vrot.slane %v10065_v48, 6  ;;  %v3065_v50 = vpack.c.bf16 %v2822_v55, %v2816_v9  ;;  %v3054_v44 = vpack.c.bf16 %v2776_v10, %v2768_v5 }
 0x29b   : > { %v8632_v30 = vrot.slane %v10070_v7, 6  ;;  %v10191_v41 = vrot.slane %v8340_v37, 4  ;;  %v8649_v5 = vrot.slane %v10066_v31, 6  ;;  %v10194_v48 = vrot.slane %v8286_v43, 2 }
 0x29c   : > { %v8635_v23 = vsel %vm1079_vm4, %v2705_v57, %v2706_v28  ;;  %v8639_v51 = vsel %vm1079_vm4, %v2706_v28, %v10158_v46  ;;  %6347 = vmatprep.mubr.bf16.mxu1 %v3065_v50  ;;  %3300 = vmatmul.mubr.bf16.gmra.mxu0 %v3054_v44  ;;  %v10192_v57 = vmov %v10190_v56  ;;  %v2472_v44 = vpop.f32.mrf.mxu1  ;;  %v10199_v7 = vrot.slane %v8547_v27, 6 }
 0x29d   : > { %v2691_v9 = vsel %vm1079_vm4, %v10191_v41, %v10190_v56  ;;  %v2692_v55 = vsel %vm1079_vm4, %v10192_v57, %v10158_v46  ;;  %v2627_v50 = vsel %vm964_vm3, %v10194_v48, %v10193_v11  ;;  %v2457_v56 = vadd.f32 %v8516_v34, %v8153_v38 }
 0x29e   : > { %v2829_v28 = vrot.slane %v2691_v9, 6  ;;  %v2835_v53 = vrot.slane %v2692_v55, 6  ;;  %v2478_v41 = vadd.f32 %v8554_v63, %v8167_v20  ;;  %v2784_v10 = vrot.slane %v2627_v50, 6 }
 0x29f   : > { %v2470_v9 = vadd.f32 %v2469_v2, %v8158_v13  ;;  %v10195_v57 = vrot.slane %v8440_v18, 4  ;;  %v8674_v34 = vmax.f32 %v2457_v56, 0.0 }
 0x2a0   : > { %v2830_v31 = vsel %vm1145_vm1, %v8368_v21, %v2829_v28  ;;  %v2836_v38 = vsel %vm1145_vm1, %v2829_v28, %v2835_v53  ;;  %v8676_v20 = vmax.f32 %v2478_v41, 0.0  ;;  %v2785_v21 = vsel %vm1145_vm1, %v8309_v60, %v2784_v10  ;;  %v6317_v28 = vpop.f32.mrf.mxu1 }
 0x2a1   : > { %v2695_v55 = vsel %vm1079_vm4, %v10195_v57, %v2694_v32  ;;  %v3068_v63 = vpack.c.bf16 %v2836_v38, %v2830_v31  ;;  %v2792_v13 = vsel %vm1145_vm1, %v2784_v10, %v8357_v36  ;;  %v8682_v2 = vmax.f32 %v2470_v9, 0.0 }
 0x2a2   : > { %v3058_v11 = vpack.c.bf16 %v2792_v13, %v2785_v21  ;;  %v10068_v50 = vrot.slane %v8674_v34, 2  ;;  %v2696_v53 = vsel %vm1079_vm4, %v2694_v32, %v10158_v46  ;;  %v10067_v60 = vrot.slane %v8676_v20, 2 }
 0x2a3   : > { %6348 = vmatmul.mubr.bf16.gmra.mxu1 %v3068_v63  ;;  %v2713_v36 = vrot.slane %v8676_v20, 4  ;;  %v10069_v10 = vrot.slane %v8682_v2, 2  ;;  %v2843_v32 = vrot.slane %v2695_v55, 6  ;;  %v2849_v13 = vrot.slane %v2696_v53, 6 }
 0x2a4   : > { %3307 = vmatprep.mubr.bf16.mxu0 %v3058_v11  ;;  %v8696_v56 = vrot.slane %v10068_v50, 6  ;;  %v8702_v38 = vrot.slane %v10067_v60, 6  ;;  %v2481_v41 = vadd.f32 %v6314_v39, %v8181_v42  ;;  %v10196_v55 = vrot.slane %v8286_v43, 6  ;;  %v2485_v50 = vpop.f32.mrf.mxu1 }
 0x2a5   : > { %v8704_v63 = vrot.slane %v2713_v36, 6  ;;  %v8709_v11 = vrot.slane %v10069_v10, 6  ;;  %v2844_v31 = vsel %vm1145_vm1, %v8532_v0, %v2843_v32  ;;  %v2850_v48 = vsel %vm1145_vm1, %v2843_v32, %v2849_v13 }
 0x2a6   : > { %v2782_v60 = vsel %vm1145_vm1, %v10157_v61, %v10196_v55  ;;  %v10197_v21 = vrot.slane %v8338_v52, 6  ;;  %v10198_v53 = vmov %v10196_v55  ;;  %v2858_v0 = vsel %vm1145_vm1, %v8478_v1, %v10199_v7 }
 0x2a7   : > { %v10200_v42 = vrot.slane %v8551_v12, 6  ;;  %v10201_v39 = vmov %v10199_v7  ;;  %v3071_v57 = vpack.c.bf16 %v2850_v48, %v2844_v31  ;;  %v8733_v9 = vmax.f32 %v2481_v41, 0.0  ;;  %v10204_v12 = vld [vmem:[#allocation7_spill] sm:$0xff] }
 0x2a8   : > { %v2790_v10 = vsel %vm1145_vm1, %v10198_v53, %v10197_v21  ;;  %v10202_v43 = vrot.slane %v8303_v58, 2  ;;  %v10203_v21 = vrot.slane %v8269_v6, 2  ;;  %v2473_v53 = vadd.f32 %v2472_v44, %v8160_v24 }
 0x2a9   : > { %v2864_v55 = vsel %vm1145_vm1, %v10201_v39, %v10200_v42  ;;  %v3057_v32 = vpack.c.bf16 %v2790_v10, %v2782_v60  ;;  %v2494_v1 = vadd.f32 %v6317_v28, %v8185_v14  ;;  %v2486_v7 = vadd.f32 %v2485_v50, %v10204_v12  ;;  %6351 = vmatprep.mubr.bf16.mxu1 %v3071_v57 }
 0x2aa   : > { %v3074_v52 = vpack.c.bf16 %v2864_v55, %v2858_v0  ;;  %v2630_v13 = vsel %vm964_vm3, %v10203_v21, %v10202_v43  ;;  %v10205_v27 = vrot.slane %v8682_v2, 4  ;;  %v10071_v48 = vrot.slane %v8733_v9, 2 }
 0x2ab   : > { %v2714_v31 = vrot.slane %v8733_v9, 4  ;;  %3308 = vmatmul.mubr.bf16.gmra.mxu0 %v3057_v32  ;;  %v2798_v60 = vrot.slane %v2630_v13, 6  ;;  %v8749_v10 = vmax.f32 %v2473_v53, 0.0  ;;  %v8751_v41 = vmax.f32 %v2494_v1, 0.0  ;;  %v6318_v1 = vpop.f32.mrf.mxu1 }
 0x2ac   : > { %v8745_v42 = vrot.slane %v10205_v27, 6  ;;  %6352 = vmatmul.mubr.bf16.gmra.mxu1 %v3074_v52  ;;  %v8753_v24 = vmax.f32 %v2486_v7, 0.0  ;;  %v10206_v14 = vrot.slane %v8674_v34, 4  ;;  %v10207_v44 = vrot.slane %v8602_v4, 4  ;;  %v10209_v27 = vld [vmem:[#allocation21_spill] sm:$0xff] }
 0x2ad   : > { %v8761_v57 = vsel %vm1079_vm4, %v2713_v36, %v2714_v31  ;;  %v8765_v28 = vsel %vm1079_vm4, %v2714_v31, %v10158_v46  ;;  %v2799_v39 = vsel %vm1145_vm1, %v8294_v47, %v2798_v60  ;;  %v8773_v32 = vrot.slane %v10071_v48, 6 }
 0x2ae   : > { %v2703_v50 = vsel %vm1079_vm4, %v10207_v44, %v10206_v14  ;;  %v2806_v52 = vsel %vm1145_vm1, %v2798_v60, %v8346_v25  ;;  %v10073_v36 = vrot.slane %v8749_v10, 2  ;;  %v2710_v13 = vrot.slane %v8749_v10, 4 }
 0x2af   : > { %v3061_v21 = vpack.c.bf16 %v2806_v52, %v2799_v39  ;;  %v10072_v53 = vrot.slane %v8751_v41, 2  ;;  %v2721_v7 = vrot.slane %v8751_v41, 4  ;;  %v10074_v25 = vrot.slane %v8753_v24, 2  ;;  %v2488_v52 = vpop.f32.mrf.mxu1 }
 0x2b0   : > { %v8784_v12 = vrot.slane %v10073_v36, 6  ;;  %v2717_v60 = vrot.slane %v8753_v24, 4  ;;  %v2704_v44 = vsel %vm1079_vm4, %v10206_v14, %v10158_v46  ;;  %v2871_v0 = vrot.slane %v2703_v50, 6 }
 0x2b1   : > { %3315 = vmatprep.mubr.bf16.mxu0 %v3061_v21  ;;  %v8791_v31 = vrot.slane %v10072_v53, 6  ;;  %v8798_v39 = vrot.slane %v2721_v7, 6  ;;  %v2877_v48 = vrot.slane %v2704_v44, 6  ;;  %v8803_v21 = vrot.slane %v10074_v25, 6 }
 0x2b2   : > { %v2497_v53 = vadd.f32 %v6318_v1, %v10209_v27  ;;  %v10210_v47 = vrot.slane %v8269_v6, 6  ;;  %v10211_v43 = vrot.slane %v8303_v58, 6  ;;  %v2872_v50 = vsel %vm1145_vm1, %v8632_v30, %v2871_v0 }
 0x2b3   : > { %10208 = vst [vmem:[#allocation10_spill] sm:$0xff] %v8791_v31  ;;  %v2878_v44 = vsel %vm1145_vm1, %v2871_v0, %v2877_v48  ;;  %v10213_v1 = vrot.slane %v8635_v23, 6  ;;  %v10214_v58 = vrot.slane %v8639_v51, 6  ;;  %v10217_v30 = vrot.slane %v8342_v15, 2 }
 0x2b4   : > { %v2796_v36 = vsel %vm1145_vm1, %v10157_v61, %v10210_v47  ;;  %v10212_v14 = vmov %v10210_v47  ;;  %v3077_v31 = vpack.c.bf16 %v2878_v44, %v2872_v50  ;;  %v8822_v47 = vmax.f32 %v2497_v53, 0.0 }
 0x2b5   : > { %v2804_v55 = vsel %vm1145_vm1, %v10212_v14, %v10211_v43  ;;  %v2886_v27 = vsel %vm1145_vm1, %v8604_v26, %v10213_v1  ;;  %v10215_v6 = vmov %v10213_v1  ;;  %v10216_v14 = vrot.slane %v8424_v35, 2 }
 0x2b6   : > { %v3060_v25 = vpack.c.bf16 %v2804_v55, %v2796_v36  ;;  %v2892_v43 = vsel %vm1145_vm1, %v10215_v6, %v10214_v58  ;;  %v10218_v36 = vld [vmem:[#allocation8_spill] sm:$0xff]  ;;  %v10219_v53 = vrot.slane %v8682_v2, 4  ;;  %v2926_v51 = vrot.slane %v2717_v60, 6  ;;  %6355 = vmatprep.mubr.bf16.mxu1 %v3077_v31 }
 0x2b7   : > { %v2633_v48 = vsel %vm964_vm3, %v10217_v30, %v10216_v14  ;;  %v3080_v0 = vpack.c.bf16 %v2892_v43, %v2886_v27  ;;  %v2489_v26 = vadd.f32 %v2488_v52, %v10218_v36  ;;  %v2659_v23 = vrot.slane %v8822_v47, 2 }
 0x2b8   : > { %3316 = vmatmul.mubr.bf16.gmra.mxu0 %v3060_v25  ;;  %v2812_v55 = vrot.slane %v2633_v48, 6  ;;  %v2711_v50 = vsel %vm1079_vm4, %v10219_v53, %v2710_v13  ;;  %v2722_v44 = vrot.slane %v8822_v47, 4  ;;  %v2712_v1 = vsel %vm1079_vm4, %v2710_v13, %v10158_v46 }
 0x2b9   : > { %6356 = vmatmul.mubr.bf16.gmra.mxu1 %v3080_v0  ;;  %v8846_v27 = vmax.f32 %v2489_v26, 0.0  ;;  %v2899_v58 = vrot.slane %v2711_v50, 6  ;;  %v2943_v43 = vrot.slane %v8822_v47, 6  ;;  %v10221_v53 = vrot.slane %v8424_v35, 6  ;;  %v6562_v47 = vld [vmem:[%s10034_s7 + $0xa0] sm:$0xff]  }
 0x2ba   : > { %v2813_v25 = vsel %vm1145_vm1, %v8373_v54, %v2812_v55  ;;  %v2820_v52 = vsel %vm1145_vm1, %v2812_v55, %v8465_v62  ;;  %v2723_v6 = vsel %vm1079_vm4, %v2721_v7, %v2722_v44  ;;  %v2724_v31 = vsel %vm1079_vm4, %v2722_v44, %v10158_v46  ;;  %6373 = vmatprep.subr.bf16.mxu0 %v6562_v47 }
 0x2bb   : > { %v3064_v14 = vpack.c.bf16 %v2820_v52, %v2813_v25  ;;  %v2941_v30 = vrot.slane %v2723_v6, 6  ;;  %v2947_v13 = vrot.slane %v2724_v31, 6  ;;  %v2656_v48 = vrot.slane %v8846_v27, 2  ;;  %v6559_v31 = vld [vmem:[%s10034_s7 + $0x10] sm:$0xff]   ;;  %6374 = vmatpush3.bf16.msra.mxu0 %v6562_v47 }
 0x2bc   : > { %v2718_v54 = vrot.slane %v8846_v27, 4  ;;  %v2929_v62 = vrot.slane %v8846_v27, 6  ;;  %v2900_v0 = vsel %vm1145_vm1, %v8745_v42, %v2899_v58  ;;  %v2905_v55 = vrot.slane %v2712_v1, 6  ;;  %6098 = vmatpush3.bf16.msra.mxu1 %v6559_v31 }
 0x2bd   : > { %3323 = vmatprep.mubr.bf16.mxu0 %v3064_v14  ;;  %v10220_v7 = vrot.slane %v8342_v15, 6  ;;  %v8863_v26 = vrot.slane %v2656_v48, 6  ;;  %v10223_v25 = vrot.slane %v8761_v57, 6  ;;  %v10224_v1 = vrot.slane %v8765_v28, 6 }
 0x2be   : > { %v2906_v35 = vsel %vm1145_vm1, %v2899_v58, %v2905_v55  ;;  %v2719_v57 = vsel %vm1079_vm4, %v2717_v60, %v2718_v54  ;;  %v10228_v58 = vrot.slane %v8340_v37, 6 }
 0x2bf   : > { %v2810_v36 = vsel %vm1145_vm1, %v10157_v61, %v10220_v7  ;;  %v10222_v50 = vmov %v10220_v7  ;;  %v2914_v42 = vsel %vm1145_vm1, %v8704_v63, %v10223_v25  ;;  %v10225_v52 = vmov %v10223_v25 }
 0x2c0   : > { %v2818_v44 = vsel %vm1145_vm1, %v10222_v50, %v10221_v53  ;;  %v2920_v6 = vsel %vm1145_vm1, %v10225_v52, %v10224_v1  ;;  %v10226_v7 = vrot.slane %v8401_v8, 2  ;;  %v10227_v53 = vrot.slane %v8340_v37, 2 }
 0x2c1   : > { %v3063_v15 = vpack.c.bf16 %v2818_v44, %v2810_v36  ;;  %v3086_v14 = vpack.c.bf16 %v2920_v6, %v2914_v42  ;;  %v3083_v50 = vpack.c.bf16 %v2906_v35, %v2900_v0  ;;  %v2720_v25 = vsel %vm1079_vm4, %v2718_v54, %v10158_v46 }
 0x2c2   : > { %v2636_v63 = vsel %vm964_vm3, %v10227_v53, %v10226_v7  ;;  %v2927_v1 = vrot.slane %v2719_v57, 6  ;;  %v2933_v52 = vrot.slane %v2720_v25, 6  ;;  %v2824_v55 = vsel %vm1145_vm1, %v10157_v61, %v10228_v58 }
 0x2c3   : > { %v2826_v28 = vrot.slane %v2636_v63, 6  ;;  %3324 = vmatmul.mubr.bf16.gmra.mxu0 %v3063_v15  ;;  %v10229_v36 = vrot.slane %v8401_v8, 6  ;;  %v10230_v44 = vmov %v10228_v58  ;;  %6359 = vmatprep.mubr.bf16.mxu1 %v3083_v50  ;;  %v2942_v42 = vsel %vm1145_vm1, %v8798_v39, %v2941_v30 }
 0x2c4   : > { %6360 = vmatmul.mubr.bf16.gmra.mxu1 %v3086_v14  ;;  %v2928_v31 = vsel %vm1145_vm1, %v2926_v51, %v2927_v1  ;;  %v2934_v8 = vsel %vm1145_vm1, %v2927_v1, %v2933_v52  ;;  %v2948_v37 = vsel %vm1145_vm1, %v2941_v30, %v2947_v13  ;;  %v10231_v7 = vrot.slane %v8539_v17, 2 }
 0x2c5   : > { %v2832_v0 = vsel %vm1145_vm1, %v10230_v44, %v10229_v36  ;;  %v2827_v60 = vsel %vm1145_vm1, %v8361_v29, %v2826_v28  ;;  %v2834_v46 = vsel %vm1145_vm1, %v2826_v28, %v8447_v59  ;;  %v3089_v35 = vpack.c.bf16 %v2934_v8, %v2928_v31 }
 0x2c6   : > { %v3066_v54 = vpack.c.bf16 %v2832_v0, %v2824_v55  ;;  %v3067_v6 = vpack.c.bf16 %v2834_v46, %v2827_v60  ;;  %v3092_v15 = vpack.c.bf16 %v2948_v37, %v2942_v42  ;;  %v10232_v29 = vrot.slane %v8440_v18, 2  ;;  %v10243_v0 = vld [vmem:[#allocation9_spill] sm:$0xff] }
 0x2c7   : > { %v10233_v53 = vrot.slane %v8440_v18, 6  ;;  %v10234_v51 = vrot.slane %v8539_v17, 6  ;;  %v10236_v13 = vrot.slane %v8514_v3, 2  ;;  %v10237_v50 = vrot.slane %v8438_v33, 2  ;;  %6363 = vmatprep.mubr.bf16.mxu1 %v3089_v35 }
 0x2c8   : > { %v2639_v59 = vsel %vm964_vm3, %v10232_v29, %v10231_v7  ;;  %3331 = vmatprep.mubr.bf16.mxu0 %v3067_v6  ;;  %v10238_v57 = vrot.slane %v8438_v33, 6  ;;  %v10239_v17 = vrot.slane %v8514_v3, 6  ;;  %v10241_v55 = vrot.slane %v8674_v34, 2  ;;  %v10244_v6 = vld [vmem:[#allocation23_spill] sm:$0xff] }
 0x2c9   : > { %v2838_v39 = vsel %vm1145_vm1, %v10157_v61, %v10233_v53  ;;  %v2840_v14 = vrot.slane %v2639_v59, 6  ;;  %v10235_v63 = vmov %v10233_v53  ;;  %v2642_v28 = vsel %vm964_vm3, %v10237_v50, %v10236_v13 }
 0x2ca   : > { %v2846_v30 = vsel %vm1145_vm1, %v10235_v63, %v10234_v51  ;;  %v8932_v25 = vsel %vm1145_vm1, %v10157_v61, %v10238_v57  ;;  %v2854_v52 = vrot.slane %v2642_v28, 6  ;;  %v10240_v18 = vmov %v10238_v57 }
 0x2cb   : > { %v3069_v1 = vpack.c.bf16 %v2846_v30, %v2838_v39  ;;  %v8939_v58 = vsel %vm1145_vm1, %v10240_v18, %v10239_v17  ;;  %v10242_v36 = vrot.slane %v8602_v4, 2  ;;  %v2841_v60 = vsel %vm1145_vm1, %v10243_v0, %v2840_v14  ;;  %3332 = vmatmul.mubr.bf16.gmra.mxu0 %v3066_v54 }
 0x2cc   : > { %v2848_v46 = vsel %vm1145_vm1, %v2840_v14, %v8596_v45  ;;  %v3072_v3 = vpack.c.bf16 %v8939_v58, %v8932_v25  ;;  %v2855_v31 = vsel %vm1145_vm1, %v10244_v6, %v2854_v52  ;;  %v2862_v8 = vsel %vm1145_vm1, %v2854_v52, %v8562_v19  ;;  %6364 = vmatmul.mubr.bf16.gmra.mxu1 %v3092_v15  ;;  %v6566_v25 = vld [vmem:[%s10034_s7 + $0x90] sm:$0xff]   ;;  %v6567_v58 = vld [vmem:[%s10034_s7 + $0x88] sm:$0xff]  }
 0x2cd   : > { %v2645_v44 = vsel %vm964_vm3, %v10242_v36, %v10241_v55  ;;  %v3070_v33 = vpack.c.bf16 %v2848_v46, %v2841_v60  ;;  %v10245_v37 = vrot.slane %v8602_v4, 6  ;;  %v3073_v7 = vpack.c.bf16 %v2862_v8, %v2855_v31 }
 0x2ce   : > { %v2868_v42 = vrot.slane %v2645_v44, 6  ;;  %v10246_v59 = vrot.slane %v8674_v34, 6  ;;  %v10248_v54 = vrot.slane %v8606_v49, 2  ;;  %v10249_v51 = vrot.slane %v8541_v16, 2 }
 0x2cf   : > { %v8960_v35 = vsel %vm1145_vm1, %v10157_v61, %v10245_v37  ;;  %v10247_v53 = vmov %v10245_v37  ;;  %3339 = vmatprep.mubr.bf16.mxu0 %v3070_v33  ;;  %v10251_v63 = vrot.slane %v8606_v49, 6  ;;  %v10253_v50 = vrot.slane %v8749_v10, 2  ;;  %v6561_v33 = vld [vmem:[%s10034_s7 + $0x8] sm:$0xff]  }
 0x2d0   : > { %v2869_v45 = vsel %vm1145_vm1, %v8627_v22, %v2868_v42  ;;  %v2876_v29 = vsel %vm1145_vm1, %v2868_v42, %v8696_v56  ;;  %v8971_v19 = vsel %vm1145_vm1, %v10247_v53, %v10246_v59  ;;  %v2648_v22 = vsel %vm964_vm3, %v10249_v51, %v10248_v54 }
 0x2d1   : > { %v3076_v39 = vpack.c.bf16 %v2876_v29, %v2869_v45  ;;  %v3075_v14 = vpack.c.bf16 %v8971_v19, %v8960_v35  ;;  %v10250_v56 = vrot.slane %v8541_v16, 6  ;;  %v2882_v4 = vrot.slane %v2648_v22, 6 }
 0x2d2   : > { %v10254_v28 = vrot.slane %v8682_v2, 2  ;;  %v10255_v52 = vrot.slane %v8682_v2, 6  ;;  %v10256_v16 = vrot.slane %v8749_v10, 6  ;;  %v10258_v36 = vrot.slane %v8733_v9, 2  ;;  %v6560_v2 = vld [vmem:[%s10034_s7 + $0x48] sm:$0xff]  }
 0x2d3   : > { %v8984_v34 = vsel %vm1145_vm1, %v10157_v61, %v10250_v56  ;;  %v10252_v30 = vmov %v10250_v56  ;;  %v10259_v44 = vrot.slane %v8676_v20, 2  ;;  %v2883_v60 = vsel %vm1145_vm1, %v8600_v40, %v2882_v4  ;;  %6099 = vmatprep.subr.bf16.mxu1 %v6560_v2  ;;  %3340 = vmatmul.mubr.bf16.gmra.mxu0 %v3069_v1 }
 0x2d4   : > { %v8991_v13 = vsel %vm1145_vm1, %v10252_v30, %v10251_v63  ;;  %v2651_v57 = vsel %vm964_vm3, %v10254_v28, %v10253_v50  ;;  %v9002_v17 = vsel %vm1145_vm1, %v10157_v61, %v10255_v52  ;;  %v10257_v18 = vmov %v10255_v52  ;;  %6100 = vmatpush3.bf16.msra.mxu1 %v6561_v33 }
 0x2d5   : > { %v3078_v49 = vpack.c.bf16 %v8991_v13, %v8984_v34  ;;  %v2896_v15 = vrot.slane %v2651_v57, 6  ;;  %v9011_v55 = vsel %vm1145_vm1, %v10257_v18, %v10256_v16  ;;  %v2654_v0 = vsel %vm964_vm3, %v10259_v44, %v10258_v36  ;;  %3347 = vmatprep.mubr.bf16.mxu0 %v3073_v7  ;;  %v10269_v13 = vld [vmem:[#allocation10_spill] sm:$0xff]  ;;  %v9111_v57 = vld [vmem:[%s10033_s6] ss:$0 sm:$0xff] }
 0x2d6   : > { %v2890_v46 = vsel %vm1145_vm1, %v2882_v4, %v8649_v5  ;;  %v3081_v10 = vpack.c.bf16 %v9011_v55, %v9002_v17  ;;  %v2910_v42 = vrot.slane %v2654_v0, 6  ;;  %v10260_v5 = vrot.slane %v8676_v20, 6 }
 0x2d7   : > { %v3079_v6 = vpack.c.bf16 %v2890_v46, %v2883_v60  ;;  %v2897_v31 = vsel %vm1145_vm1, %v8709_v11, %v2896_v15  ;;  %v2904_v40 = vsel %vm1145_vm1, %v2896_v15, %v8784_v12  ;;  %v10261_v29 = vrot.slane %v8733_v9, 6 }
 0x2d8   : > { %v2908_v8 = vsel %vm1145_vm1, %v10157_v61, %v10260_v5  ;;  %v3082_v37 = vpack.c.bf16 %v2904_v40, %v2897_v31  ;;  %v2911_v35 = vsel %vm1145_vm1, %v8702_v38, %v2910_v42  ;;  %v2918_v45 = vsel %vm1145_vm1, %v2910_v42, %v8773_v32 }
 0x2d9   : > { %v10262_v59 = vmov %v10260_v5  ;;  %v2945_v12 = vrot.slane %v2659_v23, 6  ;;  %v3085_v53 = vpack.c.bf16 %v2918_v45, %v2911_v35  ;;  %v10263_v54 = vrot.slane %v8753_v24, 2 }
 0x2da   : > { %v2916_v11 = vsel %vm1145_vm1, %v10262_v59, %v10261_v29  ;;  %v10264_v9 = vrot.slane %v8753_v24, 6  ;;  %v10266_v56 = vrot.slane %v8751_v41, 2  ;;  %v10267_v4 = vrot.slane %v8751_v41, 6 }
 0x2db   : > { %v3084_v19 = vpack.c.bf16 %v2916_v11, %v2908_v8  ;;  %v2657_v38 = vsel %vm964_vm3, %v10263_v54, %v2656_v48  ;;  %3348 = vmatmul.mubr.bf16.gmra.mxu0 %v3072_v3  ;;  %v6568_v3 = vld [vmem:[%s10034_s7 + $0x80] sm:$0xff]   ;;  %v10270_v35 = vmov 0.0  }
 0x2dc   : > { %v2924_v32 = vrot.slane %v2657_v38, 6  ;;  %v2922_v20 = vsel %vm1145_vm1, %v10157_v61, %v10264_v9  ;;  %v10265_v51 = vmov %v10264_v9  ;;  %v2660_v48 = vsel %vm964_vm3, %v10266_v56, %v2659_v23  ;;  %3355 = vmatprep.mubr.bf16.mxu0 %v3076_v39 }
 0x2dd   : > { %v2930_v22 = vsel %vm1145_vm1, %v10265_v51, %v2929_v62  ;;  %v2938_v34 = vrot.slane %v2660_v48, 6  ;;  %v2936_v63 = vsel %vm1145_vm1, %v10157_v61, %v10267_v4  ;;  %v10268_v24 = vmov %v10267_v4 }
 0x2de   : > { %v3087_v1 = vpack.c.bf16 %v2930_v22, %v2922_v20  ;;  %v2944_v27 = vsel %vm1145_vm1, %v10268_v24, %v2943_v43  ;;  %v2925_v62 = vsel %vm1145_vm1, %v8803_v21, %v2924_v32  ;;  %v2932_v23 = vsel %vm1145_vm1, %v2924_v32, %v8863_v26  ;;  %v6563_v21 = vld [vmem:[%s10034_s7 + $0x40] sm:$0xff]   ;;  %v6564_v43 = vld [vmem:[%s10034_s7 + $0x98] sm:$0xff]  }
 0x2df   : > { %v3090_v7 = vpack.c.bf16 %v2944_v27, %v2936_v63  ;;  %v3088_v30 = vpack.c.bf16 %v2932_v23, %v2925_v62  ;;  %v2939_v50 = vsel %vm1145_vm1, %v10269_v13, %v2938_v34  ;;  %v2946_v28 = vsel %vm1145_vm1, %v2938_v34, %v2945_v12  ;;  %v6565_v26 = vld [vmem:[%s10034_s7] sm:$0xff]   ;;  %6101 = vmatprep.subr.bf16.mxu1 %v6563_v21 }
 0x2e0   : > { %v3091_v41 = vpack.c.bf16 %v2946_v28, %v2939_v50  ;;  %6375 = vmatprep.subr.bf16.mxu0 %v6564_v43  ;;  %6102 = vmatpush3.bf16.msra.mxu1 %v6565_v26  ;;  %v9116_v45 = vrot.slane %v10270_v35, 5 }
 0x2e1   : > { %6376 = vmatpush3.bf16.msra.mxu0 %v6564_v43 }
 0x2e2   : > { %6377 = vmatprep.subr.bf16.mxu0 %v6566_v25 }
 0x2e3   : > { %3356 = vmatmul.mubr.bf16.gmra.mxu0 %v3075_v14 }
 0x2e4   : > { %3363 = vmatprep.mubr.bf16.mxu0 %v3079_v6 }
 0x2e5   : > { %6378 = vmatpush3.bf16.msra.mxu0 %v6566_v25 }
 0x2e6   : > { %6379 = vmatprep.subr.bf16.mxu0 %v6567_v58 }
 0x2e9   : > { %6380 = vmatpush3.bf16.msra.mxu0 %v6567_v58 }
 0x2ea   : > { %6381 = vmatprep.subr.bf16.mxu0 %v6568_v3 }
 0x2eb   : > { %3364 = vmatmul.mubr.bf16.gmra.mxu0 %v3078_v49 }
 0x2ec   : > { %3371 = vmatprep.mubr.bf16.mxu0 %v3082_v37 }
 0x2ed   : > { %6382 = vmatpush3.bf16.msra.mxu0 %v6568_v3 }
 0x2f3   : > { %3372 = vmatmul.mubr.bf16.gmra.mxu0 %v3081_v10 }
 0x2f4   : > { %3379 = vmatprep.mubr.bf16.mxu0 %v3085_v53 }
 0x2fb   : > { %3380 = vmatmul.mubr.bf16.gmra.mxu0 %v3084_v19 }
 0x2fc   : > { %3387 = vmatprep.mubr.bf16.mxu0 %v3088_v30 }
 0x303   : > { %3388 = vmatmul.mubr.bf16.gmra.mxu0 %v3087_v1 }
 0x304   : > { %3395 = vmatprep.mubr.bf16.mxu0 %v3091_v41 }
 0x30b   : > { %3396 = vmatmul.mubr.bf16.gmra.mxu0 %v3090_v7 }
 0x334   : > { %v5967_v39 = vpop.f32.mrf.mxu0 }
 0x336   : > { %v5968_v14 = vpop.f32.mrf.mxu0 }
 0x337   : > { %v5969_v17 = vadd.f32 %v5968_v14, %v5967_v39 }
 0x338   : > { %v5970_v49 = vpop.f32.mrf.mxu0 }
 0x339   : > { %v6337_v52 = vpop.f32.mrf.mxu1  ;;  %v3278_v15 = vadd.f32 %v5969_v17, %v9111_v57 }
 0x33a   : > { %v5971_v18 = vpop.f32.mrf.mxu0 }
 0x33b   : > { %v3438_v16 = vpop.f32.mrf.mxu1  ;;  %v5972_v44 = vadd.f32 %v5971_v18, %v5970_v49 }
 0x33c   : > { %v3439_v55 = vadd.f32 %v3438_v16, %v3278_v15 }
 0x33d   : > { %v6338_v36 = vpop.f32.mrf.mxu1  ;;  %v3281_v60 = vadd.f32 %v5972_v44, %v9111_v57 }
 0x33e   : > { %v3565_v0 = vmax.f32 %v3439_v55, 0.0 }
 0x33f   : > { %v3441_v46 = vpop.f32.mrf.mxu1 }
 0x340   : > { %v3442_v10 = vadd.f32 %v3441_v46, %v3281_v60  ;;  %v3678_v42 = vrot.slane %v3565_v0, 3  ;;  %v3726_v33 = vrot.slane %v3565_v0, 6  ;;  %v3792_v29 = vrot.slane %v3565_v0, 5 }
 0x342   : > { %v3566_v6 = vmax.f32 %v3442_v10, 0.0  ;;  %v3794_v59 = vrot.slane %v3678_v42, 5  ;;  %v3797_v12 = vrot.slane %v3726_v33, 5  ;;  %v3793_v34 = vsel %vm3790_vm5, %v9116_v45, %v3792_v29 }
 0x343   : > { %v5973_v2 = vpop.f32.mrf.mxu0 }
 0x344   : > { %v3679_v40 = vrot.slane %v3566_v6, 3  ;;  %v3727_v5 = vrot.slane %v3566_v6, 6  ;;  %v3800_v8 = vrot.slane %v3566_v6, 5 }
 0x345   : > { %v5974_v31 = vpop.f32.mrf.mxu0 }
 0x346   : > { %v5975_v37 = vadd.f32 %v5974_v31, %v5973_v2  ;;  %v3802_v53 = vrot.slane %v3679_v40, 5  ;;  %v3680_v54 = vsel %vm1013_vm2, %v3678_v42, %v3679_v40  ;;  %v3801_v38 = vsel %vm3790_vm5, %v3792_v29, %v3800_v8 }
 0x347   : > { %v5976_v11 = vpop.f32.mrf.mxu0  ;;  %v3795_v9 = vrot.slane %v3680_v54, 5  ;;  %v3728_v20 = vsel %vm1145_vm1, %v3726_v33, %v3727_v5  ;;  %v3729_v51 = vsel %vm1145_vm1, %v3727_v5, %v10157_v61  ;;  %v4112_v7 = vpack.c.bf16 %v3801_v38, %v3793_v34  ;;  %v9130_v30 = vpop.f32.mrf.mxu1 }
 0x348   : > { %v3286_v19 = vadd.f32 %v5975_v37, %v9111_v57  ;;  %v3798_v48 = vrot.slane %v3728_v20, 5  ;;  %v3804_v1 = vrot.slane %v3729_v51, 5 }
 0x349   : > { %v5977_v32 = vpop.f32.mrf.mxu0  ;;  %v3796_v4 = vsel %vm3790_vm5, %v3794_v59, %v3795_v9  ;;  %v3803_v63 = vsel %vm3790_vm5, %v3795_v9, %v3802_v53  ;;  %v3454_v25 = vpop.f32.mrf.mxu1 }
 0x34a   : > { %v3447_v22 = vadd.f32 %v6337_v52, %v3286_v19  ;;  %v5978_v56 = vadd.f32 %v5977_v32, %v5976_v11  ;;  %v4113_v62 = vpack.c.bf16 %v3803_v63, %v3796_v4  ;;  %v3799_v23 = vsel %vm3790_vm5, %v3797_v12, %v3798_v48 }
 0x34b   : > { %v3805_v13 = vsel %vm3790_vm5, %v3798_v48, %v3804_v1  ;;  %v6342_v44 = vpop.f32.mrf.mxu1 }
 0x34c   : > { %v3567_v24 = vmax.f32 %v3447_v22, 0.0  ;;  %v3289_v27 = vadd.f32 %v5978_v56, %v9111_v57  ;;  %4342 = vmatprep.mubr.bf16.mxu1 %v4113_v62  ;;  %v4114_v21 = vpack.c.bf16 %v3805_v13, %v3799_v23 }
 0x34d   : > { %4343 = vmatmul.mubr.bf16.vlgmr.msra.gmra.mxu1 %v4112_v7  ;;  %v3457_v12 = vpop.f32.mrf.mxu1 }
 0x34e   : > { %v3450_v50 = vadd.f32 %v6338_v36, %v3289_v27  ;;  %v3681_v28 = vrot.slane %v3567_v24, 3  ;;  %v3730_v47 = vrot.slane %v3567_v24, 6  ;;  %v5979_v41 = vpop.f32.mrf.mxu0  ;;  %v3806_v26 = vrot.slane %v3567_v24, 5  ;;  %6383 = vmatprep.mubr.bf16.mxu0 %v4114_v21 }
 0x350   : > { %v3568_v43 = vmax.f32 %v3450_v50, 0.0  ;;  %v5980_v58 = vpop.f32.mrf.mxu0  ;;  %v3811_v17 = vrot.slane %v3730_v47, 5  ;;  %v3808_v15 = vrot.slane %v3681_v28, 5  ;;  %v3807_v6 = vsel %vm3790_vm5, %v9116_v45, %v3806_v26 }
 0x351   : > { %v5981_v52 = vadd.f32 %v5980_v58, %v5979_v41 }
 0x352   : > { %v3682_v3 = vrot.slane %v3568_v43, 3  ;;  %v3731_v39 = vrot.slane %v3568_v43, 6  ;;  %v3814_v14 = vrot.slane %v3568_v43, 5  ;;  %v5982_v49 = vpop.f32.mrf.mxu0 }
 0x353   : > { %v3294_v55 = vadd.f32 %v5981_v52, %v9111_v57 }
 0x354   : > { %v3732_v16 = vsel %vm1145_vm1, %v3730_v47, %v3731_v39  ;;  %v3733_v18 = vsel %vm1145_vm1, %v3731_v39, %v10157_v61  ;;  %v3683_v36 = vsel %vm1013_vm2, %v3681_v28, %v3682_v3  ;;  %v5983_v46 = vpop.f32.mrf.mxu0  ;;  %v3816_v42 = vrot.slane %v3682_v3, 5 }
 0x355   : > { %v3812_v0 = vrot.slane %v3732_v16, 5  ;;  %v3818_v60 = vrot.slane %v3733_v18, 5  ;;  %v3809_v10 = vrot.slane %v3683_v36, 5  ;;  %v3455_v2 = vadd.f32 %v3454_v25, %v3294_v55 }
 0x356   : > { %v5984_v33 = vadd.f32 %v5983_v46, %v5982_v49  ;;  %v3815_v31 = vsel %vm3790_vm5, %v3806_v26, %v3814_v14 }
 0x357   : > { %v3810_v40 = vsel %vm3790_vm5, %v3808_v15, %v3809_v10  ;;  %v3817_v5 = vsel %vm3790_vm5, %v3809_v10, %v3816_v42  ;;  %v3813_v8 = vsel %vm3790_vm5, %v3811_v17, %v3812_v0  ;;  %v3819_v37 = vsel %vm3790_vm5, %v3812_v0, %v3818_v60 }
 0x358   : > { %v3569_v35 = vmax.f32 %v3455_v2, 0.0  ;;  %v3297_v29 = vadd.f32 %v5984_v33, %v9111_v57  ;;  %v4116_v59 = vpack.c.bf16 %v3817_v5, %v3810_v40  ;;  %v4117_v11 = vpack.c.bf16 %v3819_v37, %v3813_v8 }
 0x359   : > { %v4115_v53 = vpack.c.bf16 %v3815_v31, %v3807_v6 }
 0x35a   : > { %v3458_v19 = vadd.f32 %v3457_v12, %v3297_v29  ;;  %4350 = vmatprep.mubr.bf16.mxu1 %v4116_v59  ;;  %6384 = vmatmul.mubr.bf16.vlgmr.msra.gmra.mxu0 %v4117_v11  ;;  %v3684_v54 = vrot.slane %v3569_v35, 3  ;;  %v3734_v9 = vrot.slane %v3569_v35, 6  ;;  %v3820_v48 = vrot.slane %v3569_v35, 5 }
 0x35b   : > { %4351 = vmatmul.mubr.bf16.gmra.mxu1 %v4115_v53 }
 0x35c   : > { %v3570_v38 = vmax.f32 %v3458_v19, 0.0  ;;  %v5985_v32 = vpop.f32.mrf.mxu0  ;;  %v3822_v34 = vrot.slane %v3684_v54, 5  ;;  %v3825_v47 = vrot.slane %v3734_v9, 5  ;;  %v3821_v14 = vsel %vm3790_vm5, %v9116_v45, %v3820_v48 }
 0x35e   : > { %v3685_v20 = vrot.slane %v3570_v38, 3  ;;  %v3735_v51 = vrot.slane %v3570_v38, 6  ;;  %v3828_v22 = vrot.slane %v3570_v38, 5  ;;  %v5986_v56 = vpop.f32.mrf.mxu0 }
 0x35f   : > { %v5987_v1 = vadd.f32 %v5986_v56, %v5985_v32 }
 0x360   : > { %v5988_v4 = vpop.f32.mrf.mxu0  ;;  %v3686_v63 = vsel %vm1013_vm2, %v3684_v54, %v3685_v20  ;;  %v3830_v24 = vrot.slane %v3685_v20, 5  ;;  %v3736_v27 = vsel %vm1145_vm1, %v3734_v9, %v3735_v51  ;;  %v3737_v62 = vsel %vm1145_vm1, %v3735_v51, %v10157_v61 }
 0x361   : > { %v3302_v23 = vadd.f32 %v5987_v1, %v9111_v57  ;;  %v3823_v7 = vrot.slane %v3686_v63, 5  ;;  %v3826_v13 = vrot.slane %v3736_v27, 5  ;;  %v3832_v50 = vrot.slane %v3737_v62, 5 }
 0x362   : > { %v5989_v28 = vpop.f32.mrf.mxu0  ;;  %v3829_v41 = vsel %vm3790_vm5, %v3820_v48, %v3828_v22 }
 0x363   : > { %v3463_v21 = vadd.f32 %v9130_v30, %v3302_v23  ;;  %v5990_v43 = vadd.f32 %v5989_v28, %v5988_v4  ;;  %v3824_v26 = vsel %vm3790_vm5, %v3822_v34, %v3823_v7  ;;  %v3831_v25 = vsel %vm3790_vm5, %v3823_v7, %v3830_v24  ;;  %v9160_v30 = vpop.f32.mrf.mxu1 }
 0x364   : > { %v4119_v58 = vpack.c.bf16 %v3831_v25, %v3824_v26  ;;  %v3827_v3 = vsel %vm3790_vm5, %v3825_v47, %v3826_v13  ;;  %v3833_v39 = vsel %vm3790_vm5, %v3826_v13, %v3832_v50  ;;  %v4118_v15 = vpack.c.bf16 %v3829_v41, %v3821_v14 }
 0x365   : > { %v3571_v52 = vmax.f32 %v3463_v21, 0.0  ;;  %v3305_v17 = vadd.f32 %v5990_v43, %v9111_v57  ;;  %v4120_v49 = vpack.c.bf16 %v3833_v39, %v3827_v3  ;;  %v3470_v0 = vpop.f32.mrf.mxu1 }
 0x366   : > { %4358 = vmatprep.mubr.bf16.mxu1 %v4119_v58 }
 0x367   : > { %v3466_v16 = vadd.f32 %v6342_v44, %v3305_v17  ;;  %6387 = vmatprep.mubr.bf16.mxu0 %v4120_v49  ;;  %4359 = vmatmul.mubr.bf16.gmra.mxu1 %v4118_v15  ;;  %v3687_v18 = vrot.slane %v3571_v52, 3  ;;  %v3738_v60 = vrot.slane %v3571_v52, 6  ;;  %v3834_v33 = vrot.slane %v3571_v52, 5  ;;  %v6346_v12 = vpop.f32.mrf.mxu1 }
 0x369   : > { %v3572_v55 = vmax.f32 %v3466_v16, 0.0  ;;  %v3836_v31 = vrot.slane %v3687_v18, 5  ;;  %v3839_v53 = vrot.slane %v3738_v60, 5  ;;  %v3835_v48 = vsel %vm3790_vm5, %v9116_v45, %v3834_v33  ;;  %v3473_v24 = vpop.f32.mrf.mxu1 }
 0x36b   : > { %v5991_v36 = vpop.f32.mrf.mxu0  ;;  %v3688_v46 = vrot.slane %v3572_v55, 3  ;;  %v3739_v10 = vrot.slane %v3572_v55, 6  ;;  %v3842_v42 = vrot.slane %v3572_v55, 5  ;;  %v9180_v49 = vpop.f32.mrf.mxu1 }
 0x36d   : > { %v5992_v2 = vpop.f32.mrf.mxu0  ;;  %v3689_v5 = vsel %vm1013_vm2, %v3687_v18, %v3688_v46  ;;  %v3844_v8 = vrot.slane %v3688_v46, 5  ;;  %v3740_v44 = vsel %vm1145_vm1, %v3738_v60, %v3739_v10  ;;  %v3741_v37 = vsel %vm1145_vm1, %v3739_v10, %v10157_v61 }
 0x36e   : > { %v5993_v6 = vadd.f32 %v5992_v2, %v5991_v36  ;;  %v3837_v29 = vrot.slane %v3689_v5, 5  ;;  %v3840_v59 = vrot.slane %v3740_v44, 5  ;;  %v3846_v11 = vrot.slane %v3741_v37, 5  ;;  %v3486_v5 = vpop.f32.mrf.mxu1 }
 0x36f   : > { %v5994_v40 = vpop.f32.mrf.mxu0  ;;  %v3843_v54 = vsel %vm3790_vm5, %v3834_v33, %v3842_v42 }
 0x370   : > { %v3310_v35 = vadd.f32 %v5993_v6, %v9111_v57  ;;  %v3838_v9 = vsel %vm3790_vm5, %v3836_v31, %v3837_v29  ;;  %v3845_v20 = vsel %vm3790_vm5, %v3837_v29, %v3844_v8  ;;  %v3841_v22 = vsel %vm3790_vm5, %v3839_v53, %v3840_v59 }
 0x371   : > { %v5995_v19 = vpop.f32.mrf.mxu0  ;;  %v4122_v51 = vpack.c.bf16 %v3845_v20, %v3838_v9  ;;  %v3847_v56 = vsel %vm3790_vm5, %v3840_v59, %v3846_v11  ;;  %v4121_v63 = vpack.c.bf16 %v3843_v54, %v3835_v48  ;;  %v9192_v54 = vpop.f32.mrf.mxu1 }
 0x372   : > { %v3471_v38 = vadd.f32 %v3470_v0, %v3310_v35  ;;  %v5996_v32 = vadd.f32 %v5995_v19, %v5994_v40  ;;  %v4123_v4 = vpack.c.bf16 %v3847_v56, %v3841_v22 }
 0x373   : > { %4366 = vmatprep.mubr.bf16.mxu1 %v4122_v51 }
 0x374   : > { %v3573_v1 = vmax.f32 %v3471_v38, 0.0  ;;  %v3313_v34 = vadd.f32 %v5996_v32, %v9111_v57  ;;  %6388 = vmatmul.mubr.bf16.gmra.mxu0 %v4123_v4  ;;  %4367 = vmatmul.mubr.bf16.gmra.mxu1 %v4121_v63 }
 0x376   : > { %v3474_v27 = vadd.f32 %v3473_v24, %v3313_v34  ;;  %v3690_v23 = vrot.slane %v3573_v1, 3  ;;  %v3742_v28 = vrot.slane %v3573_v1, 6  ;;  %v3848_v26 = vrot.slane %v3573_v1, 5 }
 0x378   : > { %v5997_v62 = vpop.f32.mrf.mxu0  ;;  %v3574_v7 = vmax.f32 %v3474_v27, 0.0  ;;  %v3850_v58 = vrot.slane %v3690_v23, 5  ;;  %v3853_v36 = vrot.slane %v3742_v28, 5  ;;  %v3849_v33 = vsel %vm3790_vm5, %v9116_v45, %v3848_v26 }
 0x37a   : > { %v5998_v13 = vpop.f32.mrf.mxu0  ;;  %v3691_v47 = vrot.slane %v3574_v7, 3  ;;  %v3743_v41 = vrot.slane %v3574_v7, 6  ;;  %v3856_v21 = vrot.slane %v3574_v7, 5  ;;  %v3489_v7 = vpop.f32.mrf.mxu1 }
 0x37b   : > { %v5999_v50 = vadd.f32 %v5998_v13, %v5997_v62 }
 0x37c   : > { %v6000_v43 = vpop.f32.mrf.mxu0  ;;  %v3692_v39 = vsel %vm1013_vm2, %v3690_v23, %v3691_v47  ;;  %v3858_v14 = vrot.slane %v3691_v47, 5  ;;  %v3744_v52 = vsel %vm1145_vm1, %v3742_v28, %v3743_v41  ;;  %v3745_v17 = vsel %vm1145_vm1, %v3743_v41, %v10157_v61 }
 0x37d   : > { %v3318_v25 = vadd.f32 %v5999_v50, %v9111_v57  ;;  %v3851_v18 = vrot.slane %v3692_v39, 5  ;;  %v3854_v55 = vrot.slane %v3744_v52, 5  ;;  %v3860_v0 = vrot.slane %v3745_v17, 5 }
 0x37e   : > { %v6001_v3 = vpop.f32.mrf.mxu0  ;;  %v3857_v60 = vsel %vm3790_vm5, %v3848_v26, %v3856_v21 }
 0x37f   : > { %v3479_v15 = vadd.f32 %v9160_v30, %v3318_v25  ;;  %v6002_v16 = vadd.f32 %v6001_v3, %v6000_v43  ;;  %v3852_v42 = vsel %vm3790_vm5, %v3850_v58, %v3851_v18  ;;  %v3859_v2 = vsel %vm3790_vm5, %v3851_v18, %v3858_v14 }
 0x380   : > { %v4125_v31 = vpack.c.bf16 %v3859_v2, %v3852_v42  ;;  %v3855_v30 = vsel %vm3790_vm5, %v3853_v36, %v3854_v55  ;;  %v3861_v40 = vsel %vm3790_vm5, %v3854_v55, %v3860_v0  ;;  %v4124_v37 = vpack.c.bf16 %v3857_v60, %v3849_v33  ;;  %v9206_v55 = vpop.f32.mrf.mxu1 }
 0x381   : > { %v3321_v46 = vadd.f32 %v6002_v16, %v9111_v57  ;;  %v3575_v6 = vmax.f32 %v3479_v15, 0.0  ;;  %v4126_v29 = vpack.c.bf16 %v3861_v40, %v3855_v30 }
 0x382   : > { %4374 = vmatprep.mubr.bf16.mxu1 %v4125_v31 }
 0x383   : > { %v6003_v10 = vpop.f32.mrf.mxu0  ;;  %v3482_v8 = vadd.f32 %v6346_v12, %v3321_v46  ;;  %4375 = vmatmul.mubr.bf16.gmra.mxu1 %v4124_v37  ;;  %v3693_v53 = vrot.slane %v3575_v6, 3  ;;  %6391 = vmatprep.mubr.bf16.mxu0 %v4126_v29  ;;  %v3746_v38 = vrot.slane %v3575_v6, 6  ;;  %v3862_v12 = vrot.slane %v3575_v6, 5  ;;  %v3502_v29 = vpop.f32.mrf.mxu1 }
 0x385   : > { %v6004_v44 = vpop.f32.mrf.mxu0  ;;  %v3576_v59 = vmax.f32 %v3482_v8, 0.0  ;;  %v3867_v13 = vrot.slane %v3746_v38, 5  ;;  %v3864_v28 = vrot.slane %v3693_v53, 5  ;;  %v3863_v18 = vsel %vm3790_vm5, %v9116_v45, %v3862_v12 }
 0x386   : > { %v6005_v35 = vadd.f32 %v6004_v44, %v6003_v10 }
 0x387   : > { %v6006_v11 = vpop.f32.mrf.mxu0  ;;  %v3694_v32 = vrot.slane %v3576_v59, 3  ;;  %v3747_v9 = vrot.slane %v3576_v59, 6  ;;  %v3870_v20 = vrot.slane %v3576_v59, 5 }
 0x388   : > { %v3326_v19 = vadd.f32 %v6005_v35, %v9111_v57 }
 0x389   : > { %v6007_v51 = vpop.f32.mrf.mxu0  ;;  %v3695_v1 = vsel %vm1013_vm2, %v3693_v53, %v3694_v32  ;;  %v3872_v34 = vrot.slane %v3694_v32, 5  ;;  %v3748_v4 = vsel %vm1145_vm1, %v3746_v38, %v3747_v9  ;;  %v3749_v63 = vsel %vm1145_vm1, %v3747_v9, %v10157_v61 }
 0x38a   : > { %v3487_v22 = vadd.f32 %v3486_v5, %v3326_v19  ;;  %v6008_v56 = vadd.f32 %v6007_v51, %v6006_v11  ;;  %v3865_v62 = vrot.slane %v3695_v1, 5  ;;  %v3868_v23 = vrot.slane %v3748_v4, 5 }
 0x38b   : > { %v6009_v48 = vpop.f32.mrf.mxu0  ;;  %v3874_v47 = vrot.slane %v3749_v63, 5  ;;  %v3871_v41 = vsel %vm3790_vm5, %v3862_v12, %v3870_v20 }
 0x38c   : > { %v3577_v24 = vmax.f32 %v3487_v22, 0.0  ;;  %v3329_v27 = vadd.f32 %v6008_v56, %v9111_v57  ;;  %v3866_v39 = vsel %vm3790_vm5, %v3864_v28, %v3865_v62  ;;  %v3873_v14 = vsel %vm3790_vm5, %v3865_v62, %v3872_v34 }
 0x38d   : > { %v6010_v50 = vpop.f32.mrf.mxu0  ;;  %v3869_v52 = vsel %vm3790_vm5, %v3867_v13, %v3868_v23  ;;  %v4128_v15 = vpack.c.bf16 %v3873_v14, %v3866_v39  ;;  %v3875_v16 = vsel %vm3790_vm5, %v3868_v23, %v3874_v47  ;;  %v4127_v46 = vpack.c.bf16 %v3871_v41, %v3863_v18 }
 0x38e   : > { %v3696_v21 = vrot.slane %v3577_v24, 3  ;;  %v3750_v43 = vrot.slane %v3577_v24, 6  ;;  %v3876_v26 = vrot.slane %v3577_v24, 5  ;;  %v3490_v25 = vadd.f32 %v3489_v7, %v3329_v27  ;;  %v9223_v24 = vpop.f32.mrf.mxu1 }
 0x38f   : > { %v6011_v58 = vadd.f32 %v6010_v50, %v6009_v48  ;;  %v6012_v3 = vpop.f32.mrf.mxu0  ;;  %v4129_v60 = vpack.c.bf16 %v3875_v16, %v3869_v52  ;;  %4382 = vmatprep.mubr.bf16.mxu1 %v4128_v15 }
 0x390   : > { %v3578_v17 = vmax.f32 %v3490_v25, 0.0  ;;  %4383 = vmatmul.mubr.bf16.gmra.mxu1 %v4127_v46  ;;  %v3878_v30 = vrot.slane %v3696_v21, 5  ;;  %v3881_v40 = vrot.slane %v3750_v43, 5  ;;  %v3877_v5 = vsel %vm3790_vm5, %v9116_v45, %v3876_v26  ;;  %v3505_v52 = vpop.f32.mrf.mxu1 }
 0x391   : > { %v3334_v36 = vadd.f32 %v6011_v58, %v9111_v57  ;;  %v6013_v0 = vpop.f32.mrf.mxu0  ;;  %6392 = vmatmul.mubr.bf16.gmra.mxu0 %v4129_v60 }
 0x392   : > { %v3697_v10 = vrot.slane %v3578_v17, 3  ;;  %v3751_v42 = vrot.slane %v3578_v17, 6  ;;  %v3884_v2 = vrot.slane %v3578_v17, 5  ;;  %v6014_v33 = vadd.f32 %v6013_v0, %v6012_v3 }
 0x393   : > { %v3495_v6 = vadd.f32 %v9180_v49, %v3334_v36  ;;  %v6015_v31 = vpop.f32.mrf.mxu0 }
 0x394   : > { %v3337_v8 = vadd.f32 %v6014_v33, %v9111_v57  ;;  %v3698_v44 = vsel %vm1013_vm2, %v3696_v21, %v3697_v10  ;;  %v3886_v37 = vrot.slane %v3697_v10, 5  ;;  %v3752_v35 = vsel %vm1145_vm1, %v3750_v43, %v3751_v42 }
 0x395   : > { %v3579_v59 = vmax.f32 %v3495_v6, 0.0  ;;  %v6016_v11 = vpop.f32.mrf.mxu0  ;;  %v3879_v53 = vrot.slane %v3698_v44, 5  ;;  %v3753_v49 = vsel %vm1145_vm1, %v3751_v42, %v10157_v61  ;;  %v3882_v19 = vrot.slane %v3752_v35, 5  ;;  %v9243_v44 = vpop.f32.mrf.mxu1 }
 0x396   : > { %v3498_v38 = vadd.f32 %v9192_v54, %v3337_v8  ;;  %v6017_v32 = vadd.f32 %v6016_v11, %v6015_v31  ;;  %v3888_v9 = vrot.slane %v3753_v49, 5  ;;  %v3885_v20 = vsel %vm3790_vm5, %v3876_v26, %v3884_v2 }
 0x397   : > { %v3699_v51 = vrot.slane %v3579_v59, 3  ;;  %v3754_v12 = vrot.slane %v3579_v59, 6  ;;  %v3890_v22 = vrot.slane %v3579_v59, 5  ;;  %v6018_v56 = vpop.f32.mrf.mxu0  ;;  %v3880_v48 = vsel %vm3790_vm5, %v3878_v30, %v3879_v53 }
 0x398   : > { %v3580_v1 = vmax.f32 %v3498_v38, 0.0  ;;  %v3342_v34 = vadd.f32 %v6017_v32, %v9111_v57  ;;  %v3887_v4 = vsel %vm3790_vm5, %v3879_v53, %v3886_v37  ;;  %v3883_v63 = vsel %vm3790_vm5, %v3881_v40, %v3882_v19 }
 0x399   : > { %v3895_v54 = vrot.slane %v3754_v12, 5  ;;  %v6019_v27 = vpop.f32.mrf.mxu0  ;;  %v4131_v62 = vpack.c.bf16 %v3887_v4, %v3880_v48  ;;  %v3889_v23 = vsel %vm3790_vm5, %v3882_v19, %v3888_v9  ;;  %v4130_v7 = vpack.c.bf16 %v3885_v20, %v3877_v5 }
 0x39a   : > { %v3700_v13 = vrot.slane %v3580_v1, 3  ;;  %v3755_v50 = vrot.slane %v3580_v1, 6  ;;  %v3898_v28 = vrot.slane %v3580_v1, 5  ;;  %v3503_v47 = vadd.f32 %v3502_v29, %v3342_v34 }
 0x39b   : > { %v6020_v41 = vadd.f32 %v6019_v27, %v6018_v56  ;;  %4390 = vmatprep.mubr.bf16.mxu1 %v4131_v62  ;;  %v4132_v21 = vpack.c.bf16 %v3889_v23, %v3883_v63  ;;  %v6021_v43 = vpop.f32.mrf.mxu0  ;;  %v3892_v26 = vrot.slane %v3699_v51, 5  ;;  %v3891_v25 = vsel %vm3790_vm5, %v9116_v45, %v3890_v22 }
 0x39c   : > { %v9228_v58 = vmax.f32 %v3503_v47, 0.0  ;;  %4391 = vmatmul.mubr.bf16.gmra.mxu1 %v4130_v7  ;;  %v3701_v3 = vsel %vm1013_vm2, %v3699_v51, %v3700_v13  ;;  %v3900_v39 = vrot.slane %v3700_v13, 5  ;;  %v3756_v14 = vsel %vm1145_vm1, %v3754_v12, %v3755_v50 }
 0x39d   : > { %v3345_v17 = vadd.f32 %v6020_v41, %v9111_v57  ;;  %6395 = vmatprep.mubr.bf16.mxu0 %v4132_v21  ;;  %v6022_v15 = vpop.f32.mrf.mxu0  ;;  %v3893_v16 = vrot.slane %v3701_v3, 5  ;;  %v3757_v18 = vsel %vm1145_vm1, %v3755_v50, %v10157_v61  ;;  %v3896_v36 = vrot.slane %v3756_v14, 5 }
 0x39e   : > { %v3702_v0 = vrot.slane %v9228_v58, 3  ;;  %v3758_v60 = vrot.slane %v9228_v58, 6  ;;  %v3904_v46 = vrot.slane %v9228_v58, 5  ;;  %v6023_v10 = vadd.f32 %v6022_v15, %v6021_v43 }
 0x39f   : > { %v3506_v42 = vadd.f32 %v3505_v52, %v3345_v17  ;;  %v6024_v2 = vpop.f32.mrf.mxu0  ;;  %v3894_v33 = vsel %vm3790_vm5, %v3892_v26, %v3893_v16  ;;  %v3901_v6 = vsel %vm3790_vm5, %v3893_v16, %v3900_v39  ;;  %v3897_v31 = vsel %vm3790_vm5, %v3895_v54, %v3896_v36 }
 0x3a0   : > { %v3350_v30 = vadd.f32 %v6023_v10, %v9111_v57  ;;  %v4134_v40 = vpack.c.bf16 %v3901_v6, %v3894_v33  ;;  %v3902_v5 = vrot.slane %v3757_v18, 5  ;;  %v3899_v8 = vsel %vm3790_vm5, %v3890_v22, %v3898_v28 }
 0x3a1   : > { %v3582_v37 = vmax.f32 %v3506_v42, 0.0  ;;  %v6025_v35 = vpop.f32.mrf.mxu0  ;;  %v4133_v29 = vpack.c.bf16 %v3899_v8, %v3891_v25  ;;  %v3906_v49 = vrot.slane %v3702_v0, 5  ;;  %v3909_v20 = vrot.slane %v3758_v60, 5 }
 0x3a2   : > { %v3511_v59 = vadd.f32 %v9206_v55, %v3350_v30  ;;  %v6026_v11 = vadd.f32 %v6025_v35, %v6024_v2  ;;  %4398 = vmatprep.mubr.bf16.mxu1 %v4134_v40  ;;  %v3903_v53 = vsel %vm3790_vm5, %v3896_v36, %v3902_v5  ;;  %v3905_v56 = vsel %vm3790_vm5, %v9116_v45, %v3904_v46  ;;  %v3518_v55 = vpop.f32.mrf.mxu1 }
 0x3a3   : > { %v3703_v19 = vrot.slane %v3582_v37, 3  ;;  %v3759_v38 = vrot.slane %v3582_v37, 6  ;;  %v4135_v32 = vpack.c.bf16 %v3903_v53, %v3897_v31  ;;  %v6027_v9 = vpop.f32.mrf.mxu0  ;;  %v3912_v51 = vrot.slane %v3582_v37, 5 }
 0x3a4   : > { %v9247_v12 = vmax.f32 %v3511_v59, 0.0  ;;  %v3353_v22 = vadd.f32 %v6026_v11, %v9111_v57  ;;  %4399 = vmatmul.mubr.bf16.gmra.mxu1 %v4133_v29  ;;  %v9261_v25 = vpop.f32.mrf.mxu1 }
 0x3a5   : > { %6396 = vmatmul.mubr.bf16.gmra.mxu0 %v4135_v32  ;;  %v6028_v48 = vpop.f32.mrf.mxu0  ;;  %v3704_v1 = vsel %vm1013_vm2, %v3702_v0, %v3703_v19  ;;  %v3914_v34 = vrot.slane %v3703_v19, 5  ;;  %v3760_v4 = vsel %vm1145_vm1, %v3758_v60, %v3759_v38  ;;  %v3761_v63 = vsel %vm1145_vm1, %v3759_v38, %v10157_v61 }
 0x3a6   : > { %v3705_v54 = vrot.slane %v9247_v12, 3  ;;  %v3762_v27 = vrot.slane %v9247_v12, 6  ;;  %v3918_v62 = vrot.slane %v9247_v12, 5  ;;  %v3514_v23 = vadd.f32 %v9223_v24, %v3353_v22  ;;  %v3521_v6 = vpop.f32.mrf.mxu1 }
 0x3a7   : > { %v6029_v7 = vadd.f32 %v6028_v48, %v6027_v9  ;;  %v6030_v13 = vpop.f32.mrf.mxu0  ;;  %v3907_v50 = vrot.slane %v3704_v1, 5  ;;  %v3910_v28 = vrot.slane %v3760_v4, 5  ;;  %v3916_v47 = vrot.slane %v3761_v63, 5 }
 0x3a8   : > { %v3923_v41 = vrot.slane %v3762_v27, 5  ;;  %v3584_v21 = vmax.f32 %v3514_v23, 0.0  ;;  %v3913_v43 = vsel %vm3790_vm5, %v3904_v46, %v3912_v51  ;;  %v3920_v26 = vrot.slane %v3705_v54, 5  ;;  %v9281_v51 = vpop.f32.mrf.mxu1 }
 0x3a9   : > { %v3358_v58 = vadd.f32 %v6029_v7, %v9111_v57  ;;  %v6031_v3 = vpop.f32.mrf.mxu0  ;;  %v3908_v39 = vsel %vm3790_vm5, %v3906_v49, %v3907_v50  ;;  %v3915_v14 = vsel %vm3790_vm5, %v3907_v50, %v3914_v34  ;;  %v3911_v24 = vsel %vm3790_vm5, %v3909_v20, %v3910_v28 }
 0x3aa   : > { %v3706_v52 = vrot.slane %v3584_v21, 3  ;;  %v3763_v17 = vrot.slane %v3584_v21, 6  ;;  %v3926_v15 = vrot.slane %v3584_v21, 5  ;;  %v6032_v16 = vadd.f32 %v6031_v3, %v6030_v13  ;;  %v3534_v21 = vpop.f32.mrf.mxu1 }
 0x3ab   : > { %v3519_v18 = vadd.f32 %v3518_v55, %v3358_v58  ;;  %v4137_v36 = vpack.c.bf16 %v3915_v14, %v3908_v39  ;;  %v3917_v0 = vsel %vm3790_vm5, %v3910_v28, %v3916_v47  ;;  %v6033_v60 = vpop.f32.mrf.mxu0  ;;  %v4136_v46 = vpack.c.bf16 %v3913_v43, %v3905_v56 }
 0x3ac   : > { %v3361_v10 = vadd.f32 %v6032_v16, %v9111_v57  ;;  %v4138_v42 = vpack.c.bf16 %v3917_v0, %v3911_v24  ;;  %v3707_v2 = vsel %vm1013_vm2, %v3705_v54, %v3706_v52  ;;  %v3928_v33 = vrot.slane %v3706_v52, 5 }
 0x3ad   : > { %v9270_v31 = vmax.f32 %v3519_v18, 0.0  ;;  %4406 = vmatprep.mubr.bf16.mxu1 %v4137_v36  ;;  %v6034_v30 = vpop.f32.mrf.mxu0  ;;  %v3921_v40 = vrot.slane %v3707_v2, 5  ;;  %v3764_v5 = vsel %vm1145_vm1, %v3762_v27, %v3763_v17  ;;  %v3765_v8 = vsel %vm1145_vm1, %v3763_v17, %v10157_v61 }
 0x3ae   : > { %v3522_v37 = vadd.f32 %v3521_v6, %v3361_v10  ;;  %6399 = vmatprep.mubr.bf16.mxu0 %v4138_v42  ;;  %4407 = vmatmul.mubr.bf16.gmra.mxu1 %v4136_v46  ;;  %v6035_v35 = vadd.f32 %v6034_v30, %v6033_v60  ;;  %v3924_v29 = vrot.slane %v3764_v5, 5  ;;  %v3930_v59 = vrot.slane %v3765_v8, 5  ;;  %v9303_v10 = vpop.f32.mrf.mxu1 }
 0x3af   : > { %v3708_v11 = vrot.slane %v9270_v31, 3  ;;  %v3766_v53 = vrot.slane %v9270_v31, 6  ;;  %v6036_v49 = vpop.f32.mrf.mxu0  ;;  %v3922_v19 = vsel %vm3790_vm5, %v3920_v26, %v3921_v40  ;;  %v3929_v9 = vsel %vm3790_vm5, %v3921_v40, %v3928_v33 }
 0x3b0   : > { %v3586_v38 = vmax.f32 %v3522_v37, 0.0  ;;  %v3366_v32 = vadd.f32 %v6035_v35, %v9111_v57  ;;  %v3925_v20 = vsel %vm3790_vm5, %v3923_v41, %v3924_v29  ;;  %v3932_v12 = vrot.slane %v9270_v31, 5 }
 0x3b1   : > { %v6037_v22 = vpop.f32.mrf.mxu0  ;;  %v4140_v56 = vpack.c.bf16 %v3929_v9, %v3922_v19  ;;  %v3931_v55 = vsel %vm3790_vm5, %v3924_v29, %v3930_v59  ;;  %v3927_v48 = vsel %vm3790_vm5, %v3918_v62, %v3926_v15  ;;  %v3919_v63 = vsel %vm3790_vm5, %v9116_v45, %v3918_v62 }
 0x3b2   : > { %v3709_v1 = vrot.slane %v3586_v38, 3  ;;  %v3767_v34 = vrot.slane %v3586_v38, 6  ;;  %v3527_v4 = vadd.f32 %v9243_v44, %v3366_v32  ;;  %v3940_v54 = vrot.slane %v3586_v38, 5  ;;  %v3537_v38 = vpop.f32.mrf.mxu1 }
 0x3b3   : > { %v6038_v27 = vadd.f32 %v6037_v22, %v6036_v49  ;;  %4414 = vmatprep.mubr.bf16.mxu1 %v4140_v56  ;;  %v4141_v23 = vpack.c.bf16 %v3931_v55, %v3925_v20  ;;  %v6039_v7 = vpop.f32.mrf.mxu0  ;;  %v4139_v13 = vpack.c.bf16 %v3927_v48, %v3919_v63  ;;  %v3934_v26 = vrot.slane %v3708_v11, 5 }
 0x3b4   : > { %v9289_v50 = vmax.f32 %v3527_v4, 0.0  ;;  %v3710_v28 = vsel %vm1013_vm2, %v3708_v11, %v3709_v1  ;;  %v3942_v47 = vrot.slane %v3709_v1, 5  ;;  %v3768_v41 = vsel %vm1145_vm1, %v3766_v53, %v3767_v34 }
 0x3b5   : > { %v3369_v43 = vadd.f32 %v6038_v27, %v9111_v57  ;;  %6400 = vmatmul.mubr.bf16.gmra.mxu0 %v4141_v23  ;;  %v6040_v44 = vpop.f32.mrf.mxu0  ;;  %v3935_v62 = vrot.slane %v3710_v28, 5  ;;  %v3769_v58 = vsel %vm1145_vm1, %v3767_v34, %v10157_v61  ;;  %v3937_v24 = vrot.slane %v3766_v53, 5 }
 0x3b6   : > { %v3711_v3 = vrot.slane %v9289_v50, 3  ;;  %v3770_v39 = vrot.slane %v9289_v50, 6  ;;  %4415 = vmatmul.mubr.bf16.gmra.mxu1 %v4139_v13  ;;  %v6041_v14 = vadd.f32 %v6040_v44, %v6039_v7  ;;  %v3938_v18 = vrot.slane %v3768_v41, 5  ;;  %v9327_v44 = vpop.f32.mrf.mxu1 }
 0x3b7   : > { %v3530_v52 = vadd.f32 %v9261_v25, %v3369_v43  ;;  %v6042_v17 = vpop.f32.mrf.mxu0  ;;  %v3936_v15 = vsel %vm3790_vm5, %v3934_v26, %v3935_v62  ;;  %v3943_v16 = vsel %vm3790_vm5, %v3935_v62, %v3942_v47  ;;  %v3946_v36 = vrot.slane %v9289_v50, 5 }
 0x3b8   : > { %v3374_v0 = vadd.f32 %v6041_v14, %v9111_v57  ;;  %v4143_v60 = vpack.c.bf16 %v3943_v16, %v3936_v15  ;;  %v3944_v46 = vrot.slane %v3769_v58, 5  ;;  %v3951_v42 = vrot.slane %v3770_v39, 5 }
 0x3b9   : > { %v3588_v2 = vmax.f32 %v3530_v52, 0.0  ;;  %v6043_v33 = vpop.f32.mrf.mxu0  ;;  %v3939_v6 = vsel %vm3790_vm5, %v3937_v24, %v3938_v18  ;;  %v3941_v25 = vsel %vm3790_vm5, %v3932_v12, %v3940_v54  ;;  %v3933_v5 = vsel %vm3790_vm5, %v9116_v45, %v3932_v12 }
 0x3ba   : > { %v3535_v31 = vadd.f32 %v3534_v21, %v3374_v0  ;;  %v6044_v30 = vadd.f32 %v6043_v33, %v6042_v17  ;;  %4422 = vmatprep.mubr.bf16.mxu1 %v4143_v60  ;;  %v3945_v40 = vsel %vm3790_vm5, %v3938_v18, %v3944_v46  ;;  %v4142_v59 = vpack.c.bf16 %v3941_v25, %v3933_v5  ;;  %v9334_v17 = vld [vmem:[%s10033_s6] ss:$0 sm:$0xff] }
 0x3bb   : > { %v3712_v8 = vrot.slane %v3588_v2, 3  ;;  %v3771_v37 = vrot.slane %v3588_v2, 6  ;;  %v4144_v35 = vpack.c.bf16 %v3945_v40, %v3939_v6  ;;  %v6045_v29 = vpop.f32.mrf.mxu0  ;;  %v3954_v11 = vrot.slane %v3588_v2, 5  ;;  %v3550_v2 = vpop.f32.mrf.mxu1 }
 0x3bc   : > { %v9310_v53 = vmax.f32 %v3535_v31, 0.0  ;;  %v3377_v49 = vadd.f32 %v6044_v30, %v9111_v57  ;;  %v3948_v19 = vrot.slane %v3711_v3, 5  ;;  %v3947_v1 = vsel %vm3790_vm5, %v9116_v45, %v3946_v36 }
 0x3bd   : > { %6403 = vmatprep.mubr.bf16.mxu0 %v4144_v35  ;;  %v6046_v32 = vpop.f32.mrf.mxu0  ;;  %v3713_v9 = vsel %vm1013_vm2, %v3711_v3, %v3712_v8  ;;  %v3956_v20 = vrot.slane %v3712_v8, 5  ;;  %v3772_v22 = vsel %vm1145_vm1, %v3770_v39, %v3771_v37  ;;  %v3773_v12 = vsel %vm1145_vm1, %v3771_v37, %v10157_v61 }
 0x3be   : > { %v3714_v56 = vrot.slane %v9310_v53, 3  ;;  %v3774_v55 = vrot.slane %v9310_v53, 6  ;;  %v3538_v48 = vadd.f32 %v3537_v38, %v3377_v49  ;;  %4423 = vmatmul.mubr.bf16.gmra.mxu1 %v4142_v59  ;;  %v6047_v34 = vadd.f32 %v6046_v32, %v6045_v29  ;;  %v6366_v38 = vpop.f32.mrf.mxu1 }
 0x3bf   : > { %v6048_v4 = vpop.f32.mrf.mxu0  ;;  %v3949_v63 = vrot.slane %v3713_v9, 5  ;;  %v3952_v54 = vrot.slane %v3772_v22, 5  ;;  %v3958_v27 = vrot.slane %v3773_v12, 5  ;;  %v3960_v23 = vrot.slane %v9310_v53, 5 }
 0x3c0   : > { %v3590_v7 = vmax.f32 %v3538_v48, 0.0  ;;  %v3955_v13 = vsel %vm3790_vm5, %v3946_v36, %v3954_v11  ;;  %v3962_v50 = vrot.slane %v3714_v56, 5  ;;  %v3382_v28 = vadd.f32 %v6047_v34, %v9111_v57 }
 0x3c1   : > { %v6049_v47 = vpop.f32.mrf.mxu0  ;;  %v3950_v41 = vsel %vm3790_vm5, %v3948_v19, %v3949_v63  ;;  %v3957_v21 = vsel %vm3790_vm5, %v3949_v63, %v3956_v20  ;;  %v3953_v43 = vsel %vm3790_vm5, %v3951_v42, %v3952_v54  ;;  %v3965_v3 = vrot.slane %v3774_v55, 5 }
 0x3c2   : > { %v3715_v26 = vrot.slane %v3590_v7, 3  ;;  %v3775_v62 = vrot.slane %v3590_v7, 6  ;;  %v6050_v58 = vadd.f32 %v6049_v47, %v6048_v4  ;;  %v3543_v39 = vadd.f32 %v9281_v51, %v3382_v28  ;;  %v3553_v47 = vpop.f32.mrf.mxu1 }
 0x3c3   : > { %v4146_v14 = vpack.c.bf16 %v3957_v21, %v3950_v41  ;;  %v3959_v24 = vsel %vm3790_vm5, %v3952_v54, %v3958_v27  ;;  %v6051_v52 = vpop.f32.mrf.mxu0  ;;  %v4145_v57 = vpack.c.bf16 %v3955_v13, %v3947_v1  ;;  %v3968_v30 = vrot.slane %v3590_v7, 5 }
 0x3c4   : > { %v3385_v15 = vadd.f32 %v9334_v17, %v6050_v58  ;;  %v4147_v16 = vpack.c.bf16 %v3959_v24, %v3953_v43  ;;  %v3716_v18 = vsel %vm1013_vm2, %v3714_v56, %v3715_v26  ;;  %v3970_v36 = vrot.slane %v3715_v26, 5 }
 0x3c5   : > { %v9338_v0 = vmax.f32 %v3543_v39, 0.0  ;;  %4430 = vmatprep.mubr.bf16.mxu1 %v4146_v14  ;;  %v6052_v51 = vpop.f32.mrf.mxu0  ;;  %v3963_v60 = vrot.slane %v3716_v18, 5  ;;  %v3776_v46 = vsel %vm1145_vm1, %v3774_v55, %v3775_v62  ;;  %v3777_v42 = vsel %vm1145_vm1, %v3775_v62, %v10157_v61 }
 0x3c6   : > { %v3546_v33 = vadd.f32 %v9303_v10, %v3385_v15  ;;  %6404 = vmatmul.mubr.bf16.gmra.mxu0 %v4147_v16  ;;  %4431 = vmatmul.mubr.bf16.gmra.mxu1 %v4145_v57  ;;  %v6053_v6 = vadd.f32 %v6052_v51, %v6051_v52  ;;  %v3966_v25 = vrot.slane %v3776_v46, 5  ;;  %v3972_v31 = vrot.slane %v3777_v42, 5 }
 0x3c7   : > { %v3717_v40 = vrot.slane %v9338_v0, 3  ;;  %v6054_v5 = vpop.f32.mrf.mxu0  ;;  %v3964_v8 = vsel %vm3790_vm5, %v3962_v50, %v3963_v60  ;;  %v3971_v29 = vsel %vm3790_vm5, %v3963_v60, %v3970_v36  ;;  %v3778_v10 = vrot.slane %v9338_v0, 6 }
 0x3c8   : > { %v3592_v37 = vmax.f32 %v3546_v33, 0.0  ;;  %v3390_v35 = vadd.f32 %v9334_v17, %v6053_v6  ;;  %v3967_v59 = vsel %vm3790_vm5, %v3965_v3, %v3966_v25  ;;  %v4149_v53 = vpack.c.bf16 %v3971_v29, %v3964_v8 }
 0x3c9   : > { %v6055_v11 = vpop.f32.mrf.mxu0  ;;  %v3973_v49 = vsel %vm3790_vm5, %v3966_v25, %v3972_v31  ;;  %v3961_v19 = vsel %vm3790_vm5, %v9116_v45, %v3960_v23  ;;  %v3969_v48 = vsel %vm3790_vm5, %v3960_v23, %v3968_v30  ;;  %v3976_v1 = vrot.slane %v3717_v40, 5 }
 0x3ca   : > { %v3718_v32 = vrot.slane %v3592_v37, 3  ;;  %v3779_v9 = vrot.slane %v3592_v37, 6  ;;  %v3982_v20 = vrot.slane %v3592_v37, 5  ;;  %v3551_v22 = vadd.f32 %v3550_v2, %v3390_v35  ;;  %4438 = vmatprep.mubr.bf16.mxu1 %v4149_v53 }
 0x3cb   : > { %v6056_v12 = vadd.f32 %v6055_v11, %v6054_v5  ;;  %v4150_v56 = vpack.c.bf16 %v3973_v49, %v3967_v59  ;;  %v6057_v55 = vpop.f32.mrf.mxu0  ;;  %v4148_v4 = vpack.c.bf16 %v3969_v48, %v3961_v19  ;;  %v3974_v23 = vrot.slane %v9338_v0, 5 }
 0x3cc   : > { %v9354_v34 = vmax.f32 %v3551_v22, 0.0  ;;  %v3719_v63 = vsel %vm1013_vm2, %v3717_v40, %v3718_v32  ;;  %v3984_v54 = vrot.slane %v3718_v32, 5  ;;  %v3780_v50 = vsel %vm1145_vm1, %v3778_v10, %v3779_v9 }
 0x3cd   : > { %v3393_v27 = vadd.f32 %v9334_v17, %v6056_v12  ;;  %6407 = vmatprep.mubr.bf16.mxu0 %v4150_v56  ;;  %v6058_v7 = vpop.f32.mrf.mxu0  ;;  %v3977_v13 = vrot.slane %v3719_v63, 5  ;;  %v3781_v28 = vsel %vm1145_vm1, %v3779_v9, %v10157_v61  ;;  %v3979_v41 = vrot.slane %v3778_v10, 5 }
 0x3ce   : > { %4439 = vmatmul.mubr.bf16.gmra.mxu1 %v4148_v4  ;;  %v6059_v21 = vadd.f32 %v6058_v7, %v6057_v55  ;;  %v3980_v3 = vrot.slane %v3780_v50, 5  ;;  %v3720_v39 = vrot.slane %v9354_v34, 3  ;;  %v3986_v52 = vrot.slane %v3781_v28, 5 }
 0x3cf   : > { %v3554_v43 = vadd.f32 %v3553_v47, %v3393_v27  ;;  %v6060_v26 = vpop.f32.mrf.mxu0  ;;  %v3978_v62 = vsel %vm3790_vm5, %v3976_v1, %v3977_v13  ;;  %v3985_v58 = vsel %vm3790_vm5, %v3977_v13, %v3984_v54  ;;  %v3782_v57 = vrot.slane %v9354_v34, 6 }
 0x3d0   : > { %v3398_v14 = vadd.f32 %v9334_v17, %v6059_v21  ;;  %v4152_v24 = vpack.c.bf16 %v3985_v58, %v3978_v62  ;;  %v3981_v18 = vsel %vm3790_vm5, %v3979_v41, %v3980_v3  ;;  %v3983_v36 = vsel %vm3790_vm5, %v3974_v23, %v3982_v20 }
 0x3d1   : > { %v3594_v15 = vmax.f32 %v3554_v43, 0.0  ;;  %v6061_v16 = vpop.f32.mrf.mxu0  ;;  %v3988_v0 = vrot.slane %v9354_v34, 5  ;;  %v3987_v46 = vsel %vm3790_vm5, %v3980_v3, %v3986_v52  ;;  %v3975_v6 = vsel %vm3790_vm5, %v9116_v45, %v3974_v23 }
 0x3d2   : > { %v3559_v51 = vadd.f32 %v9327_v44, %v3398_v14  ;;  %v6062_v60 = vadd.f32 %v6061_v16, %v6060_v26  ;;  %4446 = vmatprep.mubr.bf16.mxu1 %v4152_v24  ;;  %v4153_v33 = vpack.c.bf16 %v3987_v46, %v3981_v18  ;;  %v4151_v40 = vpack.c.bf16 %v3983_v36, %v3975_v6 }
 0x3d3   : > { %v3721_v42 = vrot.slane %v3594_v15, 3  ;;  %v3783_v2 = vrot.slane %v3594_v15, 6  ;;  %v3996_v25 = vrot.slane %v3594_v15, 5  ;;  %v3990_v59 = vrot.slane %v3720_v39, 5 }
 0x3d4   : > { %v3595_v31 = vmax.f32 %v3559_v51, 0.0  ;;  %v3401_v30 = vadd.f32 %v9334_v17, %v6062_v60  ;;  %6408 = vmatmul.mubr.bf16.gmra.mxu0 %v4153_v33  ;;  %v3993_v10 = vrot.slane %v3782_v57, 5  ;;  %v3989_v48 = vsel %vm3790_vm5, %v9116_v45, %v3988_v0 }
 0x3d5   : > { %v3722_v5 = vsel %vm1013_vm2, %v3720_v39, %v3721_v42  ;;  %v3998_v8 = vrot.slane %v3721_v42, 5  ;;  %v3784_v44 = vsel %vm1145_vm1, %v3782_v57, %v3783_v2  ;;  %v3785_v37 = vsel %vm1145_vm1, %v3783_v2, %v10157_v61 }
 0x3d6   : > { %v3723_v35 = vrot.slane %v3595_v31, 3  ;;  %v3562_v29 = vadd.f32 %v6366_v38, %v3401_v30  ;;  %4447 = vmatmul.mubr.bf16.gmra.mxu1 %v4151_v40  ;;  %v3786_v11 = vrot.slane %v3595_v31, 6  ;;  %v3991_v53 = vrot.slane %v3722_v5, 5 }
 0x3d7   : > { %v3994_v49 = vrot.slane %v3784_v44, 5  ;;  %v4000_v19 = vrot.slane %v3785_v37, 5  ;;  %v3997_v32 = vsel %vm3790_vm5, %v3988_v0, %v3996_v25  ;;  %v4002_v41 = vrot.slane %v3595_v31, 5  ;;  %v9400_v0 = vld [vmem:[%s10035_s8] ss:$0 sm:$0xff] }
 0x3d8   : > { %v3596_v17 = vmax.f32 %v3562_v29, 0.0  ;;  %v3992_v9 = vsel %vm3790_vm5, %v3990_v59, %v3991_v53  ;;  %v3999_v20 = vsel %vm3790_vm5, %v3991_v53, %v3998_v8  ;;  %v4007_v1 = vrot.slane %v3786_v11, 5 }
 0x3d9   : > { %v3995_v22 = vsel %vm3790_vm5, %v3993_v10, %v3994_v49  ;;  %v4001_v12 = vsel %vm3790_vm5, %v3994_v49, %v4000_v19  ;;  %v4155_v55 = vpack.c.bf16 %v3999_v20, %v3992_v9  ;;  %v4154_v4 = vpack.c.bf16 %v3997_v32, %v3989_v48 }
 0x3da   : > { %v3724_v56 = vrot.slane %v3596_v17, 3  ;;  %v3787_v38 = vrot.slane %v3596_v17, 6  ;;  %v4156_v34 = vpack.c.bf16 %v4001_v12, %v3995_v22  ;;  %v4004_v63 = vrot.slane %v3723_v35, 5 }
 0x3db   : > { %4454 = vmatprep.mubr.bf16.mxu1 %v4155_v55  ;;  %v4010_v50 = vrot.slane %v3596_v17, 5 }
 0x3dc   : > { %v3725_v54 = vsel %vm1013_vm2, %v3723_v35, %v3724_v56  ;;  %v4012_v27 = vrot.slane %v3724_v56, 5  ;;  %v3788_v7 = vsel %vm1145_vm1, %v3786_v11, %v3787_v38  ;;  %v3789_v13 = vsel %vm1145_vm1, %v3787_v38, %v10157_v61  ;;  %6411 = vmatprep.mubr.bf16.mxu0 %v4156_v34 }
 0x3dd   : > { %v4005_v28 = vrot.slane %v3725_v54, 5  ;;  %v4008_v47 = vrot.slane %v3788_v7, 5  ;;  %v4014_v23 = vrot.slane %v3789_v13, 5  ;;  %v4011_v39 = vsel %vm3790_vm5, %v4002_v41, %v4010_v50 }
 0x3de   : > { %4455 = vmatmul.mubr.bf16.gmra.mxu1 %v4154_v4  ;;  %v4003_v61 = vsel %vm3790_vm5, %v9116_v45, %v4002_v41 }
 0x3df   : > { %v4006_v21 = vsel %vm3790_vm5, %v4004_v63, %v4005_v28  ;;  %v4013_v43 = vsel %vm3790_vm5, %v4005_v28, %v4012_v27  ;;  %v4009_v26 = vsel %vm3790_vm5, %v4007_v1, %v4008_v47  ;;  %v4015_v62 = vsel %vm3790_vm5, %v4008_v47, %v4014_v23 }
 0x3e0   : > { %v4158_v58 = vpack.c.bf16 %v4013_v43, %v4006_v21  ;;  %v4159_v3 = vpack.c.bf16 %v4015_v62, %v4009_v26  ;;  %v4157_v14 = vpack.c.bf16 %v4011_v39, %v4003_v61 }
 0x3e2   : > { %4462 = vmatprep.mubr.bf16.mxu1 %v4158_v58  ;;  %6412 = vmatmul.mubr.bf16.gmra.mxu0 %v4159_v3 }
 0x3e6   : > { %4463 = vmatmul.mubr.bf16.gmra.mxu1 %v4157_v14 }
 0x40d   : > { %v6103_v24 = vpop.f32.mrf.mxu1 }
 0x40f   : > { %v6104_v52 = vpop.f32.mrf.mxu1 }
 0x410   : > { %v6105_v57 = vadd.f32 %v6104_v52, %v6103_v24 }
 0x411   : > { %v6106_v15 = vpop.f32.mrf.mxu1 }
 0x412   : > { %v4345_v46 = vadd.f32 %v6105_v57, %v9400_v0 }
 0x413   : > { %v6107_v16 = vpop.f32.mrf.mxu1 }
 0x414   : > { %v6108_v18 = vadd.f32 %v6107_v16, %v6106_v15 }
 0x416   : > { %v4348_v25 = vadd.f32 %v6108_v18, %v9400_v0 }
 0x41a   : > { %v6385_v36 = vpop.f32.mrf.mxu0 }
 0x41b   : > { %v6109_v51 = vpop.f32.mrf.mxu1 }
 0x41c   : > { %v4505_v60 = vpop.f32.mrf.mxu0 }
 0x41d   : > { %v6110_v42 = vpop.f32.mrf.mxu1  ;;  %v4506_v33 = vadd.f32 %v4505_v60, %v4345_v46 }
 0x41e   : > { %v6111_v45 = vadd.f32 %v6110_v42, %v6109_v51  ;;  %v6386_v2 = vpop.f32.mrf.mxu0 }
 0x41f   : > { %v6112_v6 = vpop.f32.mrf.mxu1  ;;  %v4632_v44 = vmax.f32 %v4506_v33, 0.0 }
 0x420   : > { %v4353_v31 = vadd.f32 %v6111_v45, %v9400_v0  ;;  %v4508_v30 = vpop.f32.mrf.mxu0 }
 0x421   : > { %v4509_v40 = vadd.f32 %v4508_v30, %v4348_v25  ;;  %v6113_v5 = vpop.f32.mrf.mxu1 }
 0x422   : > { %v6114_v8 = vadd.f32 %v6113_v5, %v6112_v6  ;;  %v4514_v35 = vadd.f32 %v6385_v36, %v4353_v31 }
 0x423   : > { %v4633_v37 = vmax.f32 %v4509_v40, 0.0 }
 0x424   : > { %v4356_v29 = vadd.f32 %v6114_v8, %v9400_v0  ;;  %v4634_v49 = vmax.f32 %v4514_v35, 0.0 }
 0x425   : > { %v4664_v59 = vadd.f32 %v4633_v37, %v4632_v44 }
 0x426   : > { %v4517_v10 = vadd.f32 %v6386_v2, %v4356_v29 }
 0x427   : > { %v4665_v11 = vrot.slane %v4664_v59, 4  ;;  %v6115_v53 = vpop.f32.mrf.mxu1 }
 0x428   : > { %v4635_v19 = vmax.f32 %v4517_v10, 0.0 }
 0x429   : > { %v4666_v17 = vadd.f32 %v4665_v11, %v4664_v59  ;;  %v6116_v32 = vpop.f32.mrf.mxu1 }
 0x42a   : > { %v4671_v9 = vadd.f32 %v4635_v19, %v4634_v49  ;;  %v6117_v20 = vadd.f32 %v6116_v32, %v6115_v53 }
 0x42b   : > { %v4667_v22 = vrot.slane %v4666_v17, 2  ;;  %v6118_v12 = vpop.f32.mrf.mxu1 }
 0x42c   : > { %v4672_v56 = vrot.slane %v4671_v9, 4  ;;  %v4361_v41 = vadd.f32 %v6117_v20, %v9400_v0 }
 0x42d   : > { %v4668_v38 = vadd.f32 %v4667_v22, %v4666_v17  ;;  %v6119_v55 = vpop.f32.mrf.mxu1 }
 0x42e   : > { %v4673_v48 = vadd.f32 %v4672_v56, %v4671_v9  ;;  %v6120_v1 = vadd.f32 %v6119_v55, %v6118_v12 }
 0x42f   : > { %v4669_v34 = vrot.slane %v4668_v38, 1 }
 0x430   : > { %v4674_v4 = vrot.slane %v4673_v48, 2  ;;  %v4364_v57 = vadd.f32 %v6120_v1, %v9400_v0 }
 0x431   : > { %v4670_v63 = vadd.f32 %v4669_v34, %v4668_v38 }
 0x432   : > { %v4675_v54 = vadd.f32 %v4674_v4, %v4673_v48 }
 0x433   : > { %v4777_v27 = vmul.f32 0.0625, %v4670_v63 }
 0x434   : > { %v4676_v7 = vrot.slane %v4675_v54, 1  ;;  %v6389_v13 = vpop.f32.mrf.mxu0  ;;  %v6121_v50 = vpop.f32.mrf.mxu1 }
 0x435   : > { %v4793_v28 = vsub.f32 %v4632_v44, %v4777_v27  ;;  %v4794_v47 = vsub.f32 %v4633_v37, %v4777_v27 }
 0x436   : > { %v4677_v23 = vadd.f32 %v4676_v7, %v4675_v54  ;;  %v4521_v21 = vpop.f32.mrf.mxu0  ;;  %v6122_v43 = vpop.f32.mrf.mxu1 }
 0x437   : > { %v4825_v26 = vmul.f32 %v4793_v28, %v4793_v28  ;;  %v4826_v62 = vmul.f32 %v4794_v47, %v4794_v47  ;;  %v6123_v58 = vadd.f32 %v6122_v43, %v6121_v50  ;;  %v9407_v39 = vadd.f32 %v4521_v21, %v4361_v41 }
 0x438   : > { %v4778_v3 = vmul.f32 0.0625, %v4677_v23  ;;  %v6390_v61 = vpop.f32.mrf.mxu0  ;;  %v6124_v14 = vpop.f32.mrf.mxu1 }
 0x439   : > { %v4857_v24 = vadd.f32 %v4826_v62, %v4825_v26  ;;  %v4369_v52 = vadd.f32 %v6123_v58, %v9400_v0  ;;  %v4636_v33 = vmax.f32 %v9407_v39, 0.0 }
 0x43a   : > { %v4795_v15 = vsub.f32 %v4634_v49, %v4778_v3  ;;  %v4796_v16 = vsub.f32 %v4635_v19, %v4778_v3  ;;  %v4524_v18 = vpop.f32.mrf.mxu0  ;;  %v5130_v36 = vsel %vm5129_vm6, %v4778_v3, %v4777_v27  ;;  %v6125_v51 = vpop.f32.mrf.mxu1 }
 0x43b   : > { %v4858_v60 = vrot.slane %v4857_v24, 4  ;;  %v4525_v46 = vadd.f32 %v4524_v18, %v4364_v57  ;;  %v6126_v42 = vadd.f32 %v6125_v51, %v6124_v14  ;;  %v9413_v25 = vadd.f32 %v6389_v13, %v4369_v52 }
 0x43c   : > { %v4827_v45 = vmul.f32 %v4795_v15, %v4795_v15  ;;  %v4828_v2 = vmul.f32 %v4796_v16, %v4796_v16 }
 0x43d   : > { %v4859_v6 = vadd.f32 %v4858_v60, %v4857_v24  ;;  %v4637_v31 = vmax.f32 %v4525_v46, 0.0  ;;  %v4372_v30 = vadd.f32 %v6126_v42, %v9400_v0  ;;  %v4638_v29 = vmax.f32 %v9413_v25, 0.0 }
 0x43e   : > { %v4864_v40 = vadd.f32 %v4828_v2, %v4827_v45 }
 0x43f   : > { %v4860_v5 = vrot.slane %v4859_v6, 2  ;;  %v4678_v8 = vadd.f32 %v4637_v31, %v4636_v33  ;;  %v4533_v44 = vadd.f32 %v6390_v61, %v4372_v30 }
 0x440   : > { %v4865_v37 = vrot.slane %v4864_v40, 4 }
 0x441   : > { %v4861_v35 = vadd.f32 %v4860_v5, %v4859_v6  ;;  %v4679_v59 = vrot.slane %v4678_v8, 4  ;;  %v4639_v10 = vmax.f32 %v4533_v44, 0.0  ;;  %v6569_v44 = vld [vmem:[%s10036_s9 + $0x70] ss:$8 sps:$4 sm:$0xff]  }
 0x442   : > { %v4866_v53 = vadd.f32 %v4865_v37, %v4864_v40  ;;  %v6571_v37 = vld [vmem:[%s10036_s9 + $0x74] ss:$8 sps:$4 sm:$0xff]  }
 0x443   : > { %v6127_v11 = vpop.f32.mrf.mxu1  ;;  %v4862_v49 = vrot.slane %v4861_v35, 1  ;;  %v4680_v19 = vadd.f32 %v4679_v59, %v4678_v8  ;;  %v4685_v17 = vadd.f32 %v4639_v10, %v4638_v29  ;;  %5390 = vmatprep.subr.bf16.mxu0 %v6571_v37  ;;  %v6581_v37 = vld [vmem:[%s10036_s9 + $0x30] ss:$8 sps:$4 sm:$0xff]  }
 0x444   : > { %v4867_v9 = vrot.slane %v4866_v53, 2  ;;  %5391 = vmatpush1.bf16.msra.mxu0 %v6569_v44 }
 0x445   : > { %v6128_v32 = vpop.f32.mrf.mxu1  ;;  %v4863_v22 = vadd.f32 %v4862_v49, %v4861_v35  ;;  %v4681_v12 = vrot.slane %v4680_v19, 2  ;;  %v4686_v56 = vrot.slane %v4685_v17, 4 }
 0x446   : > { %v6129_v20 = vadd.f32 %v6128_v32, %v6127_v11  ;;  %v4868_v55 = vadd.f32 %v4867_v9, %v4866_v53  ;;  %v6574_v53 = vld [vmem:[%s10036_s9 + $0x64] ss:$8 sps:$4 sm:$0xff]   ;;  %v6572_v9 = vld [vmem:[%s10036_s9 + $0x60] ss:$8 sps:$4 sm:$0xff]  }
 0x447   : > { %v6130_v38 = vpop.f32.mrf.mxu1  ;;  %v4969_v48 = vmul.f32 0.0625, %v4863_v22  ;;  %v4682_v1 = vadd.f32 %v4681_v12, %v4680_v19  ;;  %v4687_v34 = vadd.f32 %v4686_v56, %v4685_v17  ;;  %5392 = vmatprep.subr.bf16.mxu0 %v6574_v53  ;;  %v6577_v12 = vld [vmem:[%s10036_s9 + $0x54] ss:$8 sps:$4 sm:$0xff]  }
 0x448   : > { %v4869_v63 = vrot.slane %v4868_v55, 1  ;;  %v4377_v52 = vadd.f32 %v6129_v20, %v9400_v0  ;;  %5393 = vmatpush1.bf16.msra.mxu0 %v6572_v9 }
 0x449   : > { %v6131_v4 = vpop.f32.mrf.mxu1  ;;  %v9417_v27 = vadd.f32 1e-06, %v4969_v48  ;;  %v4683_v7 = vrot.slane %v4682_v1, 1  ;;  %v4688_v13 = vrot.slane %v4687_v34, 2  ;;  %5394 = vmatprep.subr.bf16.mxu0 %v6577_v12 }
 0x44a   : > { %v6132_v54 = vadd.f32 %v6131_v4, %v6130_v38  ;;  %v4870_v50 = vadd.f32 %v4869_v63, %v4868_v55 }
 0x44b   : > { %v4684_v28 = vadd.f32 %v4683_v7, %v4682_v1  ;;  %v4689_v47 = vadd.f32 %v4688_v13, %v4687_v34  ;;  %6617 = vrsqrt.f32 %v9417_v27  ;;  %vm5003_vm9 = vcmp.eq.f32.partialorder %v9417_v27, inf }
 0x44c   : > { %v4970_v23 = vmul.f32 0.0625, %v4870_v50  ;;  %vm5005_vm12 = vcmp.eq.f32.partialorder %v9417_v27, 0.0 }
 0x44d   : > { %v4779_v41 = vmul.f32 0.0625, %v4684_v28  ;;  %v4690_v21 = vrot.slane %v4689_v47, 1  ;;  %v6580_v28 = vld [vmem:[%s10036_s9 + $0x44] ss:$8 sps:$4 sm:$0xff]  }
 0x44e   : > { %v9420_v62 = vadd.f32 1e-06, %v4970_v23 }
 0x44f   : > { %v4797_v58 = vsub.f32 %v4636_v33, %v4779_v41  ;;  %v4798_v3 = vsub.f32 %v4637_v31, %v4779_v41  ;;  %v5132_v39 = vsel %vm5131_vm7, %v4779_v41, %v5130_v36  ;;  %v4691_v61 = vadd.f32 %v4690_v21, %v4689_v47 }
 0x450   : > { %v6133_v26 = vpop.f32.mrf.mxu1  ;;  %6619 = vrsqrt.f32 %v9420_v62  ;;  %v4380_v36 = vadd.f32 %v6132_v54, %v9400_v0  ;;  %v6575_v54 = vld [vmem:[%s10036_s9 + $0x50] ss:$8 sps:$4 sm:$0xff]   ;;  %vm5010_vm10 = vcmp.eq.f32.partialorder %v9420_v62, inf  ;;  %vm5012_vm11 = vcmp.eq.f32.partialorder %v9420_v62, 0.0 }
 0x451   : > { %v6393_v43 = vpop.f32.mrf.mxu0  ;;  %v4829_v15 = vmul.f32 %v4797_v58, %v4797_v58  ;;  %v4830_v16 = vmul.f32 %v4798_v3, %v4798_v3  ;;  %v4780_v18 = vmul.f32 0.0625, %v4691_v61  ;;  %v5013_v58 = vand.u32 2147483648, %v9420_v62  ;;  %5395 = vmatpush1.bf16.msra.mxu0 %v6575_v54 }
 0x452   : > { %v6134_v24 = vpop.f32.mrf.mxu1  ;;  %5396 = vmatprep.subr.bf16.mxu0 %v6580_v28 }
 0x453   : > { %v4537_v14 = vpop.f32.mrf.mxu0  ;;  %v6135_v57 = vadd.f32 %v6134_v24, %v6133_v26  ;;  %v4871_v45 = vadd.f32 %v4830_v16, %v4829_v15  ;;  %v4799_v2 = vsub.f32 %v4638_v29, %v4780_v18  ;;  %v4800_v33 = vsub.f32 %v4639_v10, %v4780_v18  ;;  %v6583_v16 = vld [vmem:[%s10036_s9 + $0x34] ss:$8 sps:$4 sm:$0xff]  }
 0x454   : > { %v6136_v60 = vpop.f32.mrf.mxu1  ;;  %v9425_v46 = vadd.f32 %v4537_v14, %v4377_v52  ;;  %v9430_v25 = vsel %vm5133_vm8, %v4780_v18, %v5132_v39  ;;  %v6578_v14 = vld [vmem:[%s10036_s9 + $0x40] ss:$8 sps:$4 sm:$0xff]   ;;  %v5006_v18 = vand.u32 2147483648, %v9417_v27 }
 0x455   : > { %v6394_v51 = vpop.f32.mrf.mxu0  ;;  %v4385_v42 = vadd.f32 %v6135_v57, %v9400_v0  ;;  %v4831_v5 = vmul.f32 %v4799_v2, %v4799_v2  ;;  %v4832_v8 = vmul.f32 %v4800_v33, %v4800_v33  ;;  %v4872_v56 = vrot.slane %v4871_v45, 4  ;;  %5397 = vmatpush1.bf16.msra.mxu0 %v6578_v14 }
 0x456   : > { %v6137_v31 = vpop.f32.mrf.mxu1  ;;  %v4640_v35 = vmax.f32 %v9425_v46, 0.0  ;;  %5398 = vmatprep.subr.bf16.mxu0 %v6583_v16  ;;  %v6589_v46 = vld [vmem:[%s10036_s9 + $0x14] ss:$8 sps:$4 sm:$0xff]  }
 0x457   : > { %v4540_v6 = vpop.f32.mrf.mxu0  ;;  %v6138_v40 = vadd.f32 %v6137_v31, %v6136_v60  ;;  %v9441_v29 = vadd.f32 %v6393_v43, %v4385_v42  ;;  %v9448_v49 = vadd.f32 %v4832_v8, %v4831_v5  ;;  %v4873_v47 = vadd.f32 %v4872_v56, %v4871_v45 }
 0x458   : > { %v9432_v30 = vadd.f32 %v4540_v6, %v4380_v36  ;;  %v6618_v20 = vpop.eup %6617 }
 0x459   : > { %v4388_v10 = vadd.f32 %v6138_v40, %v9400_v0  ;;  %v4642_v38 = vmax.f32 %v9441_v29, 0.0  ;;  %v5002_v7 = vmul.f32 %v6618_v20, %v9417_v27  ;;  %v4874_v60 = vrot.slane %v4873_v47, 2  ;;  %5399 = vmatpush1.bf16.msra.mxu0 %v6581_v37  ;;  %v6592_v29 = vld [vmem:[%s10036_s9 + $0x4] ss:$8 sps:$4 sm:$0xff]  }
 0x45a   : > { %v4641_v59 = vmax.f32 %v9432_v30, 0.0  ;;  %v4879_v2 = vrot.slane %v9448_v49, 4 }
 0x45b   : > { %v9454_v17 = vadd.f32 %v6394_v51, %v4388_v10  ;;  %v5004_v24 = vsel %vm5003_vm9, %v9417_v27, %v5002_v7  ;;  %vm5139_vm9 = vcmask 1046534  }
 0x45c   : > { %v6139_v11 = vpop.f32.mrf.mxu1  ;;  %v4692_v19 = vadd.f32 %v4641_v59, %v4640_v35  ;;  %v5007_v31 = vsel %vm5005_vm12, %v5006_v18, %v5004_v24  ;;  %v4880_v12 = vadd.f32 %v4879_v2, %v9448_v49  ;;  %v6584_v49 = vld [vmem:[%s10036_s9 + $0x20] ss:$8 sps:$4 sm:$0xff]  }
 0x45d   : > { %v4643_v48 = vmax.f32 %v9454_v17, 0.0  ;;  %v6620_v13 = vpop.eup %6619 }
 0x45e   : > { %v6140_v32 = vpop.f32.mrf.mxu1  ;;  %v4693_v55 = vrot.slane %v4692_v19, 4  ;;  %v5009_v43 = vmul.f32 %v6620_v13, %v9420_v62 }
 0x45f   : > { %v6141_v22 = vadd.f32 %v6140_v32, %v6139_v11  ;;  %v4699_v4 = vadd.f32 %v4643_v48, %v4642_v38 }
 0x460   : > { %v6142_v1 = vpop.f32.mrf.mxu1  ;;  %v4694_v34 = vadd.f32 %v4693_v55, %v4692_v19  ;;  %v5011_v52 = vsel %vm5010_vm10, %v9420_v62, %v5009_v43  ;;  %v6586_v19 = vld [vmem:[%s10036_s9 + $0x24] ss:$8 sps:$4 sm:$0xff]   ;;  %vm5141_vm10 = vcmask 1047559  }
 0x461   : > { %v4700_v41 = vrot.slane %v4699_v4, 4  ;;  %v5014_v51 = vsel %vm5012_vm11, %v5013_v58, %v5011_v52  ;;  %v4393_v62 = vadd.f32 %v6141_v22, %v9400_v0  ;;  %v4875_v22 = vadd.f32 %v4874_v60, %v4873_v47  ;;  %5400 = vmatprep.subr.bf16.mxu0 %v6586_v19 }
 0x462   : > { %v6143_v63 = vpop.f32.mrf.mxu1  ;;  %v4695_v23 = vrot.slane %v4694_v34, 2  ;;  %v9498_v27 = vsel %vm5129_vm6, %v5014_v51, %v5007_v31  ;;  %5401 = vmatpush1.bf16.msra.mxu0 %v6584_v49 }
 0x463   : > { %v6144_v50 = vadd.f32 %v6143_v63, %v6142_v1  ;;  %v4701_v39 = vadd.f32 %v4700_v41, %v4699_v4  ;;  %v4876_v28 = vrot.slane %v4875_v22, 1  ;;  %5402 = vmatprep.subr.bf16.mxu0 %v6589_v46 }
 0x464   : > { %v6145_v21 = vpop.f32.mrf.mxu1  ;;  %v4696_v3 = vadd.f32 %v4695_v23, %v4694_v34 }
 0x465   : > { %v6397_v26 = vpop.f32.mrf.mxu0  ;;  %v4702_v36 = vrot.slane %v4701_v39, 2  ;;  %v4396_v8 = vadd.f32 %v6144_v50, %v9400_v0  ;;  %v4877_v18 = vadd.f32 %v4876_v28, %v4875_v22  ;;  %v6593_v22 = vld [vmem:[%s10036_s9 + $0xf0] ss:$8 sps:$4 sm:$0xff]  }
 0x466   : > { %v6146_v61 = vpop.f32.mrf.mxu1  ;;  %v4697_v42 = vrot.slane %v4696_v3, 1 }
 0x467   : > { %v4553_v57 = vpop.f32.mrf.mxu0  ;;  %v6147_v15 = vadd.f32 %v6146_v61, %v6145_v21  ;;  %v4703_v5 = vadd.f32 %v4702_v36, %v4701_v39  ;;  %v4881_v21 = vrot.slane %v4880_v12, 2  ;;  %v6587_v39 = vld [vmem:[%s10036_s9 + $0x10] ss:$8 sps:$4 sm:$0xff]  }
 0x468   : > { %v6148_v45 = vpop.f32.mrf.mxu1  ;;  %v4698_v40 = vadd.f32 %v4697_v42, %v4696_v3  ;;  %v9500_v10 = vadd.f32 %v4553_v57, %v4393_v62  ;;  %5403 = vmatpush1.bf16.msra.mxu0 %v6587_v39  ;;  %v6601_v39 = vld [vmem:[%s10036_s9 + $0xd4] ss:$8 sps:$4 sm:$0xff]  }
 0x469   : > { %v4401_v33 = vadd.f32 %v6147_v15, %v9400_v0  ;;  %v6398_v6 = vpop.f32.mrf.mxu0  ;;  %v4704_v9 = vrot.slane %v4703_v5, 1  ;;  %v4882_v51 = vadd.f32 %v4881_v21, %v4880_v12  ;;  %5404 = vmatprep.subr.bf16.mxu0 %v6592_v29  ;;  %v6596_v21 = vld [vmem:[%s10036_s9 + $0xe0] ss:$8 sps:$4 sm:$0xff]  }
 0x46a   : > { %v6149_v44 = vpop.f32.mrf.mxu1  ;;  %v4781_v32 = vmul.f32 0.0625, %v4698_v40  ;;  %v4644_v7 = vmax.f32 %v9500_v10, 0.0 }
 0x46b   : > { %v4556_v11 = vpop.f32.mrf.mxu0  ;;  %v6150_v53 = vadd.f32 %v6149_v44, %v6148_v45  ;;  %v9508_v56 = vadd.f32 %v6397_v26, %v4401_v33  ;;  %v4705_v63 = vadd.f32 %v4704_v9, %v4703_v5  ;;  %v6590_v45 = vld [vmem:[%s10036_s9] ss:$8 sps:$4 sm:$0xff]  }
 0x46c   : > { %v9505_v20 = vadd.f32 %v4556_v11, %v4396_v8  ;;  %v4801_v1 = vsub.f32 %v4640_v35, %v4781_v32  ;;  %v4802_v34 = vsub.f32 %v4641_v59, %v4781_v32  ;;  %v5136_v4 = vsel %vm5135_vm13, %v4781_v32, %v9430_v25  ;;  %5405 = vmatpush1.bf16.msra.mxu0 %v6590_v45 }
 0x46d   : > { %v4404_v55 = vadd.f32 %v6150_v53, %v9400_v0  ;;  %v4782_v35 = vmul.f32 0.0625, %v4705_v63  ;;  %v4646_v47 = vmax.f32 %v9508_v56, 0.0  ;;  %v4971_v11 = vmul.f32 0.0625, %v4877_v18  ;;  %v6599_v18 = vld [vmem:[%s10036_s9 + $0xd0] ss:$8 sps:$4 sm:$0xff]  }
 0x46e   : > { %v6151_v54 = vpop.f32.mrf.mxu1  ;;  %v4645_v13 = vmax.f32 %v9505_v20, 0.0  ;;  %v4833_v30 = vmul.f32 %v4801_v1, %v4801_v1  ;;  %v4834_v25 = vmul.f32 %v4802_v34, %v4802_v34  ;;  %v4883_v53 = vrot.slane %v4882_v51, 1  ;;  %v6598_v34 = vld [vmem:[%s10036_s9 + $0xe4] ss:$8 sps:$4 sm:$0xff]  }
 0x46f   : > { %v9522_v50 = vadd.f32 %v6398_v6, %v4404_v55  ;;  %v4803_v26 = vsub.f32 %v4642_v38, %v4782_v35  ;;  %v4804_v58 = vsub.f32 %v4643_v48, %v4782_v35  ;;  %v9550_v17 = vsel %vm5137_vm14, %v4782_v35, %v5136_v4  ;;  %v6595_v6 = vld [vmem:[%s10036_s9 + $0xf4] ss:$8 sps:$4 sm:$0xff]  }
 0x470   : > { %v6152_v59 = vpop.f32.mrf.mxu1  ;;  %v4706_v23 = vadd.f32 %v4645_v13, %v4644_v7  ;;  %v9533_v43 = vadd.f32 %v4834_v25, %v4833_v30  ;;  %5406 = vmatprep.subr.bf16.mxu0 %v6595_v6  ;;  %v9573_v25 = vadd.f32 1e-06, %v4971_v11  ;;  %v4884_v35 = vadd.f32 %v4883_v53, %v4882_v51  ;;  %v6604_v51 = vld [vmem:[%s10036_s9 + $0xc4] ss:$8 sps:$4 sm:$0xff]   ;;  %v6607_v53 = vld [vmem:[%s10036_s9 + $0xb4] ss:$8 sps:$4 sm:$0xff]  }
 0x471   : > { %v4647_v41 = vmax.f32 %v9522_v50, 0.0  ;;  %v4835_v38 = vmul.f32 %v4803_v26, %v4803_v26  ;;  %v4836_v48 = vmul.f32 %v4804_v58, %v4804_v58  ;;  %v6153_v24 = vadd.f32 %v6152_v59, %v6151_v54  ;;  %5407 = vmatpush2.bf16.msra.mxu0 %v6593_v22 }
 0x472   : > { %v6154_v3 = vpop.f32.mrf.mxu1  ;;  %v4707_v61 = vrot.slane %v4706_v23, 4  ;;  %5408 = vmatprep.subr.bf16.mxu0 %v6598_v34  ;;  %6621 = vrsqrt.f32 %v9573_v25  ;;  %vm5017_vm15 = vcmp.eq.f32.partialorder %v9573_v25, inf  ;;  %vm5019_vm1 = vcmp.eq.f32.partialorder %v9573_v25, 0.0 }
 0x473   : > { %v4713_v14 = vadd.f32 %v4647_v41, %v4646_v47  ;;  %v9552_v60 = vadd.f32 %v4836_v48, %v4835_v38  ;;  %v4409_v31 = vadd.f32 %v6153_v24, %v9400_v0 }
 0x474   : > { %v6155_v52 = vpop.f32.mrf.mxu1  ;;  %v4708_v57 = vadd.f32 %v4707_v61, %v4706_v23 }
 0x475   : > { %v4714_v15 = vrot.slane %v4713_v14, 4  ;;  %v6401_v16 = vpop.f32.mrf.mxu0  ;;  %v6156_v42 = vadd.f32 %v6155_v52, %v6154_v3  ;;  %5409 = vmatpush2.bf16.msra.mxu0 %v6596_v21 }
 0x476   : > { %v6157_v36 = vpop.f32.mrf.mxu1  ;;  %v4709_v2 = vrot.slane %v4708_v57, 2  ;;  %5410 = vmatprep.subr.bf16.mxu0 %v6601_v39 }
 0x477   : > { %v4715_v62 = vadd.f32 %v4714_v15, %v4713_v14  ;;  %v4569_v33 = vpop.f32.mrf.mxu0  ;;  %v4412_v9 = vadd.f32 %v6156_v42, %v9400_v0  ;;  %v4886_v42 = vrot.slane %v9533_v43, 4 }
 0x478   : > { %v6158_v40 = vpop.f32.mrf.mxu1  ;;  %v4710_v5 = vadd.f32 %v4709_v2, %v4708_v57  ;;  %v9561_v19 = vadd.f32 %v4569_v33, %v4409_v31  ;;  %v4972_v57 = vmul.f32 0.0625, %v4884_v35 }
 0x479   : > { %v4716_v8 = vrot.slane %v4715_v62, 2  ;;  %v6159_v44 = vadd.f32 %v6158_v40, %v6157_v36  ;;  %v6402_v37 = vpop.f32.mrf.mxu0  ;;  %5411 = vmatpush2.bf16.msra.mxu0 %v6599_v18 }
 0x47a   : > { %v6160_v32 = vpop.f32.mrf.mxu1  ;;  %v4711_v12 = vrot.slane %v4710_v5, 1  ;;  %v4648_v59 = vmax.f32 %v9561_v19, 0.0  ;;  %v9620_v50 = vadd.f32 1e-06, %v4972_v57  ;;  %5412 = vmatprep.subr.bf16.mxu0 %v6604_v51 }
 0x47b   : > { %v4717_v55 = vadd.f32 %v4716_v8, %v4715_v62  ;;  %v4572_v1 = vpop.f32.mrf.mxu0  ;;  %v4417_v4 = vadd.f32 %v6159_v44, %v9400_v0  ;;  %v6602_v44 = vld [vmem:[%s10036_s9 + $0xc0] ss:$8 sps:$4 sm:$0xff]  }
 0x47c   : > { %v9571_v63 = vadd.f32 %v4572_v1, %v4412_v9  ;;  %v6161_v54 = vpop.f32.mrf.mxu1  ;;  %v4712_v49 = vadd.f32 %v4711_v12, %v4710_v5  ;;  %6623 = vrsqrt.f32 %v9620_v50  ;;  %vm5024_vm0 = vcmp.eq.f32.partialorder %v9620_v50, inf }
 0x47d   : > { %v4718_v46 = vrot.slane %v4717_v55, 1  ;;  %v6162_v30 = vadd.f32 %v6161_v54, %v6160_v32  ;;  %v9586_v61 = vadd.f32 %v6401_v16, %v4417_v4  ;;  %v4887_v32 = vadd.f32 %v4886_v42, %v9533_v43  ;;  %5413 = vmatpush2.bf16.msra.mxu0 %v6602_v44 }
 0x47e   : > { %v4649_v28 = vmax.f32 %v9571_v63, 0.0  ;;  %v6163_v23 = vpop.f32.mrf.mxu1  ;;  %v9580_v26 = vmul.f32 0.0625, %v4712_v49  ;;  %5414 = vmatprep.subr.bf16.mxu0 %v6607_v53  ;;  %v6616_v53 = vld [vmem:[%s10036_s9 + $0x84] ss:$8 sps:$4 sm:$0xff]   ;;  %vm5026_vm2 = vcmp.eq.f32.partialorder %v9620_v50, 0.0 }
 0x47f   : > { %v4719_v58 = vadd.f32 %v4718_v46, %v4717_v55  ;;  %v4420_v3 = vadd.f32 %v6162_v30, %v9400_v0  ;;  %v4650_v36 = vmax.f32 %v9586_v61, 0.0  ;;  %v6605_v30 = vld [vmem:[%s10036_s9 + $0xb0] ss:$8 sps:$4 sm:$0xff]   ;;  %v4888_v21 = vrot.slane %v4887_v32, 2  ;;  %v6622_v18 = vpop.eup %6621 }
 0x480   : > { %v4720_v14 = vadd.f32 %v4649_v28, %v4648_v59  ;;  %v6164_v29 = vpop.f32.mrf.mxu1  ;;  %v4805_v38 = vsub.f32 %v4644_v7, %v9580_v26  ;;  %v4806_v48 = vsub.f32 %v4645_v13, %v9580_v26  ;;  %v5016_v44 = vmul.f32 %v6622_v18, %v9573_v25 }
 0x481   : > { %v9598_v24 = vmul.f32 0.0625, %v4719_v58  ;;  %v9600_v52 = vadd.f32 %v6402_v37, %v4420_v3  ;;  %v6165_v6 = vadd.f32 %v6164_v29, %v6163_v23  ;;  %v6610_v23 = vld [vmem:[%s10036_s9 + $0xa4] ss:$8 sps:$4 sm:$0xff]   ;;  %5415 = vmatpush2.bf16.msra.mxu0 %v6605_v30  ;;  %v4889_v51 = vadd.f32 %v4888_v21, %v4887_v32 }
 0x482   : > { %v4721_v15 = vrot.slane %v4720_v14, 4  ;;  %v6166_v16 = vpop.f32.mrf.mxu1  ;;  %v4837_v10 = vmul.f32 %v4805_v38, %v4805_v38  ;;  %v4838_v7 = vmul.f32 %v4806_v48, %v4806_v48  ;;  %5416 = vmatprep.subr.bf16.mxu0 %v6610_v23  ;;  %v9689_v23 = vsel %vm5017_vm15, %v9573_v25, %v5016_v44 }
 0x483   : > { %v4807_v20 = vsub.f32 %v4646_v47, %v9598_v24  ;;  %v4808_v13 = vsub.f32 %v4647_v41, %v9598_v24  ;;  %v4651_v2 = vmax.f32 %v9600_v52, 0.0  ;;  %v4893_v41 = vrot.slane %v9552_v60, 4 }
 0x484   : > { %v4722_v45 = vadd.f32 %v4721_v15, %v4720_v14  ;;  %v6167_v62 = vpop.f32.mrf.mxu1  ;;  %v9618_v33 = vadd.f32 %v4838_v7, %v4837_v10  ;;  %v4425_v1 = vadd.f32 %v6165_v6, %v9400_v0  ;;  %v4890_v32 = vrot.slane %v4889_v51, 1 }
 0x485   : > { %v4839_v56 = vmul.f32 %v4807_v20, %v4807_v20  ;;  %v4840_v47 = vmul.f32 %v4808_v13, %v4808_v13  ;;  %v4727_v40 = vadd.f32 %v4651_v2, %v4650_v36  ;;  %v6168_v11 = vadd.f32 %v6167_v62, %v6166_v16  ;;  %v6608_v16 = vld [vmem:[%s10036_s9 + $0xa0] ss:$8 sps:$4 sm:$0xff]   ;;  %v6613_v13 = vld [vmem:[%s10036_s9 + $0x94] ss:$8 sps:$4 sm:$0xff]  }
 0x486   : > { %v4723_v31 = vrot.slane %v4722_v45, 2  ;;  %v6405_v5 = vpop.f32.mrf.mxu0  ;;  %v6169_v8 = vpop.f32.mrf.mxu1  ;;  %v4894_v4 = vadd.f32 %v4893_v41, %v9552_v60  ;;  %v4900_v10 = vrot.slane %v9618_v33, 4  ;;  %5417 = vmatpush2.bf16.msra.mxu0 %v6608_v16  ;;  %v5027_v21 = vand.u32 2147483648, %v9620_v50 }
 0x487   : > { %v9630_v37 = vadd.f32 %v4840_v47, %v4839_v56  ;;  %v4728_v22 = vrot.slane %v4727_v40, 4  ;;  %v4428_v35 = vadd.f32 %v6168_v11, %v9400_v0  ;;  %5418 = vmatprep.subr.bf16.mxu0 %v6613_v13 }
 0x488   : > { %v4724_v9 = vadd.f32 %v4723_v31, %v4722_v45  ;;  %v4585_v12 = vpop.f32.mrf.mxu0  ;;  %v6170_v55 = vpop.f32.mrf.mxu1  ;;  %v4895_v38 = vrot.slane %v4894_v4, 2  ;;  %v4901_v11 = vadd.f32 %v4900_v10, %v9618_v33 }
 0x489   : > { %v6171_v34 = vadd.f32 %v6170_v55, %v6169_v8  ;;  %v4729_v54 = vadd.f32 %v4728_v22, %v4727_v40  ;;  %v9642_v43 = vadd.f32 %v4585_v12, %v4425_v1  ;;  %v6611_v8 = vld [vmem:[%s10036_s9 + $0x90] ss:$8 sps:$4 sm:$0xff]  }
 0x48a   : > { %v6406_v49 = vpop.f32.mrf.mxu0  ;;  %v6172_v46 = vpop.f32.mrf.mxu1  ;;  %v4725_v58 = vrot.slane %v4724_v9, 1  ;;  %v4896_v41 = vadd.f32 %v4895_v38, %v4894_v4  ;;  %5419 = vmatpush2.bf16.msra.mxu0 %v6611_v8 }
 0x48b   : > { %v4730_v60 = vrot.slane %v4729_v54, 2  ;;  %v4433_v14 = vadd.f32 %v6171_v34, %v9400_v0  ;;  %v4652_v7 = vmax.f32 %v9642_v43, 0.0  ;;  %5420 = vmatprep.subr.bf16.mxu0 %v6616_v53 }
 0x48c   : > { %v4588_v3 = vpop.f32.mrf.mxu0  ;;  %v6173_v39 = vpop.f32.mrf.mxu1  ;;  %v4726_v42 = vadd.f32 %v4725_v58, %v4724_v9 }
 0x48d   : > { %v9649_v29 = vadd.f32 %v4588_v3, %v4428_v35  ;;  %v4731_v48 = vadd.f32 %v4730_v60, %v4729_v54  ;;  %v6174_v57 = vadd.f32 %v6173_v39, %v6172_v46  ;;  %v9661_v47 = vadd.f32 %v6405_v5, %v4433_v14  ;;  %v6614_v35 = vld [vmem:[%s10036_s9 + $0x80] ss:$8 sps:$4 sm:$0xff]   ;;  %v6624_v58 = vpop.eup %6623 }
 0x48e   : > { %v6175_v15 = vpop.f32.mrf.mxu1  ;;  %v9678_v9 = vmul.f32 0.0625, %v4726_v42  ;;  %v5020_v54 = vand.u32 2147483648, %v9573_v25  ;;  %v4902_v60 = vrot.slane %v4901_v11, 2  ;;  %v4907_v3 = vrot.slane %v9630_v37, 4  ;;  %5421 = vmatpush2.bf16.msra.mxu0 %v6614_v35 }
 0x48f   : > { %v4653_v20 = vmax.f32 %v9649_v29, 0.0  ;;  %v4436_v45 = vadd.f32 %v6174_v57, %v9400_v0  ;;  %v4732_v56 = vrot.slane %v4731_v48, 1  ;;  %v4654_v34 = vmax.f32 %v9661_v47, 0.0 }
 0x490   : > { %v6176_v62 = vpop.f32.mrf.mxu1  ;;  %v4809_v57 = vsub.f32 %v4648_v59, %v9678_v9  ;;  %v5023_v59 = vmul.f32 %v6624_v58, %v9620_v50  ;;  %v4903_v63 = vadd.f32 %v4902_v60, %v4901_v11 }
 0x491   : > { %v4734_v6 = vadd.f32 %v4653_v20, %v4652_v7  ;;  %v9667_v31 = vadd.f32 %v6406_v49, %v4436_v45  ;;  %v6177_v12 = vadd.f32 %v6176_v62, %v6175_v15  ;;  %v4733_v1 = vadd.f32 %v4732_v56, %v4731_v48 }
 0x492   : > { %v6178_v40 = vpop.f32.mrf.mxu1  ;;  %v4897_v49 = vrot.slane %v4896_v41, 1  ;;  %v4891_v48 = vadd.f32 %v4890_v32, %v4889_v51  ;;  %v4810_v15 = vsub.f32 %v4649_v28, %v9678_v9  ;;  %v4908_v28 = vadd.f32 %v4907_v3, %v9630_v37 }
 0x493   : > { %v4735_v5 = vrot.slane %v4734_v6, 4  ;;  %v4655_v22 = vmax.f32 %v9667_v31, 0.0  ;;  %v4441_v16 = vadd.f32 %v6177_v12, %v9400_v0  ;;  %v9705_v10 = vmul.f32 0.0625, %v4733_v1 }
 0x494   : > { %v6179_v55 = vpop.f32.mrf.mxu1  ;;  %v6409_v33 = vpop.f32.mrf.mxu0  ;;  %v4898_v56 = vadd.f32 %v4897_v49, %v4896_v41  ;;  %v4842_v53 = vmul.f32 %v4810_v15, %v4810_v15  ;;  %v4973_v11 = vmul.f32 0.0625, %v4891_v48  ;;  %v4909_v58 = vrot.slane %v4908_v28, 2 }
 0x495   : > { %v4736_v4 = vadd.f32 %v4735_v5, %v4734_v6  ;;  %v6180_v46 = vadd.f32 %v6179_v55, %v6178_v40  ;;  %v4741_v14 = vadd.f32 %v4655_v22, %v4654_v34  ;;  %v4841_v5 = vmul.f32 %v4809_v57, %v4809_v57 }
 0x496   : > { %v6181_v30 = vpop.f32.mrf.mxu1  ;;  %v4601_v38 = vpop.f32.mrf.mxu0  ;;  %v4811_v55 = vsub.f32 %v4650_v36, %v9705_v10  ;;  %v4812_v37 = vsub.f32 %v4651_v2, %v9705_v10  ;;  %v4904_v36 = vrot.slane %v4903_v63, 1 }
 0x497   : > { %v4737_v39 = vrot.slane %v4736_v4, 2  ;;  %v4742_v42 = vrot.slane %v4741_v14, 4  ;;  %v9707_v6 = vadd.f32 %v4601_v38, %v4441_v16  ;;  %v4444_v19 = vadd.f32 %v6180_v46, %v9400_v0 }
 0x498   : > { %v6182_v18 = vpop.f32.mrf.mxu1  ;;  %v6410_v62 = vpop.f32.mrf.mxu0  ;;  %v4974_v38 = vmul.f32 0.0625, %v4898_v56  ;;  %v4913_v48 = vadd.f32 %v4842_v53, %v4841_v5  ;;  %v4843_v57 = vmul.f32 %v4811_v55, %v4811_v55  ;;  %v4844_v16 = vmul.f32 %v4812_v37, %v4812_v37 }
 0x499   : > { %v4738_v13 = vadd.f32 %v4737_v39, %v4736_v4  ;;  %v6183_v45 = vadd.f32 %v6182_v18, %v6181_v30  ;;  %v4743_v8 = vadd.f32 %v4742_v42, %v4741_v14  ;;  %v4656_v46 = vmax.f32 %v9707_v6, 0.0 }
 0x49a   : > { %v6184_v51 = vpop.f32.mrf.mxu1  ;;  %v4604_v44 = vpop.f32.mrf.mxu0  ;;  %v9735_v14 = vsel %vm5024_vm0, %v9620_v50, %v5023_v59  ;;  %v4905_v59 = vadd.f32 %v4904_v36, %v4903_v63  ;;  %v4914_v5 = vrot.slane %v4913_v48, 4 }
 0x49b   : > { %v4739_v40 = vrot.slane %v4738_v13, 1  ;;  %v4449_v32 = vadd.f32 %v6183_v45, %v9400_v0  ;;  %v9713_v12 = vadd.f32 %v4604_v44, %v4444_v19  ;;  %v4744_v4 = vrot.slane %v4743_v8, 2 }
 0x49c   : > { %v6185_v41 = vpop.f32.mrf.mxu1  ;;  %v9744_v45 = vadd.f32 1e-06, %v4973_v11  ;;  %v9751_v44 = vadd.f32 1e-06, %v4974_v38  ;;  %v4975_v37 = vmul.f32 0.0625, %v4905_v59  ;;  %v4915_v47 = vadd.f32 %v4914_v5, %v4913_v48 }
 0x49d   : > { %v4740_v1 = vadd.f32 %v4739_v40, %v4738_v13  ;;  %v6186_v49 = vadd.f32 %v6185_v41, %v6184_v51  ;;  %v4657_v30 = vmax.f32 %v9713_v12, 0.0  ;;  %v4745_v3 = vadd.f32 %v4744_v4, %v4743_v8 }
 0x49e   : > { %v6187_v35 = vpop.f32.mrf.mxu1  ;;  %v9726_v39 = vadd.f32 %v6409_v33, %v4449_v32  ;;  %v4910_v51 = vadd.f32 %v4909_v58, %v4908_v28  ;;  %v4920_v28 = vadd.f32 %v4844_v16, %v4843_v57  ;;  %6625 = vrsqrt.f32 %v9744_v45 }
 0x49f   : > { %v9723_v60 = vmul.f32 0.0625, %v4740_v1  ;;  %v4452_v61 = vadd.f32 %v6186_v49, %v9400_v0  ;;  %v4748_v52 = vadd.f32 %v4657_v30, %v4656_v46  ;;  %v4746_v15 = vrot.slane %v4745_v3, 1 }
 0x4a0   : > { %v6188_v2 = vpop.f32.mrf.mxu1  ;;  %v4658_v40 = vmax.f32 %v9726_v39, 0.0  ;;  %v4921_v16 = vrot.slane %v4920_v28, 4  ;;  %6627 = vrsqrt.f32 %v9751_v44  ;;  %v4916_v5 = vrot.slane %v4915_v47, 2 }
 0x4a1   : > { %v4813_v0 = vsub.f32 %v4652_v7, %v9723_v60  ;;  %v4749_v33 = vrot.slane %v4748_v52, 4  ;;  %v9740_v18 = vadd.f32 %v6410_v62, %v4452_v61  ;;  %v4814_v56 = vsub.f32 %v4653_v20, %v9723_v60 }
 0x4a2   : > { %v6190_v13 = vpop.f32.mrf.mxu1  ;;  %v9742_v42 = vpop.f32.mrf.mxu0  ;;  %v4747_v19 = vadd.f32 %v4746_v15, %v4745_v3  ;;  %v6189_v32 = vadd.f32 %v6188_v2, %v6187_v35  ;;  %v4911_v35 = vrot.slane %v4910_v51, 1  ;;  %v6651_v2 = vld [vmem:[%s10035_s8] ss:$0 sm:$0xff]  ;;  %v4917_v6 = vadd.f32 %v4916_v5, %v4915_v47 }
 0x4a3   : > { %v4750_v8 = vadd.f32 %v4749_v33, %v4748_v52  ;;  %v4659_v43 = vmax.f32 %v9740_v18, 0.0  ;;  %v4845_v41 = vmul.f32 %v4813_v0, %v4813_v0  ;;  %v4846_v1 = vmul.f32 %v4814_v56, %v4814_v56 }
 0x4a4   : > { %v6191_v7 = vpop.f32.mrf.mxu1  ;;  %v4617_v62 = vpop.f32.mrf.mxu0  ;;  %v9753_v53 = vmul.f32 0.0625, %v4747_v19  ;;  %v4457_v38 = vadd.f32 %v6651_v2, %v6189_v32  ;;  %v4912_v32 = vadd.f32 %v4911_v35, %v4910_v51  ;;  %v9819_v18 = vsel %vm5019_vm1, %v5020_v54, %v9689_v23 }
 0x4a5   : > { %v4751_v55 = vrot.slane %v4750_v8, 2  ;;  %v4755_v29 = vadd.f32 %v4659_v43, %v4658_v40  ;;  %v6192_v11 = vadd.f32 %v6191_v7, %v6190_v13  ;;  %v4927_v0 = vadd.f32 %v4846_v1, %v4845_v41 }
 0x4a6   : > { %v6193_v20 = vpop.f32.mrf.mxu1  ;;  %v6414_v63 = vpop.f32.mrf.mxu0  ;;  %v4815_v4 = vsub.f32 %v4654_v34, %v9753_v53  ;;  %v4816_v49 = vsub.f32 %v4655_v22, %v9753_v53  ;;  %v9769_v33 = vadd.f32 %v4617_v62, %v4457_v38  ;;  %v9772_v7 = vadd.f32 1e-06, %v4975_v37 }
 0x4a7   : > { %v4752_v58 = vadd.f32 %v4751_v55, %v4750_v8  ;;  %v4756_v3 = vrot.slane %v4755_v29, 4  ;;  %v4460_v13 = vadd.f32 %v6651_v2, %v6192_v11  ;;  %v4922_v62 = vadd.f32 %v4921_v16, %v4920_v28 }
 0x4a8   : > { %v6194_v61 = vpop.f32.mrf.mxu1  ;;  %v4847_v36 = vmul.f32 %v4815_v4, %v4815_v4  ;;  %v4848_v52 = vmul.f32 %v4816_v49, %v4816_v49  ;;  %v4620_v15 = vpop.f32.mrf.mxu0  ;;  %v4928_v1 = vrot.slane %v4927_v0, 4  ;;  %v4660_v4 = vmax.f32 %v9769_v33, 0.0 }
 0x4a9   : > { %v6195_v57 = vadd.f32 %v6194_v61, %v6193_v20  ;;  %v4753_v34 = vrot.slane %v4752_v58, 1  ;;  %v4757_v31 = vadd.f32 %v4756_v3, %v4755_v29  ;;  %v9774_v48 = vadd.f32 %v4620_v15, %v4460_v13 }
 0x4aa   : > { %v6196_v22 = vpop.f32.mrf.mxu1  ;;  %v4934_v56 = vadd.f32 %v4848_v52, %v4847_v36  ;;  %v4929_v52 = vadd.f32 %v4928_v1, %v4927_v0  ;;  %6629 = vrsqrt.f32 %v9772_v7  ;;  %v4918_v16 = vrot.slane %v4917_v6, 1 }
 0x4ab   : > { %v4754_v19 = vadd.f32 %v4753_v34, %v4752_v58  ;;  %v4758_v59 = vrot.slane %v4757_v31, 2  ;;  %v4465_v55 = vadd.f32 %v6651_v2, %v6195_v57  ;;  %v4661_v49 = vmax.f32 %v9774_v48, 0.0 }
 0x4ac   : > { %v6197_v8 = vpop.f32.mrf.mxu1  ;;  %v4935_v11 = vrot.slane %v4934_v56, 4  ;;  %v4976_v58 = vmul.f32 0.0625, %v4912_v32  ;;  %vm5031_vm3 = vcmp.eq.f32.partialorder %v9744_v45, inf  ;;  %vm5033_vm4 = vcmp.eq.f32.partialorder %v9744_v45, 0.0 }
 0x4ad   : > { %v9776_v29 = vmul.f32 0.0625, %v4754_v19  ;;  %v4759_v20 = vadd.f32 %v4758_v59, %v4757_v31  ;;  %v6198_v41 = vadd.f32 %v6197_v8, %v6196_v22  ;;  %v9788_v28 = vadd.f32 %v9742_v42, %v4465_v55 }
 0x4ae   : > { %v4762_v3 = vadd.f32 %v4661_v49, %v4660_v4  ;;  %v4936_v34 = vadd.f32 %v4935_v11, %v4934_v56  ;;  %v9800_v22 = vadd.f32 1e-06, %v4976_v58  ;;  %v6626_v56 = vpop.eup %6625  ;;  %v4930_v59 = vrot.slane %v4929_v52, 2 }
 0x4af   : > { %v4817_v37 = vsub.f32 %v4656_v46, %v9776_v29  ;;  %v4818_v51 = vsub.f32 %v4657_v30, %v9776_v29  ;;  %v4760_v35 = vrot.slane %v4759_v20, 1  ;;  %v4468_v61 = vadd.f32 %v6651_v2, %v6198_v41  ;;  %v6628_v1 = vpop.eup %6627 }
 0x4b0   : > { %v4923_v30 = vrot.slane %v4922_v62, 2  ;;  %v4763_v38 = vrot.slane %v4762_v3, 4  ;;  %v4662_v2 = vmax.f32 %v9788_v28, 0.0  ;;  %v4937_v55 = vrot.slane %v4936_v34, 2 }
 0x4b1   : > { %v4849_v46 = vmul.f32 %v4817_v37, %v4817_v37  ;;  %v4850_v36 = vmul.f32 %v4818_v51, %v4818_v51  ;;  %v4761_v12 = vadd.f32 %v4760_v35, %v4759_v20  ;;  %v9795_v57 = vadd.f32 %v6414_v63, %v4468_v61 }
 0x4b2   : > { %v4764_v15 = vadd.f32 %v4763_v38, %v4762_v3  ;;  %v4924_v19 = vadd.f32 %v4923_v30, %v4922_v62  ;;  %6631 = vrsqrt.f32 %v9800_v22  ;;  %v9827_v37 = vsel %vm5026_vm2, %v5027_v21, %v9735_v14 }
 0x4b3   : > { %v4941_v42 = vadd.f32 %v4850_v36, %v4849_v46  ;;  %v9797_v31 = vmul.f32 0.0625, %v4761_v12  ;;  %v4663_v47 = vmax.f32 %v9795_v57, 0.0  ;;  %v4931_v25 = vadd.f32 %v4930_v59, %v4929_v52 }
 0x4b4   : > { %v4765_v8 = vrot.slane %v4764_v15, 2  ;;  %v4925_v51 = vrot.slane %v4924_v19, 1  ;;  %v4938_v54 = vadd.f32 %v4937_v55, %v4936_v34  ;;  %v5034_v46 = vand.u32 2147483648, %v9744_v45 }
 0x4b5   : > { %v4942_v13 = vrot.slane %v4941_v42, 4  ;;  %v4819_v63 = vsub.f32 %v4658_v40, %v9797_v31  ;;  %v4820_v0 = vsub.f32 %v4659_v43, %v9797_v31  ;;  %v4769_v32 = vadd.f32 %v4663_v47, %v4662_v2 }
 0x4b6   : > { %v4766_v39 = vadd.f32 %v4765_v8, %v4764_v15  ;;  %v4919_v43 = vadd.f32 %v4918_v16, %v4917_v6  ;;  %v5030_v6 = vmul.f32 %v6626_v56, %v9744_v45  ;;  %v5037_v14 = vmul.f32 %v6628_v1, %v9751_v44 }
 0x4b7   : > { %v4943_v5 = vadd.f32 %v4942_v13, %v4941_v42  ;;  %v4851_v20 = vmul.f32 %v4819_v63, %v4819_v63  ;;  %v4852_v41 = vmul.f32 %v4820_v0, %v4820_v0  ;;  %v4770_v40 = vrot.slane %v4769_v32, 4  ;;  %v6630_v16 = vpop.eup %6629 }
 0x4b8   : > { %v4767_v35 = vrot.slane %v4766_v39, 1  ;;  %v4977_v36 = vmul.f32 0.0625, %v4919_v43  ;;  %v4926_v12 = vadd.f32 %v4925_v51, %v4924_v19  ;;  %vm5038_vm5 = vcmp.eq.f32.partialorder %v9751_v44, inf }
 0x4b9   : > { %v4944_v62 = vrot.slane %v4943_v5, 2  ;;  %v4948_v11 = vadd.f32 %v4852_v41, %v4851_v20  ;;  %v4771_v58 = vadd.f32 %v4770_v40, %v4769_v32  ;;  %v4932_v52 = vrot.slane %v4931_v25, 1 }
 0x4ba   : > { %v4768_v3 = vadd.f32 %v4767_v35, %v4766_v39  ;;  %v4939_v34 = vrot.slane %v4938_v54, 1  ;;  %v5041_v15 = vand.u32 2147483648, %v9751_v44  ;;  %v5032_v56 = vsel %vm5031_vm3, %v9744_v45, %v5030_v6 }
 0x4bb   : > { %v4949_v23 = vrot.slane %v4948_v11, 4  ;;  %v4772_v61 = vrot.slane %v4771_v58, 2  ;;  %v4945_v50 = vadd.f32 %v4944_v62, %v4943_v5  ;;  %v9847_v19 = vadd.f32 1e-06, %v4977_v36 }
 0x4bc   : > { %v9834_v30 = vmul.f32 0.0625, %v4768_v3  ;;  %v5039_v32 = vsel %vm5038_vm5, %v9751_v44, %v5037_v14  ;;  %v4978_v55 = vmul.f32 0.0625, %v4926_v12  ;;  %v4940_v41 = vadd.f32 %v4939_v34, %v4938_v54 }
 0x4bd   : > { %v4950_v21 = vadd.f32 %v4949_v23, %v4948_v11  ;;  %v4773_v38 = vadd.f32 %v4772_v61, %v4771_v58  ;;  %v4946_v59 = vrot.slane %v4945_v50, 1  ;;  %v5044_v48 = vmul.f32 %v6630_v16, %v9772_v7 }
 0x4be   : > { %v4821_v13 = vsub.f32 %v4660_v4, %v9834_v30  ;;  %v4822_v63 = vsub.f32 %v4661_v49, %v9834_v30  ;;  %v4933_v4 = vadd.f32 %v4932_v52, %v4931_v25  ;;  %v5035_v40 = vsel %vm5033_vm4, %v5034_v46, %v5032_v56 }
 0x4bf   : > { %v4951_v42 = vrot.slane %v4950_v21, 2  ;;  %v4774_v0 = vrot.slane %v4773_v38, 1  ;;  %vm5040_vm11 = vcmp.eq.f32.partialorder %v9751_v44, 0.0  ;;  %v6632_v43 = vpop.eup %6631  ;;  %6633 = vrsqrt.f32 %v9847_v19 }
 0x4c0   : > { %v4853_v5 = vmul.f32 %v4821_v13, %v4821_v13  ;;  %v4854_v20 = vmul.f32 %v4822_v63, %v4822_v63  ;;  %v4947_v62 = vadd.f32 %v4946_v59, %v4945_v50  ;;  %v5042_v11 = vsel %vm5040_vm11, %v5041_v15, %v5039_v32 }
 0x4c1   : > { %v4952_v8 = vadd.f32 %v4951_v42, %v4950_v21  ;;  %v4775_v33 = vadd.f32 %v4774_v0, %v4773_v38  ;;  %vm5045_vm12 = vcmp.eq.f32.partialorder %v9772_v7, inf  ;;  %v9864_v25 = vadd.f32 1e-06, %v4978_v55 }
 0x4c2   : > { %v4955_v49 = vadd.f32 %v4854_v20, %v4853_v5  ;;  %v4979_v44 = vmul.f32 0.0625, %v4933_v4  ;;  %v4980_v54 = vmul.f32 0.0625, %v4940_v41  ;;  %v5046_v23 = vsel %vm5045_vm12, %v9772_v7, %v5044_v48 }
 0x4c3   : > { %v4953_v1 = vrot.slane %v4952_v8, 1  ;;  %v9851_v39 = vmul.f32 0.0625, %v4775_v33  ;;  %v5051_v46 = vmul.f32 %v6632_v43, %v9800_v22  ;;  %v4981_v36 = vmul.f32 0.0625, %v4947_v62 }
 0x4c4   : > { %v4956_v35 = vrot.slane %v4955_v49, 4  ;;  %vm5047_vm15 = vcmp.eq.f32.partialorder %v9772_v7, 0.0  ;;  %v5048_v28 = vand.u32 2147483648, %v9772_v7  ;;  %v5140_v57 = vsel %vm5139_vm9, %v9580_v26, %v9550_v17 }
 0x4c5   : > { %v4954_v51 = vadd.f32 %v4953_v1, %v4952_v8  ;;  %v4823_v58 = vsub.f32 %v4662_v2, %v9851_v39  ;;  %v4824_v45 = vsub.f32 %v4663_v47, %v9851_v39  ;;  %v9875_v21 = vsel %vm5141_vm10, %v9598_v24, %v5140_v57 }
 0x4c6   : > { %v4957_v3 = vadd.f32 %v4956_v35, %v4955_v49  ;;  %6635 = vrsqrt.f32 %v9864_v25  ;;  %v9878_v14 = vadd.f32 1e-06, %v4979_v44  ;;  %v5049_v12 = vsel %vm5047_vm15, %v5048_v28, %v5046_v23 }
 0x4c7   : > { %v4855_v61 = vmul.f32 %v4823_v58, %v4823_v58  ;;  %v4856_v6 = vmul.f32 %v4824_v45, %v4824_v45  ;;  %v4982_v2 = vmul.f32 0.0625, %v4954_v51  ;;  %vm5052_vm0 = vcmp.eq.f32.partialorder %v9800_v22, inf }
 0x4c8   : > { %v4958_v47 = vrot.slane %v4957_v3, 2  ;;  %v9881_v38 = vadd.f32 1e-06, %v4980_v54  ;;  %v5053_v17 = vsel %vm5052_vm0, %v9800_v22, %v5051_v46  ;;  %v9884_v26 = vadd.f32 1e-06, %v4981_v36 }
 0x4c9   : > { %v4962_v50 = vadd.f32 %v4856_v6, %v4855_v61  ;;  %vm5054_vm1 = vcmp.eq.f32.partialorder %v9800_v22, 0.0  ;;  %v5055_v24 = vand.u32 2147483648, %v9800_v22  ;;  %v5169_v34 = vsel %vm5131_vm7, %v9819_v18, %v9498_v27 }
 0x4ca   : > { %v4959_v7 = vadd.f32 %v4958_v47, %v4957_v3  ;;  %v9891_v42 = vadd.f32 1e-06, %v4982_v2  ;;  %v5170_v13 = vsel %vm5133_vm8, %v9827_v37, %v5169_v34  ;;  %6637 = vrsqrt.f32 %v9878_v14 }
 0x4cb   : > { %v4963_v52 = vrot.slane %v4962_v50, 4  ;;  %v5056_v63 = vsel %vm5054_vm1, %v5055_v24, %v5053_v17  ;;  %v5171_v0 = vsel %vm5135_vm13, %v5035_v40, %v5170_v13  ;;  %6639 = vrsqrt.f32 %v9881_v38 }
 0x4cc   : > { %v4960_v15 = vrot.slane %v4959_v7, 1  ;;  %v5172_v59 = vsel %vm5137_vm14, %v5042_v11, %v5171_v0  ;;  %6641 = vrsqrt.f32 %v9884_v26  ;;  %v6634_v18 = vpop.eup %6633  ;;  %vm5059_vm2 = vcmp.eq.f32.partialorder %v9847_v19, inf }
 0x4cd   : > { %v4964_v16 = vadd.f32 %v4963_v52, %v4962_v50  ;;  %v5173_v27 = vsel %vm5139_vm9, %v5049_v12, %v5172_v59  ;;  %6643 = vrsqrt.f32 %v9891_v42  ;;  %v5058_v1 = vmul.f32 %v6634_v18, %v9847_v19 }
 0x4ce   : > { %v4961_v56 = vadd.f32 %v4960_v15, %v4959_v7  ;;  %v9903_v37 = vsel %vm5141_vm10, %v5056_v63, %v5173_v27  ;;  %vm5066_vm3 = vcmp.eq.f32.partialorder %v9864_v25, inf  ;;  %v5143_v35 = vsel %vm5129_vm6, %v9705_v10, %v9678_v9 }
 0x4cf   : > { %v4965_v22 = vrot.slane %v4964_v16, 2  ;;  %v5060_v11 = vsel %vm5059_vm2, %v9847_v19, %v5058_v1  ;;  %v5062_v58 = vand.u32 2147483648, %v9847_v19  ;;  %v5144_v54 = vsel %vm5131_vm7, %v9723_v60, %v5143_v35 }
 0x4d0   : > { %v4983_v8 = vmul.f32 0.0625, %v4961_v56  ;;  %vm5061_vm4 = vcmp.eq.f32.partialorder %v9847_v19, 0.0  ;;  %v5069_v23 = vand.u32 2147483648, %v9864_v25  ;;  %vm5068_vm5 = vcmp.eq.f32.partialorder %v9864_v25, 0.0 }
 0x4d1   : > { %v4966_v32 = vadd.f32 %v4965_v22, %v4964_v16  ;;  %v5063_v61 = vsel %vm5061_vm4, %v5062_v58, %v5060_v11  ;;  %vm5073_vm11 = vcmp.eq.f32.partialorder %v9878_v14, inf  ;;  %vm5075_vm12 = vcmp.eq.f32.partialorder %v9878_v14, 0.0 }
 0x4d2   : > { %v9905_v55 = vadd.f32 1e-06, %v4983_v8  ;;  %vm5080_vm15 = vcmp.eq.f32.partialorder %v9881_v38, inf  ;;  %v5076_v60 = vand.u32 2147483648, %v9878_v14  ;;  %vm5087_vm0 = vcmp.eq.f32.partialorder %v9884_v26, inf }
 0x4d3   : > { %v4967_v5 = vrot.slane %v4966_v32, 1  ;;  %v6636_v33 = vpop.eup %6635  ;;  %vm5082_vm1 = vcmp.eq.f32.partialorder %v9881_v38, 0.0  ;;  %v5083_v36 = vand.u32 2147483648, %v9881_v38  ;;  %vm5094_vm2 = vcmp.eq.f32.partialorder %v9891_v42, inf }
 0x4d4   : > { %6645 = vrsqrt.f32 %v9905_v55  ;;  %v5065_v49 = vmul.f32 %v6636_v33, %v9864_v25  ;;  %v5090_v2 = vand.u32 2147483648, %v9884_v26  ;;  %vm5089_vm4 = vcmp.eq.f32.partialorder %v9884_v26, 0.0 }
 0x4d5   : > { %v4968_v20 = vadd.f32 %v4967_v5, %v4966_v32  ;;  %v5145_v24 = vsel %vm5133_vm8, %v9753_v53, %v5144_v54 }
 0x4d6   : > { %v5067_v45 = vsel %vm5066_vm3, %v9864_v25, %v5065_v49  ;;  %vm5101_vm3 = vcmp.eq.f32.partialorder %v9905_v55, inf  ;;  %v5146_v15 = vsel %vm5135_vm13, %v9776_v29, %v5145_v24 }
 0x4d7   : > { %v4984_v4 = vmul.f32 0.0625, %v4968_v20  ;;  %v6638_v48 = vpop.eup %6637  ;;  %v5070_v6 = vsel %vm5068_vm5, %v5069_v23, %v5067_v45  ;;  %vm5096_vm5 = vcmp.eq.f32.partialorder %v9891_v42, 0.0  ;;  %v5147_v53 = vsel %vm5137_vm14, %v9797_v31, %v5146_v15  ;;  %v5218_v20 = vld [vmem:[%s10037_s10] sm:$0x3] }
 0x4d8   : > { %v6640_v40 = vpop.eup %6639  ;;  %v5072_v51 = vmul.f32 %v6638_v48, %v9878_v14  ;;  %v5175_v52 = vsel %vm5129_vm6, %v5070_v6, %v5063_v61  ;;  %v5148_v29 = vsel %vm5139_vm9, %v9834_v30, %v5147_v53 }
 0x4d9   : > { %v9908_v41 = vadd.f32 1e-06, %v4984_v4  ;;  %v6642_v43 = vpop.eup %6641  ;;  %v5079_v44 = vmul.f32 %v6640_v40, %v9881_v38  ;;  %v5149_v27 = vsel %vm5141_vm10, %v9851_v39, %v5148_v29 }
 0x4da   : > { %v6644_v62 = vpop.eup %6643  ;;  %v5086_v3 = vmul.f32 %v6642_v43, %v9884_v26  ;;  %v5074_v46 = vsel %vm5073_vm11, %v9878_v14, %v5072_v51  ;;  %v5097_v14 = vand.u32 2147483648, %v9891_v42  ;;  %vm5103_vm11 = vcmp.eq.f32.partialorder %v9905_v55, 0.0 }
 0x4db   : > { %6647 = vrsqrt.f32 %v9908_v41  ;;  %v5093_v9 = vmul.f32 %v6644_v62, %v9891_v42  ;;  %v5081_v19 = vsel %vm5080_vm15, %v9881_v38, %v5079_v44  ;;  %v5077_v57 = vsel %vm5075_vm12, %v5076_v60, %v5074_v46 }
 0x4dc   : > { %v5088_v28 = vsel %vm5087_vm0, %v9884_v26, %v5086_v3  ;;  %v5084_v50 = vsel %vm5082_vm1, %v5083_v36, %v5081_v19  ;;  %v5104_v38 = vand.u32 2147483648, %v9905_v55  ;;  %v5176_v26 = vsel %vm5131_vm7, %v5077_v57, %v5175_v52 }
 0x4dd   : > { %v5095_v47 = vsel %vm5094_vm2, %v9891_v42, %v5093_v9  ;;  %v5091_v7 = vsel %vm5089_vm4, %v5090_v2, %v5088_v28  ;;  %v5177_v42 = vsel %vm5133_vm8, %v5084_v50, %v5176_v26  ;;  %vm5108_vm12 = vcmp.eq.f32.partialorder %v9908_v41, inf }
 0x4de   : > { %v5098_v34 = vsel %vm5096_vm5, %v5097_v14, %v5095_v47  ;;  %v5111_v63 = vand.u32 2147483648, %v9908_v41  ;;  %v5178_v0 = vsel %vm5135_vm13, %v5091_v7, %v5177_v42  ;;  %vm5110_vm6 = vcmp.eq.f32.partialorder %v9908_v41, 0.0 }
 0x4df   : > { %v5179_v22 = vsel %vm5137_vm14, %v5098_v34, %v5178_v0  ;;  %v5184_v32 = vpack.c.bf16 %v5149_v27, %v9875_v21 }
 0x4e1   : > { %v6646_v10 = vpop.eup %6645 }
 0x4e2   : > { %v5100_v25 = vmul.f32 %v6646_v10, %v9905_v55 }
 0x4e4   : > { %v5102_v12 = vsel %vm5101_vm3, %v9905_v55, %v5100_v25  ;;  %v5220_v55 = vlaneseq }
 0x4e5   : > { %v5105_v16 = vsel %vm5103_vm11, %v5104_v38, %v5102_v12 }
 0x4e6   : > { %v5180_v18 = vsel %vm5139_vm9, %v5105_v16, %v5179_v22  ;;  %v5221_v5 = vshrl.u32 %v5220_v55, 7 }
 0x4e8   : > { %v6648_v17 = vpop.eup %6647  ;;  %v5222_v30 = vsub.s32 0, %v5221_v5  ;;  %v5226_v39 = vsub.s32 1, %v5221_v5 }
 0x4e9   : > { %v5107_v13 = vmul.f32 %v6648_v17, %v9908_v41 }
 0x4ea   : > { %v5223_v33 = vrot.slane %v5218_v20, %v5222_v30  ;;  %v5227_v4 = vrot.slane %v5218_v20, %v5226_v39 }
 0x4eb   : > { %v5109_v56 = vsel %vm5108_vm12, %v9908_v41, %v5107_v13 }
 0x4ec   : > { %v5112_v59 = vsel %vm5110_vm6, %v5111_v63, %v5109_v56 }
 0x4ed   : > { %v5181_v31 = vsel %vm5141_vm10, %v5112_v59, %v5180_v18 }
 0x4ee   : > { %v5185_v8 = vpack.c.bf16 %v5181_v31, %v9903_v37 }
 0x4f0   : > { %5422 = vmatprep.mubr.bf16.mxu0 %v5185_v8 }
 0x4f1   : > { %5423 = vmatmul.mubr.bf16.vlgmr.msra.gmra.mxu0 %v5184_v32 }
 0x5b1   : > { %v5424_v41 = vpop.f32.mrf.mxu0 }
 0x5b2   : > { %v5425_v1 = vadd.f32 %v5424_v41, %v5223_v33 }
 0x5b3   : > { %v5426_v37 = vpop.f32.mrf.mxu0 }
 0x5b4   : > { %5433 = vst [vmem:[%s382_s14] sm:$0xff] %v5425_v1  ;;  %v5427_v21 = vadd.f32 %v5426_v37, %v5227_v4 }
 0x5b5   : > { %v5428_v48 = vpop.f32.mrf.mxu0 }
 0x5b6   : > { %5434 = vst [vmem:[%s382_s14 + $0x8] sm:$0xff] %v5427_v21  ;;  %v5429_v49 = vadd.f32 %v5428_v48, %v5223_v33 }
 0x5b7   : > { %v5430_v40 = vpop.f32.mrf.mxu0 }
 0x5b8   : > { %5435 = vst [vmem:[%s382_s14 + $0x10] sm:$0xff] %v5429_v49  ;;  %v5431_v43 = vadd.f32 %v5430_v40, %v5227_v4 }
 0x5ba   : > { %5436 = vst [vmem:[%s382_s14 + $0x18] sm:$0xff] %v5431_v43 }
 0x5bb   : > { %6665 = shalt.err (!%p6662_p3)
}
 0x5bc   : > { %s6666_s29 = scalar_lea.hbm %s9985_s24, 512  ;;  %s6670_s16 = scalar_lea.hbm %s10038_s11, 1024 }
 0x5bd   : > { %p6667_p4 = scmp.ne.s32.totalorder %s9985_s24, %s6666_s29  ;;  %p6671_p9 = scmp.lt.s32.totalorder %s9985_s24, %s10038_s11 }
 0x5be   : > { %p6672_p10 = scmp.lt.s32.totalorder %s6670_s16, %s6666_s29 }
 0x5bf   : > { %p6668_p7 = pnand %p6667_p4, %p6816_p5 }
 0x5c0   : > { %p6673_p11 = por %p6672_p10, %p6671_p9 }
 0x5c1   : > { %p6669_p8 = pneg %p6668_p7 }
 0x5c3   : > { %p6674_p12 = pnand %p6673_p11, %p6669_p8 }
 0x5c5   : > { %6677 = shalt.err (!%p6674_p12)
}
 0x5c6   : > { %s6716_s0 = smov 256   ;;  %s6717_s30 = smov 16  }
 0x5c7   : > { %6415 = dma.vmem_to_hbm [thread:$0]  (%p6816_p5), %s9980_s15, 512, %s9985_s24, %s9987_s25, %s6716_s0, %s6716_s0, %s6717_s30  }
 0x5c8 PF: > { %p6421_p13 = scmp.ge.s32.totalorder %s6712_s20, 2  ;;  %s5467_s13 = sand.u32 1, %s6700_s17  }
 0x5c9   : > { %s5468_s29 = scalar_lea.sflag [#allocation3], %s5467_s13 }
 0x5ca   : > { %p6418_p0 = pnand %p6421_p13, %p6820_p6 }
 0x5cc   : > { %p6419_p1 = pneg %p6418_p0 }
 0x5ce   : > { %6695 = dma.done.wait (%p6419_p1), %s5468_s29, 512  }
 0x5cf   : > { %6697 = vsyncadd (%p6419_p1), %s5468_s29, 4294966784  ;;  %p21_p2 = scmp.ge.s32.totalorder %s6803_s23, 4   ;;  %s10271_s17 = smov %s6704_s18 }
 0x5d0   : > { %s10272_s18 = smov %s6708_s19  ;;  %s10273_s19 = smov %s6814_s26 }
 0x5d1   : > { %s10274_s20 = smov %s6803_s23  ;;  %23 = sbr.rel (!%p21_p2) target bundleno = 5 (0x5), region = 99 }
 0x5d6   :  { %5473 = vsyncpa [#allocation3], 1 }
 0x5d7   :  { %5475 = vsyncpa [#allocation3 + $0x1], 1 }

</bundles_post_ra>
